<compile_context>
chip_gen: v6e
topology: v6e:2x2x1
jax: 0.10.0
libtpu: 0.0.40
codegen_flags: <defaults>
</compile_context>

<pallas_src>
import jax
import jax.numpy as jnp
from jax.experimental import pallas as pl
from jax.experimental.pallas import tpu as pltpu

KERNEL_SIZE = 9
PAD = 8
GROW = 2 * PAD - KERNEL_SIZE + 1        # +8 length per conv layer
N_LAYERS = 3
LN_EPS = 1e-5                           # PyTorch LayerNorm default
MATMUL_DTYPE = jnp.bfloat16             # MXU operand dtype (accumulate in f32)


# ---------------------------------------------------------------------------
# Kernel
# ---------------------------------------------------------------------------
def aligner_kernel(x_ref,
                   w1_ref, b1_ref, g1_ref, be1_ref,
                   w2_ref, b2_ref, g2_ref, be2_ref,
                   w3_ref, b3_ref, g3_ref, be3_ref,
                   wo_ref, bo_ref, noise_ref,
                   o_ref,
                   pad_ref):
  """Full Aligner forward for one batch block, all layers fused."""
  BB, T, C = x_ref.shape

  # Zero the padded-activation scratch once per step.  Every layer only
  # overwrites its interior rows, so the halo rows stay zero for all layers.
  pad_ref[...] = jnp.zeros_like(pad_ref)

  layer_params = ((w1_ref, b1_ref, g1_ref, be1_ref),
                  (w2_ref, b2_ref, g2_ref, be2_ref),
                  (w3_ref, b3_ref, g3_ref, be3_ref))

  for b in range(BB):                                # whole batch per grid step
    y = x_ref[b].astype(jnp.float32)                 # (T, C)
    L = T
    for w_ref, b_ref, g_ref, be_ref in layer_params:
      Lout = L + GROW
      # Write current activation into the (pre-zeroed) halo scratch interior.
      pad_ref[b, PAD:PAD + L, :] = y.astype(pad_ref.dtype)

      # im2col: 9 shifted windows concatenated on the lane axis -> one wide
      # (Lout, K*C) @ (K*C, C) MXU matmul instead of 9 narrow ones.
      cols = [pad_ref[b, k:k + Lout, :] for k in range(KERNEL_SIZE)]
      im = jnp.concatenate(cols, axis=-1)            # (Lout, K*C) f32
      acc = jnp.dot(im.astype(w_ref.dtype), w_ref[...],
                    preferred_element_type=jnp.float32)   # (Lout, C) f32
      acc = acc + b_ref[...]                         # conv bias (1, C)

      # One-pass LayerNorm over channels (f32 VPU math, rsqrt on the EUP).
      mean = jnp.mean(acc, axis=-1, keepdims=True)
      var = jnp.mean(acc * acc, axis=-1, keepdims=True) - mean * mean
      y = (acc - mean) * jax.lax.rsqrt(var + LN_EPS) * g_ref[...] + be_ref[...]
      # TODO(synk): nn.Dropout(0.1) is identity at inference; not modeled here.
      L = Lout

    # Final projection, padded to a lane-dense (>=128) output width.
    logits = jnp.dot(y.astype(wo_ref.dtype), wo_ref[...],
                     preferred_element_type=jnp.float32)   # (Tout, Mp)
    logits = logits + bo_ref[...] + noise_ref[b]           # additive gaussian noise
    o_ref[b] = jax.nn.sigmoid(logits).astype(o_ref.dtype)


# ---------------------------------------------------------------------------
# Wrapper
# ---------------------------------------------------------------------------
def aligner_forward(x, params, noise, *, batch_block=None,
                    matmul_dtype=MATMUL_DTYPE):
  B, T, C = x.shape
  M = params["wo"].shape[-1]
  Tout = T + N_LAYERS * GROW
  Mp = ((M + 127) // 128) * 128                       # lane-dense output width
  bb = B if batch_block is None else batch_block
  assert B % bb == 0, (B, bb)

  def rep_spec(shape):                                # replicated (weights)
    nd = len(shape)
    return pl.BlockSpec(shape, lambda b, _nd=nd: (0,) * _nd)

  in_specs = [pl.BlockSpec((bb, T, C), lambda b: (b, 0, 0))]
  args = [x]
  for i in (1, 2, 3):
    # (K, C_in, C_out) -> single (K*C_in, C_out) im2col weight, bf16 operands.
    wi = params[f"w{i}"].reshape(KERNEL_SIZE * C, C).astype(matmul_dtype)
    for p in (wi, params[f"b{i}"], params[f"g{i}"], params[f"beta{i}"]):
      in_specs.append(rep_spec(p.shape))
      args.append(p)

  # Pad the projection / noise / output to Mp lanes; slice back after the call.
  wo_p = jnp.pad(params["wo"], ((0, 0), (0, Mp - M))).astype(matmul_dtype)
  bo_p = jnp.pad(params["bo"], ((0, 0), (0, Mp - M)))
  noise_p = jnp.pad(noise, ((0, 0), (0, 0), (0, Mp - M)))
  in_specs += [rep_spec(wo_p.shape), rep_spec(bo_p.shape),
               pl.BlockSpec((bb, Tout, Mp), lambda b: (b, 0, 0))]
  args += [wo_p, bo_p, noise_p]

  # Halo scratch: big enough for the largest padded layer input (layer 3).
  pad_rows = T + 2 * GROW + 2 * PAD

  out = pl.pallas_call(
      aligner_kernel,
      out_shape=jax.ShapeDtypeStruct((B, Tout, Mp), jnp.float32),
      grid=(B // bb,),
      in_specs=in_specs,
      out_specs=pl.BlockSpec((bb, Tout, Mp), lambda b: (b, 0, 0)),
      scratch_shapes=[pltpu.VMEM((bb, pad_rows, C), jnp.float32)],
      compiler_params=pltpu.CompilerParams(
          dimension_semantics=("parallel",)),
  )(*args)
  return out[..., :M]


# ---------------------------------------------------------------------------
# Pure-JAX reference (same math, f32 everywhere) for a sanity check.
# ---------------------------------------------------------------------------
def reference_forward(x, params, noise):
  def conv_ln(y, w, b, g, beta):
    B, L, C = y.shape
    Lout = L + GROW
    ypad = jnp.pad(y, ((0, 0), (PAD, PAD), (0, 0)))
    acc = jnp.zeros((B, Lout, C), jnp.float32)
    for k in range(KERNEL_SIZE):
      acc = acc + jnp.einsum("blc,cd->bld", ypad[:, k:k + Lout, :], w[k])
    acc = acc + b
    mean = acc.mean(-1, keepdims=True)
    var = ((acc - mean) ** 2).mean(-1, keepdims=True)
    return (acc - mean) / jnp.sqrt(var + LN_EPS) * g + beta

  y = x
  for i in (1, 2, 3):
    y = conv_ln(y, params[f"w{i}"], params[f"b{i}"],
                params[f"g{i}"], params[f"beta{i}"])
  logits = y @ params["wo"] + params["bo"] + noise
  return jax.nn.sigmoid(logits)


# ---------------------------------------------------------------------------
# Deterministic parameter init + demo run
# ---------------------------------------------------------------------------
def init_params(key, C, M):
  params = {}
  keys = jax.random.split(key, 8)
  for i, k in zip((1, 2, 3), keys[:3]):
    kw, kb = jax.random.split(k)
    params[f"w{i}"] = (jax.random.normal(kw, (KERNEL_SIZE, C, C),
                                         jnp.float32) * 0.05)
    params[f"b{i}"] = (jax.random.normal(kb, (1, C), jnp.float32) * 0.01)
    params[f"g{i}"] = jnp.ones((1, C), jnp.float32)       # LayerNorm weight
    params[f"beta{i}"] = jnp.zeros((1, C), jnp.float32)   # LayerNorm bias
  params["wo"] = jax.random.normal(keys[3], (C, M), jnp.float32) * 0.05
  params["bo"] = jax.random.normal(keys[4], (1, M), jnp.float32) * 0.01
  return params


if __name__ == "__main__":
  B, T, C, M = 2, 16, 32, 8            # batch, seq, d_model_e, max duration M
  Tout = T + N_LAYERS * GROW

  key = jax.random.PRNGKey(0)
  kx, kp, kn = jax.random.split(key, 3)
  x = jax.random.normal(kx, (B, T, C), jnp.float32)
  params = init_params(kp, C, M)
  # torch.randn-style additive noise, generated deterministically on the host
  # (kept host-side + lane-padded so the kernel stays bit-checkable; in-kernel
  # pltpu.stateful_normal is a drop-in alternative that removes this input).
  noise = jax.random.normal(kn, (B, Tout, M), jnp.float32)

  out = aligner_forward(x, params, noise)
  out = jax.block_until_ready(out)

  ref = reference_forward(x, params, noise)
  assert out.shape == (B, Tout, M), out.shape
  # bf16 MXU operands vs f32 reference -> loose-but-meaningful tolerance.
  max_err = float(jnp.max(jnp.abs(out - ref)))
  assert max_err < 3e-2, max_err

  print("KERNEL_OK")
</pallas_src>

<mosaic_0001>
module attributes {stable_mosaic.version = 11 : i64} {
  func.func @aligner_kernel(%arg0: i32, %arg1: memref<2x16x32xf32, #tpu.memory_space<vmem>>, %arg2: memref<288x32xbf16, #tpu.memory_space<vmem>>, %arg3: memref<1x32xf32, #tpu.memory_space<vmem>>, %arg4: memref<1x32xf32, #tpu.memory_space<vmem>>, %arg5: memref<1x32xf32, #tpu.memory_space<vmem>>, %arg6: memref<288x32xbf16, #tpu.memory_space<vmem>>, %arg7: memref<1x32xf32, #tpu.memory_space<vmem>>, %arg8: memref<1x32xf32, #tpu.memory_space<vmem>>, %arg9: memref<1x32xf32, #tpu.memory_space<vmem>>, %arg10: memref<288x32xbf16, #tpu.memory_space<vmem>>, %arg11: memref<1x32xf32, #tpu.memory_space<vmem>>, %arg12: memref<1x32xf32, #tpu.memory_space<vmem>>, %arg13: memref<1x32xf32, #tpu.memory_space<vmem>>, %arg14: memref<32x128xbf16, #tpu.memory_space<vmem>>, %arg15: memref<1x128xf32, #tpu.memory_space<vmem>>, %arg16: memref<2x40x128xf32, #tpu.memory_space<vmem>>, %arg17: memref<2x40x128xf32, #tpu.memory_space<vmem>>, %arg18: memref<2x48x32xf32, #tpu.memory_space<vmem>>) attributes {dimension_semantics = [#tpu.dimension_semantics<parallel>], iteration_bounds = array<i64: 1>, scalar_prefetch = 0 : i64, scratch_operands = 1 : i64, tpu.core_type = #tpu.core_type<tc>, window_params = [{transform_indices = @transform_0, window_bounds = array<i64: 2, 16, 32>}, {pipeline_mode = #tpu.pipeline_mode<synchronous>, transform_indices = @transform_1, window_bounds = array<i64: 288, 32>}, {pipeline_mode = #tpu.pipeline_mode<synchronous>, transform_indices = @transform_2, window_bounds = array<i64: 1, 32>}, {pipeline_mode = #tpu.pipeline_mode<synchronous>, transform_indices = @transform_3, window_bounds = array<i64: 1, 32>}, {pipeline_mode = #tpu.pipeline_mode<synchronous>, transform_indices = @transform_4, window_bounds = array<i64: 1, 32>}, {pipeline_mode = #tpu.pipeline_mode<synchronous>, transform_indices = @transform_5, window_bounds = array<i64: 288, 32>}, {pipeline_mode = #tpu.pipeline_mode<synchronous>, transform_indices = @transform_6, window_bounds = array<i64: 1, 32>}, {pipeline_mode = #tpu.pipeline_mode<synchronous>, transform_indices = @transform_7, window_bounds = array<i64: 1, 32>}, {pipeline_mode = #tpu.pipeline_mode<synchronous>, transform_indices = @transform_8, window_bounds = array<i64: 1, 32>}, {pipeline_mode = #tpu.pipeline_mode<synchronous>, transform_indices = @transform_9, window_bounds = array<i64: 288, 32>}, {pipeline_mode = #tpu.pipeline_mode<synchronous>, transform_indices = @transform_10, window_bounds = array<i64: 1, 32>}, {pipeline_mode = #tpu.pipeline_mode<synchronous>, transform_indices = @transform_11, window_bounds = array<i64: 1, 32>}, {pipeline_mode = #tpu.pipeline_mode<synchronous>, transform_indices = @transform_12, window_bounds = array<i64: 1, 32>}, {pipeline_mode = #tpu.pipeline_mode<synchronous>, transform_indices = @transform_13, window_bounds = array<i64: 32, 128>}, {pipeline_mode = #tpu.pipeline_mode<synchronous>, transform_indices = @transform_14, window_bounds = array<i64: 1, 128>}, {transform_indices = @transform_15, window_bounds = array<i64: 2, 40, 128>}, {transform_indices = @transform_16, window_bounds = array<i64: 2, 40, 128>}]} {
    %cst = arith.constant 0.000000e+00 : f32
    %0 = vector.broadcast %cst : f32 to vector<2x48x32xf32>
    %c0 = arith.constant 0 : index
    %c0_0 = arith.constant 0 : index
    %c0_1 = arith.constant 0 : index
    %1 = vector.load %arg18[%c0, %c0_0, %c0_1] : memref<2x48x32xf32, #tpu.memory_space<vmem>>, vector<2x48x32xf32>
    tpu.vector_store %arg18[%c0, %c0_0, %c0_1], %0 {strides = array<i32>} : memref<2x48x32xf32, #tpu.memory_space<vmem>>, vector<2x48x32xf32>,
    %c0_2 = arith.constant 0 : index
    %c0_3 = arith.constant 0 : index
    %c0_4 = arith.constant 0 : index
    %2 = vector.load %arg1[%c0_2, %c0_3, %c0_4] : memref<2x16x32xf32, #tpu.memory_space<vmem>>, vector<1x16x32xf32>
    %3 = vector.shape_cast %2 : vector<1x16x32xf32> to vector<16x32xf32>
    %c0_5 = arith.constant 0 : index
    %c8 = arith.constant 8 : index
    %c0_6 = arith.constant 0 : index
    %4 = vector.load %arg18[%c0_5, %c8, %c0_6] : memref<2x48x32xf32, #tpu.memory_space<vmem>>, vector<1x16x32xf32>
    %5 = vector.shape_cast %4 : vector<1x16x32xf32> to vector<16x32xf32>
    %6 = vector.shape_cast %3 : vector<16x32xf32> to vector<1x16x32xf32>
    tpu.vector_store %arg18[%c0_5, %c8, %c0_6], %6 {strides = array<i32>} : memref<2x48x32xf32, #tpu.memory_space<vmem>>, vector<1x16x32xf32>,
    %c0_7 = arith.constant 0 : index
    %c0_8 = arith.constant 0 : index
    %c0_9 = arith.constant 0 : index
    %7 = vector.load %arg18[%c0_7, %c0_8, %c0_9] : memref<2x48x32xf32, #tpu.memory_space<vmem>>, vector<1x24x32xf32>
    %8 = vector.shape_cast %7 : vector<1x24x32xf32> to vector<24x32xf32>
    %c0_10 = arith.constant 0 : index
    %c1 = arith.constant 1 : index
    %c0_11 = arith.constant 0 : index
    %9 = vector.load %arg18[%c0_10, %c1, %c0_11] : memref<2x48x32xf32, #tpu.memory_space<vmem>>, vector<1x24x32xf32>
    %10 = vector.shape_cast %9 : vector<1x24x32xf32> to vector<24x32xf32>
    %c0_12 = arith.constant 0 : index
    %c2 = arith.constant 2 : index
    %c0_13 = arith.constant 0 : index
    %11 = vector.load %arg18[%c0_12, %c2, %c0_13] : memref<2x48x32xf32, #tpu.memory_space<vmem>>, vector<1x24x32xf32>
    %12 = vector.shape_cast %11 : vector<1x24x32xf32> to vector<24x32xf32>
    %c0_14 = arith.constant 0 : index
    %c3 = arith.constant 3 : index
    %c0_15 = arith.constant 0 : index
    %13 = vector.load %arg18[%c0_14, %c3, %c0_15] : memref<2x48x32xf32, #tpu.memory_space<vmem>>, vector<1x24x32xf32>
    %14 = vector.shape_cast %13 : vector<1x24x32xf32> to vector<24x32xf32>
    %c0_16 = arith.constant 0 : index
    %c4 = arith.constant 4 : index
    %c0_17 = arith.constant 0 : index
    %15 = vector.load %arg18[%c0_16, %c4, %c0_17] : memref<2x48x32xf32, #tpu.memory_space<vmem>>, vector<1x24x32xf32>
    %16 = vector.shape_cast %15 : vector<1x24x32xf32> to vector<24x32xf32>
    %c0_18 = arith.constant 0 : index
    %c5 = arith.constant 5 : index
    %c0_19 = arith.constant 0 : index
    %17 = vector.load %arg18[%c0_18, %c5, %c0_19] : memref<2x48x32xf32, #tpu.memory_space<vmem>>, vector<1x24x32xf32>
    %18 = vector.shape_cast %17 : vector<1x24x32xf32> to vector<24x32xf32>
    %c0_20 = arith.constant 0 : index
    %c6 = arith.constant 6 : index
    %c0_21 = arith.constant 0 : index
    %19 = vector.load %arg18[%c0_20, %c6, %c0_21] : memref<2x48x32xf32, #tpu.memory_space<vmem>>, vector<1x24x32xf32>
    %20 = vector.shape_cast %19 : vector<1x24x32xf32> to vector<24x32xf32>
    %c0_22 = arith.constant 0 : index
    %c7 = arith.constant 7 : index
    %c0_23 = arith.constant 0 : index
    %21 = vector.load %arg18[%c0_22, %c7, %c0_23] : memref<2x48x32xf32, #tpu.memory_space<vmem>>, vector<1x24x32xf32>
    %22 = vector.shape_cast %21 : vector<1x24x32xf32> to vector<24x32xf32>
    %c0_24 = arith.constant 0 : index
    %c8_25 = arith.constant 8 : index
    %c0_26 = arith.constant 0 : index
    %23 = vector.load %arg18[%c0_24, %c8_25, %c0_26] : memref<2x48x32xf32, #tpu.memory_space<vmem>>, vector<1x24x32xf32>
    %24 = vector.shape_cast %23 : vector<1x24x32xf32> to vector<24x32xf32>
    %25 = tpu.concatenate %8, %10, %12, %14, %16, %18, %20, %22, %24 in 1 : vector<24x32xf32>, vector<24x32xf32>, vector<24x32xf32>, vector<24x32xf32>, vector<24x32xf32>, vector<24x32xf32>, vector<24x32xf32>, vector<24x32xf32>, vector<24x32xf32> -> vector<24x288xf32>
    %26 = arith.truncf %25 : vector<24x288xf32> to vector<24x288xbf16>
    %c0_27 = arith.constant 0 : index
    %c0_28 = arith.constant 0 : index
    %27 = vector.load %arg2[%c0_27, %c0_28] : memref<288x32xbf16, #tpu.memory_space<vmem>>, vector<288x32xbf16>
    %cst_29 = arith.constant dense<0.000000e+00> : vector<24x32xf32>
    %28 = tpu.matmul %26, %27, %cst_29 {dimension_numbers = #tpu.dot_dimension_numbers<[1], [0], [0], [1], [0, 0, 1, 1], [], []>} : vector<24x288xbf16>, vector<288x32xbf16>, vector<24x32xf32> -> vector<24x32xf32>
    %c0_30 = arith.constant 0 : index
    %c0_31 = arith.constant 0 : index
    %29 = vector.load %arg3[%c0_30, %c0_31] : memref<1x32xf32, #tpu.memory_space<vmem>>, vector<1x32xf32>
    %30 = vector.broadcast %29 : vector<1x32xf32> to vector<24x32xf32>
    %31 = arith.addf %28, %30 : vector<24x32xf32>
    %cst_32 = arith.constant dense<0.000000e+00> : vector<24xf32>
    %32 = vector.multi_reduction <add>, %31, %cst_32 [1] : vector<24x32xf32> to vector<24xf32>
    %33 = vector.shape_cast %32 : vector<24xf32> to vector<24x1xf32>
    %cst_33 = arith.constant 3.200000e+01 : f32
    %34 = vector.broadcast %cst_33 : f32 to vector<24x1xf32>
    %35 = arith.divf %33, %34 : vector<24x1xf32>
    %36 = arith.mulf %31, %31 : vector<24x32xf32>
    %cst_34 = arith.constant dense<0.000000e+00> : vector<24xf32>
    %37 = vector.multi_reduction <add>, %36, %cst_34 [1] : vector<24x32xf32> to vector<24xf32>
    %38 = vector.shape_cast %37 : vector<24xf32> to vector<24x1xf32>
    %cst_35 = arith.constant 3.200000e+01 : f32
    %39 = vector.broadcast %cst_35 : f32 to vector<24x1xf32>
    %40 = arith.divf %38, %39 : vector<24x1xf32>
    %41 = arith.mulf %35, %35 : vector<24x1xf32>
    %42 = arith.subf %40, %41 : vector<24x1xf32>
    %43 = vector.broadcast %35 : vector<24x1xf32> to vector<24x32xf32>
    %44 = arith.subf %31, %43 : vector<24x32xf32>
    %cst_36 = arith.constant 9.99999974E-6 : f32
    %45 = vector.broadcast %cst_36 : f32 to vector<24x1xf32>
    %46 = arith.addf %42, %45 : vector<24x1xf32>
    %47 = math.rsqrt %46 : vector<24x1xf32>
    %48 = vector.broadcast %47 : vector<24x1xf32> to vector<24x32xf32>
    %49 = arith.mulf %44, %48 : vector<24x32xf32>
    %c0_37 = arith.constant 0 : index
    %c0_38 = arith.constant 0 : index
    %50 = vector.load %arg4[%c0_37, %c0_38] : memref<1x32xf32, #tpu.memory_space<vmem>>, vector<1x32xf32>
    %51 = vector.broadcast %50 : vector<1x32xf32> to vector<24x32xf32>
    %52 = arith.mulf %49, %51 : vector<24x32xf32>
    %c0_39 = arith.constant 0 : index
    %c0_40 = arith.constant 0 : index
    %53 = vector.load %arg5[%c0_39, %c0_40] : memref<1x32xf32, #tpu.memory_space<vmem>>, vector<1x32xf32>
    %54 = vector.broadcast %53 : vector<1x32xf32> to vector<24x32xf32>
    %55 = arith.addf %52, %54 : vector<24x32xf32>
    %c0_41 = arith.constant 0 : index
    %c8_42 = arith.constant 8 : index
    %c0_43 = arith.constant 0 : index
    %56 = vector.load %arg18[%c0_41, %c8_42, %c0_43] : memref<2x48x32xf32, #tpu.memory_space<vmem>>, vector<1x24x32xf32>
    %57 = vector.shape_cast %56 : vector<1x24x32xf32> to vector<24x32xf32>
    %58 = vector.shape_cast %55 : vector<24x32xf32> to vector<1x24x32xf32>
    tpu.vector_store %arg18[%c0_41, %c8_42, %c0_43], %58 {strides = array<i32>} : memref<2x48x32xf32, #tpu.memory_space<vmem>>, vector<1x24x32xf32>,
    %c0_44 = arith.constant 0 : index
    %c0_45 = arith.constant 0 : index
    %c0_46 = arith.constant 0 : index
    %59 = vector.load %arg18[%c0_44, %c0_45, %c0_46] : memref<2x48x32xf32, #tpu.memory_space<vmem>>, vector<1x32x32xf32>
    %60 = vector.shape_cast %59 : vector<1x32x32xf32> to vector<32x32xf32>
    %c0_47 = arith.constant 0 : index
    %c1_48 = arith.constant 1 : index
    %c0_49 = arith.constant 0 : index
    %61 = vector.load %arg18[%c0_47, %c1_48, %c0_49] : memref<2x48x32xf32, #tpu.memory_space<vmem>>, vector<1x32x32xf32>
    %62 = vector.shape_cast %61 : vector<1x32x32xf32> to vector<32x32xf32>
    %c0_50 = arith.constant 0 : index
    %c2_51 = arith.constant 2 : index
    %c0_52 = arith.constant 0 : index
    %63 = vector.load %arg18[%c0_50, %c2_51, %c0_52] : memref<2x48x32xf32, #tpu.memory_space<vmem>>, vector<1x32x32xf32>
    %64 = vector.shape_cast %63 : vector<1x32x32xf32> to vector<32x32xf32>
    %c0_53 = arith.constant 0 : index
    %c3_54 = arith.constant 3 : index
    %c0_55 = arith.constant 0 : index
    %65 = vector.load %arg18[%c0_53, %c3_54, %c0_55] : memref<2x48x32xf32, #tpu.memory_space<vmem>>, vector<1x32x32xf32>
    %66 = vector.shape_cast %65 : vector<1x32x32xf32> to vector<32x32xf32>
    %c0_56 = arith.constant 0 : index
    %c4_57 = arith.constant 4 : index
    %c0_58 = arith.constant 0 : index
    %67 = vector.load %arg18[%c0_56, %c4_57, %c0_58] : memref<2x48x32xf32, #tpu.memory_space<vmem>>, vector<1x32x32xf32>
    %68 = vector.shape_cast %67 : vector<1x32x32xf32> to vector<32x32xf32>
    %c0_59 = arith.constant 0 : index
    %c5_60 = arith.constant 5 : index
    %c0_61 = arith.constant 0 : index
    %69 = vector.load %arg18[%c0_59, %c5_60, %c0_61] : memref<2x48x32xf32, #tpu.memory_space<vmem>>, vector<1x32x32xf32>
    %70 = vector.shape_cast %69 : vector<1x32x32xf32> to vector<32x32xf32>
    %c0_62 = arith.constant 0 : index
    %c6_63 = arith.constant 6 : index
    %c0_64 = arith.constant 0 : index
    %71 = vector.load %arg18[%c0_62, %c6_63, %c0_64] : memref<2x48x32xf32, #tpu.memory_space<vmem>>, vector<1x32x32xf32>
    %72 = vector.shape_cast %71 : vector<1x32x32xf32> to vector<32x32xf32>
    %c0_65 = arith.constant 0 : index
    %c7_66 = arith.constant 7 : index
    %c0_67 = arith.constant 0 : index
    %73 = vector.load %arg18[%c0_65, %c7_66, %c0_67] : memref<2x48x32xf32, #tpu.memory_space<vmem>>, vector<1x32x32xf32>
    %74 = vector.shape_cast %73 : vector<1x32x32xf32> to vector<32x32xf32>
    %c0_68 = arith.constant 0 : index
    %c8_69 = arith.constant 8 : index
    %c0_70 = arith.constant 0 : index
    %75 = vector.load %arg18[%c0_68, %c8_69, %c0_70] : memref<2x48x32xf32, #tpu.memory_space<vmem>>, vector<1x32x32xf32>
    %76 = vector.shape_cast %75 : vector<1x32x32xf32> to vector<32x32xf32>
    %77 = tpu.concatenate %60, %62, %64, %66, %68, %70, %72, %74, %76 in 1 : vector<32x32xf32>, vector<32x32xf32>, vector<32x32xf32>, vector<32x32xf32>, vector<32x32xf32>, vector<32x32xf32>, vector<32x32xf32>, vector<32x32xf32>, vector<32x32xf32> -> vector<32x288xf32>
    %78 = arith.truncf %77 : vector<32x288xf32> to vector<32x288xbf16>
    %c0_71 = arith.constant 0 : index
    %c0_72 = arith.constant 0 : index
    %79 = vector.load %arg6[%c0_71, %c0_72] : memref<288x32xbf16, #tpu.memory_space<vmem>>, vector<288x32xbf16>
    %cst_73 = arith.constant dense<0.000000e+00> : vector<32x32xf32>
    %80 = tpu.matmul %78, %79, %cst_73 {dimension_numbers = #tpu.dot_dimension_numbers<[1], [0], [0], [1], [0, 0, 1, 1], [], []>} : vector<32x288xbf16>, vector<288x32xbf16>, vector<32x32xf32> -> vector<32x32xf32>
    %c0_74 = arith.constant 0 : index
    %c0_75 = arith.constant 0 : index
    %81 = vector.load %arg7[%c0_74, %c0_75] : memref<1x32xf32, #tpu.memory_space<vmem>>, vector<1x32xf32>
    %82 = vector.broadcast %81 : vector<1x32xf32> to vector<32x32xf32>
    %83 = arith.addf %80, %82 : vector<32x32xf32>
    %cst_76 = arith.constant dense<0.000000e+00> : vector<32xf32>
    %84 = vector.multi_reduction <add>, %83, %cst_76 [1] : vector<32x32xf32> to vector<32xf32>
    %85 = vector.shape_cast %84 : vector<32xf32> to vector<32x1xf32>
    %cst_77 = arith.constant 3.200000e+01 : f32
    %86 = vector.broadcast %cst_77 : f32 to vector<32x1xf32>
    %87 = arith.divf %85, %86 : vector<32x1xf32>
    %88 = arith.mulf %83, %83 : vector<32x32xf32>
    %cst_78 = arith.constant dense<0.000000e+00> : vector<32xf32>
    %89 = vector.multi_reduction <add>, %88, %cst_78 [1] : vector<32x32xf32> to vector<32xf32>
    %90 = vector.shape_cast %89 : vector<32xf32> to vector<32x1xf32>
    %cst_79 = arith.constant 3.200000e+01 : f32
    %91 = vector.broadcast %cst_79 : f32 to vector<32x1xf32>
    %92 = arith.divf %90, %91 : vector<32x1xf32>
    %93 = arith.mulf %87, %87 : vector<32x1xf32>
    %94 = arith.subf %92, %93 : vector<32x1xf32>
    %95 = vector.broadcast %87 : vector<32x1xf32> to vector<32x32xf32>
    %96 = arith.subf %83, %95 : vector<32x32xf32>
    %cst_80 = arith.constant 9.99999974E-6 : f32
    %97 = vector.broadcast %cst_80 : f32 to vector<32x1xf32>
    %98 = arith.addf %94, %97 : vector<32x1xf32>
    %99 = math.rsqrt %98 : vector<32x1xf32>
    %100 = vector.broadcast %99 : vector<32x1xf32> to vector<32x32xf32>
    %101 = arith.mulf %96, %100 : vector<32x32xf32>
    %c0_81 = arith.constant 0 : index
    %c0_82 = arith.constant 0 : index
    %102 = vector.load %arg8[%c0_81, %c0_82] : memref<1x32xf32, #tpu.memory_space<vmem>>, vector<1x32xf32>
    %103 = vector.broadcast %102 : vector<1x32xf32> to vector<32x32xf32>
    %104 = arith.mulf %101, %103 : vector<32x32xf32>
    %c0_83 = arith.constant 0 : index
    %c0_84 = arith.constant 0 : index
    %105 = vector.load %arg9[%c0_83, %c0_84] : memref<1x32xf32, #tpu.memory_space<vmem>>, vector<1x32xf32>
    %106 = vector.broadcast %105 : vector<1x32xf32> to vector<32x32xf32>
    %107 = arith.addf %104, %106 : vector<32x32xf32>
    %c0_85 = arith.constant 0 : index
    %c8_86 = arith.constant 8 : index
    %c0_87 = arith.constant 0 : index
    %108 = vector.load %arg18[%c0_85, %c8_86, %c0_87] : memref<2x48x32xf32, #tpu.memory_space<vmem>>, vector<1x32x32xf32>
    %109 = vector.shape_cast %108 : vector<1x32x32xf32> to vector<32x32xf32>
    %110 = vector.shape_cast %107 : vector<32x32xf32> to vector<1x32x32xf32>
    tpu.vector_store %arg18[%c0_85, %c8_86, %c0_87], %110 {strides = array<i32>} : memref<2x48x32xf32, #tpu.memory_space<vmem>>, vector<1x32x32xf32>,
    %c0_88 = arith.constant 0 : index
    %c0_89 = arith.constant 0 : index
    %c0_90 = arith.constant 0 : index
    %111 = vector.load %arg18[%c0_88, %c0_89, %c0_90] : memref<2x48x32xf32, #tpu.memory_space<vmem>>, vector<1x40x32xf32>
    %112 = vector.shape_cast %111 : vector<1x40x32xf32> to vector<40x32xf32>
    %c0_91 = arith.constant 0 : index
    %c1_92 = arith.constant 1 : index
    %c0_93 = arith.constant 0 : index
    %113 = vector.load %arg18[%c0_91, %c1_92, %c0_93] : memref<2x48x32xf32, #tpu.memory_space<vmem>>, vector<1x40x32xf32>
    %114 = vector.shape_cast %113 : vector<1x40x32xf32> to vector<40x32xf32>
    %c0_94 = arith.constant 0 : index
    %c2_95 = arith.constant 2 : index
    %c0_96 = arith.constant 0 : index
    %115 = vector.load %arg18[%c0_94, %c2_95, %c0_96] : memref<2x48x32xf32, #tpu.memory_space<vmem>>, vector<1x40x32xf32>
    %116 = vector.shape_cast %115 : vector<1x40x32xf32> to vector<40x32xf32>
    %c0_97 = arith.constant 0 : index
    %c3_98 = arith.constant 3 : index
    %c0_99 = arith.constant 0 : index
    %117 = vector.load %arg18[%c0_97, %c3_98, %c0_99] : memref<2x48x32xf32, #tpu.memory_space<vmem>>, vector<1x40x32xf32>
    %118 = vector.shape_cast %117 : vector<1x40x32xf32> to vector<40x32xf32>
    %c0_100 = arith.constant 0 : index
    %c4_101 = arith.constant 4 : index
    %c0_102 = arith.constant 0 : index
    %119 = vector.load %arg18[%c0_100, %c4_101, %c0_102] : memref<2x48x32xf32, #tpu.memory_space<vmem>>, vector<1x40x32xf32>
    %120 = vector.shape_cast %119 : vector<1x40x32xf32> to vector<40x32xf32>
    %c0_103 = arith.constant 0 : index
    %c5_104 = arith.constant 5 : index
    %c0_105 = arith.constant 0 : index
    %121 = vector.load %arg18[%c0_103, %c5_104, %c0_105] : memref<2x48x32xf32, #tpu.memory_space<vmem>>, vector<1x40x32xf32>
    %122 = vector.shape_cast %121 : vector<1x40x32xf32> to vector<40x32xf32>
    %c0_106 = arith.constant 0 : index
    %c6_107 = arith.constant 6 : index
    %c0_108 = arith.constant 0 : index
    %123 = vector.load %arg18[%c0_106, %c6_107, %c0_108] : memref<2x48x32xf32, #tpu.memory_space<vmem>>, vector<1x40x32xf32>
    %124 = vector.shape_cast %123 : vector<1x40x32xf32> to vector<40x32xf32>
    %c0_109 = arith.constant 0 : index
    %c7_110 = arith.constant 7 : index
    %c0_111 = arith.constant 0 : index
    %125 = vector.load %arg18[%c0_109, %c7_110, %c0_111] : memref<2x48x32xf32, #tpu.memory_space<vmem>>, vector<1x40x32xf32>
    %126 = vector.shape_cast %125 : vector<1x40x32xf32> to vector<40x32xf32>
    %c0_112 = arith.constant 0 : index
    %c8_113 = arith.constant 8 : index
    %c0_114 = arith.constant 0 : index
    %127 = vector.load %arg18[%c0_112, %c8_113, %c0_114] : memref<2x48x32xf32, #tpu.memory_space<vmem>>, vector<1x40x32xf32>
    %128 = vector.shape_cast %127 : vector<1x40x32xf32> to vector<40x32xf32>
    %129 = tpu.concatenate %112, %114, %116, %118, %120, %122, %124, %126, %128 in 1 : vector<40x32xf32>, vector<40x32xf32>, vector<40x32xf32>, vector<40x32xf32>, vector<40x32xf32>, vector<40x32xf32>, vector<40x32xf32>, vector<40x32xf32>, vector<40x32xf32> -> vector<40x288xf32>
    %130 = arith.truncf %129 : vector<40x288xf32> to vector<40x288xbf16>
    %c0_115 = arith.constant 0 : index
    %c0_116 = arith.constant 0 : index
    %131 = vector.load %arg10[%c0_115, %c0_116] : memref<288x32xbf16, #tpu.memory_space<vmem>>, vector<288x32xbf16>
    %cst_117 = arith.constant dense<0.000000e+00> : vector<40x32xf32>
    %132 = tpu.matmul %130, %131, %cst_117 {dimension_numbers = #tpu.dot_dimension_numbers<[1], [0], [0], [1], [0, 0, 1, 1], [], []>} : vector<40x288xbf16>, vector<288x32xbf16>, vector<40x32xf32> -> vector<40x32xf32>
    %c0_118 = arith.constant 0 : index
    %c0_119 = arith.constant 0 : index
    %133 = vector.load %arg11[%c0_118, %c0_119] : memref<1x32xf32, #tpu.memory_space<vmem>>, vector<1x32xf32>
    %134 = vector.broadcast %133 : vector<1x32xf32> to vector<40x32xf32>
    %135 = arith.addf %132, %134 : vector<40x32xf32>
    %cst_120 = arith.constant dense<0.000000e+00> : vector<40xf32>
    %136 = vector.multi_reduction <add>, %135, %cst_120 [1] : vector<40x32xf32> to vector<40xf32>
    %137 = vector.shape_cast %136 : vector<40xf32> to vector<40x1xf32>
    %cst_121 = arith.constant 3.200000e+01 : f32
    %138 = vector.broadcast %cst_121 : f32 to vector<40x1xf32>
    %139 = arith.divf %137, %138 : vector<40x1xf32>
    %140 = arith.mulf %135, %135 : vector<40x32xf32>
    %cst_122 = arith.constant dense<0.000000e+00> : vector<40xf32>
    %141 = vector.multi_reduction <add>, %140, %cst_122 [1] : vector<40x32xf32> to vector<40xf32>
    %142 = vector.shape_cast %141 : vector<40xf32> to vector<40x1xf32>
    %cst_123 = arith.constant 3.200000e+01 : f32
    %143 = vector.broadcast %cst_123 : f32 to vector<40x1xf32>
    %144 = arith.divf %142, %143 : vector<40x1xf32>
    %145 = arith.mulf %139, %139 : vector<40x1xf32>
    %146 = arith.subf %144, %145 : vector<40x1xf32>
    %147 = vector.broadcast %139 : vector<40x1xf32> to vector<40x32xf32>
    %148 = arith.subf %135, %147 : vector<40x32xf32>
    %cst_124 = arith.constant 9.99999974E-6 : f32
    %149 = vector.broadcast %cst_124 : f32 to vector<40x1xf32>
    %150 = arith.addf %146, %149 : vector<40x1xf32>
    %151 = math.rsqrt %150 : vector<40x1xf32>
    %152 = vector.broadcast %151 : vector<40x1xf32> to vector<40x32xf32>
    %153 = arith.mulf %148, %152 : vector<40x32xf32>
    %c0_125 = arith.constant 0 : index
    %c0_126 = arith.constant 0 : index
    %154 = vector.load %arg12[%c0_125, %c0_126] : memref<1x32xf32, #tpu.memory_space<vmem>>, vector<1x32xf32>
    %155 = vector.broadcast %154 : vector<1x32xf32> to vector<40x32xf32>
    %156 = arith.mulf %153, %155 : vector<40x32xf32>
    %c0_127 = arith.constant 0 : index
    %c0_128 = arith.constant 0 : index
    %157 = vector.load %arg13[%c0_127, %c0_128] : memref<1x32xf32, #tpu.memory_space<vmem>>, vector<1x32xf32>
    %158 = vector.broadcast %157 : vector<1x32xf32> to vector<40x32xf32>
    %159 = arith.addf %156, %158 : vector<40x32xf32>
    %160 = arith.truncf %159 : vector<40x32xf32> to vector<40x32xbf16>
    %c0_129 = arith.constant 0 : index
    %c0_130 = arith.constant 0 : index
    %161 = vector.load %arg14[%c0_129, %c0_130] : memref<32x128xbf16, #tpu.memory_space<vmem>>, vector<32x128xbf16>
    %cst_131 = arith.constant dense<0.000000e+00> : vector<40x128xf32>
    %162 = tpu.matmul %160, %161, %cst_131 {dimension_numbers = #tpu.dot_dimension_numbers<[1], [0], [0], [1], [0, 0, 1, 1], [], []>} : vector<40x32xbf16>, vector<32x128xbf16>, vector<40x128xf32> -> vector<40x128xf32>
    %c0_132 = arith.constant 0 : index
    %c0_133 = arith.constant 0 : index
    %163 = vector.load %arg15[%c0_132, %c0_133] : memref<1x128xf32, #tpu.memory_space<vmem>>, vector<1x128xf32>
    %164 = vector.broadcast %163 : vector<1x128xf32> to vector<40x128xf32>
    %165 = arith.addf %162, %164 : vector<40x128xf32>
    %c0_134 = arith.constant 0 : index
    %c0_135 = arith.constant 0 : index
    %c0_136 = arith.constant 0 : index
    %166 = vector.load %arg16[%c0_134, %c0_135, %c0_136] : memref<2x40x128xf32, #tpu.memory_space<vmem>>, vector<1x40x128xf32>
    %167 = vector.shape_cast %166 : vector<1x40x128xf32> to vector<40x128xf32>
    %168 = arith.addf %165, %167 : vector<40x128xf32>
    %169 = arith.negf %168 : vector<40x128xf32>
    %170 = math.exp %169 : vector<40x128xf32>
    %cst_137 = arith.constant 1.000000e+00 : f32
    %171 = vector.broadcast %cst_137 : f32 to vector<40x128xf32>
    %172 = arith.addf %171, %170 : vector<40x128xf32>
    %173 = arith.divf %171, %172 : vector<40x128xf32>
    %c0_138 = arith.constant 0 : index
    %c0_139 = arith.constant 0 : index
    %c0_140 = arith.constant 0 : index
    %174 = vector.load %arg17[%c0_138, %c0_139, %c0_140] : memref<2x40x128xf32, #tpu.memory_space<vmem>>, vector<1x40x128xf32>
    %175 = vector.shape_cast %174 : vector<1x40x128xf32> to vector<40x128xf32>
    %176 = vector.shape_cast %173 : vector<40x128xf32> to vector<1x40x128xf32>
    tpu.vector_store %arg17[%c0_138, %c0_139, %c0_140], %176 {strides = array<i32>} : memref<2x40x128xf32, #tpu.memory_space<vmem>>, vector<1x40x128xf32>,
    %c1_141 = arith.constant 1 : index
    %c0_142 = arith.constant 0 : index
    %c0_143 = arith.constant 0 : index
    %177 = vector.load %arg1[%c1_141, %c0_142, %c0_143] : memref<2x16x32xf32, #tpu.memory_space<vmem>>, vector<1x16x32xf32>
    %178 = vector.shape_cast %177 : vector<1x16x32xf32> to vector<16x32xf32>
    %c1_144 = arith.constant 1 : index
    %c8_145 = arith.constant 8 : index
    %c0_146 = arith.constant 0 : index
    %179 = vector.load %arg18[%c1_144, %c8_145, %c0_146] : memref<2x48x32xf32, #tpu.memory_space<vmem>>, vector<1x16x32xf32>
    %180 = vector.shape_cast %179 : vector<1x16x32xf32> to vector<16x32xf32>
    %181 = vector.shape_cast %178 : vector<16x32xf32> to vector<1x16x32xf32>
    tpu.vector_store %arg18[%c1_144, %c8_145, %c0_146], %181 {strides = array<i32>} : memref<2x48x32xf32, #tpu.memory_space<vmem>>, vector<1x16x32xf32>,
    %c1_147 = arith.constant 1 : index
    %c0_148 = arith.constant 0 : index
    %c0_149 = arith.constant 0 : index
    %182 = vector.load %arg18[%c1_147, %c0_148, %c0_149] : memref<2x48x32xf32, #tpu.memory_space<vmem>>, vector<1x24x32xf32>
    %183 = vector.shape_cast %182 : vector<1x24x32xf32> to vector<24x32xf32>
    %c1_150 = arith.constant 1 : index
    %c1_151 = arith.constant 1 : index
    %c0_152 = arith.constant 0 : index
    %184 = vector.load %arg18[%c1_150, %c1_151, %c0_152] : memref<2x48x32xf32, #tpu.memory_space<vmem>>, vector<1x24x32xf32>
    %185 = vector.shape_cast %184 : vector<1x24x32xf32> to vector<24x32xf32>
    %c1_153 = arith.constant 1 : index
    %c2_154 = arith.constant 2 : index
    %c0_155 = arith.constant 0 : index
    %186 = vector.load %arg18[%c1_153, %c2_154, %c0_155] : memref<2x48x32xf32, #tpu.memory_space<vmem>>, vector<1x24x32xf32>
    %187 = vector.shape_cast %186 : vector<1x24x32xf32> to vector<24x32xf32>
    %c1_156 = arith.constant 1 : index
    %c3_157 = arith.constant 3 : index
    %c0_158 = arith.constant 0 : index
    %188 = vector.load %arg18[%c1_156, %c3_157, %c0_158] : memref<2x48x32xf32, #tpu.memory_space<vmem>>, vector<1x24x32xf32>
    %189 = vector.shape_cast %188 : vector<1x24x32xf32> to vector<24x32xf32>
    %c1_159 = arith.constant 1 : index
    %c4_160 = arith.constant 4 : index
    %c0_161 = arith.constant 0 : index
    %190 = vector.load %arg18[%c1_159, %c4_160, %c0_161] : memref<2x48x32xf32, #tpu.memory_space<vmem>>, vector<1x24x32xf32>
    %191 = vector.shape_cast %190 : vector<1x24x32xf32> to vector<24x32xf32>
    %c1_162 = arith.constant 1 : index
    %c5_163 = arith.constant 5 : index
    %c0_164 = arith.constant 0 : index
    %192 = vector.load %arg18[%c1_162, %c5_163, %c0_164] : memref<2x48x32xf32, #tpu.memory_space<vmem>>, vector<1x24x32xf32>
    %193 = vector.shape_cast %192 : vector<1x24x32xf32> to vector<24x32xf32>
    %c1_165 = arith.constant 1 : index
    %c6_166 = arith.constant 6 : index
    %c0_167 = arith.constant 0 : index
    %194 = vector.load %arg18[%c1_165, %c6_166, %c0_167] : memref<2x48x32xf32, #tpu.memory_space<vmem>>, vector<1x24x32xf32>
    %195 = vector.shape_cast %194 : vector<1x24x32xf32> to vector<24x32xf32>
    %c1_168 = arith.constant 1 : index
    %c7_169 = arith.constant 7 : index
    %c0_170 = arith.constant 0 : index
    %196 = vector.load %arg18[%c1_168, %c7_169, %c0_170] : memref<2x48x32xf32, #tpu.memory_space<vmem>>, vector<1x24x32xf32>
    %197 = vector.shape_cast %196 : vector<1x24x32xf32> to vector<24x32xf32>
    %c1_171 = arith.constant 1 : index
    %c8_172 = arith.constant 8 : index
    %c0_173 = arith.constant 0 : index
    %198 = vector.load %arg18[%c1_171, %c8_172, %c0_173] : memref<2x48x32xf32, #tpu.memory_space<vmem>>, vector<1x24x32xf32>
    %199 = vector.shape_cast %198 : vector<1x24x32xf32> to vector<24x32xf32>
    %200 = tpu.concatenate %183, %185, %187, %189, %191, %193, %195, %197, %199 in 1 : vector<24x32xf32>, vector<24x32xf32>, vector<24x32xf32>, vector<24x32xf32>, vector<24x32xf32>, vector<24x32xf32>, vector<24x32xf32>, vector<24x32xf32>, vector<24x32xf32> -> vector<24x288xf32>
    %201 = arith.truncf %200 : vector<24x288xf32> to vector<24x288xbf16>
    %c0_174 = arith.constant 0 : index
    %c0_175 = arith.constant 0 : index
    %202 = vector.load %arg2[%c0_174, %c0_175] : memref<288x32xbf16, #tpu.memory_space<vmem>>, vector<288x32xbf16>
    %cst_176 = arith.constant dense<0.000000e+00> : vector<24x32xf32>
    %203 = tpu.matmul %201, %202, %cst_176 {dimension_numbers = #tpu.dot_dimension_numbers<[1], [0], [0], [1], [0, 0, 1, 1], [], []>} : vector<24x288xbf16>, vector<288x32xbf16>, vector<24x32xf32> -> vector<24x32xf32>
    %c0_177 = arith.constant 0 : index
    %c0_178 = arith.constant 0 : index
    %204 = vector.load %arg3[%c0_177, %c0_178] : memref<1x32xf32, #tpu.memory_space<vmem>>, vector<1x32xf32>
    %205 = vector.broadcast %204 : vector<1x32xf32> to vector<24x32xf32>
    %206 = arith.addf %203, %205 : vector<24x32xf32>
    %cst_179 = arith.constant dense<0.000000e+00> : vector<24xf32>
    %207 = vector.multi_reduction <add>, %206, %cst_179 [1] : vector<24x32xf32> to vector<24xf32>
    %208 = vector.shape_cast %207 : vector<24xf32> to vector<24x1xf32>
    %cst_180 = arith.constant 3.200000e+01 : f32
    %209 = vector.broadcast %cst_180 : f32 to vector<24x1xf32>
    %210 = arith.divf %208, %209 : vector<24x1xf32>
    %211 = arith.mulf %206, %206 : vector<24x32xf32>
    %cst_181 = arith.constant dense<0.000000e+00> : vector<24xf32>
    %212 = vector.multi_reduction <add>, %211, %cst_181 [1] : vector<24x32xf32> to vector<24xf32>
    %213 = vector.shape_cast %212 : vector<24xf32> to vector<24x1xf32>
    %cst_182 = arith.constant 3.200000e+01 : f32
    %214 = vector.broadcast %cst_182 : f32 to vector<24x1xf32>
    %215 = arith.divf %213, %214 : vector<24x1xf32>
    %216 = arith.mulf %210, %210 : vector<24x1xf32>
    %217 = arith.subf %215, %216 : vector<24x1xf32>
    %218 = vector.broadcast %210 : vector<24x1xf32> to vector<24x32xf32>
    %219 = arith.subf %206, %218 : vector<24x32xf32>
    %cst_183 = arith.constant 9.99999974E-6 : f32
    %220 = vector.broadcast %cst_183 : f32 to vector<24x1xf32>
    %221 = arith.addf %217, %220 : vector<24x1xf32>
    %222 = math.rsqrt %221 : vector<24x1xf32>
    %223 = vector.broadcast %222 : vector<24x1xf32> to vector<24x32xf32>
    %224 = arith.mulf %219, %223 : vector<24x32xf32>
    %c0_184 = arith.constant 0 : index
    %c0_185 = arith.constant 0 : index
    %225 = vector.load %arg4[%c0_184, %c0_185] : memref<1x32xf32, #tpu.memory_space<vmem>>, vector<1x32xf32>
    %226 = vector.broadcast %225 : vector<1x32xf32> to vector<24x32xf32>
    %227 = arith.mulf %224, %226 : vector<24x32xf32>
    %c0_186 = arith.constant 0 : index
    %c0_187 = arith.constant 0 : index
    %228 = vector.load %arg5[%c0_186, %c0_187] : memref<1x32xf32, #tpu.memory_space<vmem>>, vector<1x32xf32>
    %229 = vector.broadcast %228 : vector<1x32xf32> to vector<24x32xf32>
    %230 = arith.addf %227, %229 : vector<24x32xf32>
    %c1_188 = arith.constant 1 : index
    %c8_189 = arith.constant 8 : index
    %c0_190 = arith.constant 0 : index
    %231 = vector.load %arg18[%c1_188, %c8_189, %c0_190] : memref<2x48x32xf32, #tpu.memory_space<vmem>>, vector<1x24x32xf32>
    %232 = vector.shape_cast %231 : vector<1x24x32xf32> to vector<24x32xf32>
    %233 = vector.shape_cast %230 : vector<24x32xf32> to vector<1x24x32xf32>
    tpu.vector_store %arg18[%c1_188, %c8_189, %c0_190], %233 {strides = array<i32>} : memref<2x48x32xf32, #tpu.memory_space<vmem>>, vector<1x24x32xf32>,
    %c1_191 = arith.constant 1 : index
    %c0_192 = arith.constant 0 : index
    %c0_193 = arith.constant 0 : index
    %234 = vector.load %arg18[%c1_191, %c0_192, %c0_193] : memref<2x48x32xf32, #tpu.memory_space<vmem>>, vector<1x32x32xf32>
    %235 = vector.shape_cast %234 : vector<1x32x32xf32> to vector<32x32xf32>
    %c1_194 = arith.constant 1 : index
    %c1_195 = arith.constant 1 : index
    %c0_196 = arith.constant 0 : index
    %236 = vector.load %arg18[%c1_194, %c1_195, %c0_196] : memref<2x48x32xf32, #tpu.memory_space<vmem>>, vector<1x32x32xf32>
    %237 = vector.shape_cast %236 : vector<1x32x32xf32> to vector<32x32xf32>
    %c1_197 = arith.constant 1 : index
    %c2_198 = arith.constant 2 : index
    %c0_199 = arith.constant 0 : index
    %238 = vector.load %arg18[%c1_197, %c2_198, %c0_199] : memref<2x48x32xf32, #tpu.memory_space<vmem>>, vector<1x32x32xf32>
    %239 = vector.shape_cast %238 : vector<1x32x32xf32> to vector<32x32xf32>
    %c1_200 = arith.constant 1 : index
    %c3_201 = arith.constant 3 : index
    %c0_202 = arith.constant 0 : index
    %240 = vector.load %arg18[%c1_200, %c3_201, %c0_202] : memref<2x48x32xf32, #tpu.memory_space<vmem>>, vector<1x32x32xf32>
    %241 = vector.shape_cast %240 : vector<1x32x32xf32> to vector<32x32xf32>
    %c1_203 = arith.constant 1 : index
    %c4_204 = arith.constant 4 : index
    %c0_205 = arith.constant 0 : index
    %242 = vector.load %arg18[%c1_203, %c4_204, %c0_205] : memref<2x48x32xf32, #tpu.memory_space<vmem>>, vector<1x32x32xf32>
    %243 = vector.shape_cast %242 : vector<1x32x32xf32> to vector<32x32xf32>
    %c1_206 = arith.constant 1 : index
    %c5_207 = arith.constant 5 : index
    %c0_208 = arith.constant 0 : index
    %244 = vector.load %arg18[%c1_206, %c5_207, %c0_208] : memref<2x48x32xf32, #tpu.memory_space<vmem>>, vector<1x32x32xf32>
    %245 = vector.shape_cast %244 : vector<1x32x32xf32> to vector<32x32xf32>
    %c1_209 = arith.constant 1 : index
    %c6_210 = arith.constant 6 : index
    %c0_211 = arith.constant 0 : index
    %246 = vector.load %arg18[%c1_209, %c6_210, %c0_211] : memref<2x48x32xf32, #tpu.memory_space<vmem>>, vector<1x32x32xf32>
    %247 = vector.shape_cast %246 : vector<1x32x32xf32> to vector<32x32xf32>
    %c1_212 = arith.constant 1 : index
    %c7_213 = arith.constant 7 : index
    %c0_214 = arith.constant 0 : index
    %248 = vector.load %arg18[%c1_212, %c7_213, %c0_214] : memref<2x48x32xf32, #tpu.memory_space<vmem>>, vector<1x32x32xf32>
    %249 = vector.shape_cast %248 : vector<1x32x32xf32> to vector<32x32xf32>
    %c1_215 = arith.constant 1 : index
    %c8_216 = arith.constant 8 : index
    %c0_217 = arith.constant 0 : index
    %250 = vector.load %arg18[%c1_215, %c8_216, %c0_217] : memref<2x48x32xf32, #tpu.memory_space<vmem>>, vector<1x32x32xf32>
    %251 = vector.shape_cast %250 : vector<1x32x32xf32> to vector<32x32xf32>
    %252 = tpu.concatenate %235, %237, %239, %241, %243, %245, %247, %249, %251 in 1 : vector<32x32xf32>, vector<32x32xf32>, vector<32x32xf32>, vector<32x32xf32>, vector<32x32xf32>, vector<32x32xf32>, vector<32x32xf32>, vector<32x32xf32>, vector<32x32xf32> -> vector<32x288xf32>
    %253 = arith.truncf %252 : vector<32x288xf32> to vector<32x288xbf16>
    %c0_218 = arith.constant 0 : index
    %c0_219 = arith.constant 0 : index
    %254 = vector.load %arg6[%c0_218, %c0_219] : memref<288x32xbf16, #tpu.memory_space<vmem>>, vector<288x32xbf16>
    %cst_220 = arith.constant dense<0.000000e+00> : vector<32x32xf32>
    %255 = tpu.matmul %253, %254, %cst_220 {dimension_numbers = #tpu.dot_dimension_numbers<[1], [0], [0], [1], [0, 0, 1, 1], [], []>} : vector<32x288xbf16>, vector<288x32xbf16>, vector<32x32xf32> -> vector<32x32xf32>
    %c0_221 = arith.constant 0 : index
    %c0_222 = arith.constant 0 : index
    %256 = vector.load %arg7[%c0_221, %c0_222] : memref<1x32xf32, #tpu.memory_space<vmem>>, vector<1x32xf32>
    %257 = vector.broadcast %256 : vector<1x32xf32> to vector<32x32xf32>
    %258 = arith.addf %255, %257 : vector<32x32xf32>
    %cst_223 = arith.constant dense<0.000000e+00> : vector<32xf32>
    %259 = vector.multi_reduction <add>, %258, %cst_223 [1] : vector<32x32xf32> to vector<32xf32>
    %260 = vector.shape_cast %259 : vector<32xf32> to vector<32x1xf32>
    %cst_224 = arith.constant 3.200000e+01 : f32
    %261 = vector.broadcast %cst_224 : f32 to vector<32x1xf32>
    %262 = arith.divf %260, %261 : vector<32x1xf32>
    %263 = arith.mulf %258, %258 : vector<32x32xf32>
    %cst_225 = arith.constant dense<0.000000e+00> : vector<32xf32>
    %264 = vector.multi_reduction <add>, %263, %cst_225 [1] : vector<32x32xf32> to vector<32xf32>
    %265 = vector.shape_cast %264 : vector<32xf32> to vector<32x1xf32>
    %cst_226 = arith.constant 3.200000e+01 : f32
    %266 = vector.broadcast %cst_226 : f32 to vector<32x1xf32>
    %267 = arith.divf %265, %266 : vector<32x1xf32>
    %268 = arith.mulf %262, %262 : vector<32x1xf32>
    %269 = arith.subf %267, %268 : vector<32x1xf32>
    %270 = vector.broadcast %262 : vector<32x1xf32> to vector<32x32xf32>
    %271 = arith.subf %258, %270 : vector<32x32xf32>
    %cst_227 = arith.constant 9.99999974E-6 : f32
    %272 = vector.broadcast %cst_227 : f32 to vector<32x1xf32>
    %273 = arith.addf %269, %272 : vector<32x1xf32>
    %274 = math.rsqrt %273 : vector<32x1xf32>
    %275 = vector.broadcast %274 : vector<32x1xf32> to vector<32x32xf32>
    %276 = arith.mulf %271, %275 : vector<32x32xf32>
    %c0_228 = arith.constant 0 : index
    %c0_229 = arith.constant 0 : index
    %277 = vector.load %arg8[%c0_228, %c0_229] : memref<1x32xf32, #tpu.memory_space<vmem>>, vector<1x32xf32>
    %278 = vector.broadcast %277 : vector<1x32xf32> to vector<32x32xf32>
    %279 = arith.mulf %276, %278 : vector<32x32xf32>
    %c0_230 = arith.constant 0 : index
    %c0_231 = arith.constant 0 : index
    %280 = vector.load %arg9[%c0_230, %c0_231] : memref<1x32xf32, #tpu.memory_space<vmem>>, vector<1x32xf32>
    %281 = vector.broadcast %280 : vector<1x32xf32> to vector<32x32xf32>
    %282 = arith.addf %279, %281 : vector<32x32xf32>
    %c1_232 = arith.constant 1 : index
    %c8_233 = arith.constant 8 : index
    %c0_234 = arith.constant 0 : index
    %283 = vector.load %arg18[%c1_232, %c8_233, %c0_234] : memref<2x48x32xf32, #tpu.memory_space<vmem>>, vector<1x32x32xf32>
    %284 = vector.shape_cast %283 : vector<1x32x32xf32> to vector<32x32xf32>
    %285 = vector.shape_cast %282 : vector<32x32xf32> to vector<1x32x32xf32>
    tpu.vector_store %arg18[%c1_232, %c8_233, %c0_234], %285 {strides = array<i32>} : memref<2x48x32xf32, #tpu.memory_space<vmem>>, vector<1x32x32xf32>,
    %c1_235 = arith.constant 1 : index
    %c0_236 = arith.constant 0 : index
    %c0_237 = arith.constant 0 : index
    %286 = vector.load %arg18[%c1_235, %c0_236, %c0_237] : memref<2x48x32xf32, #tpu.memory_space<vmem>>, vector<1x40x32xf32>
    %287 = vector.shape_cast %286 : vector<1x40x32xf32> to vector<40x32xf32>
    %c1_238 = arith.constant 1 : index
    %c1_239 = arith.constant 1 : index
    %c0_240 = arith.constant 0 : index
    %288 = vector.load %arg18[%c1_238, %c1_239, %c0_240] : memref<2x48x32xf32, #tpu.memory_space<vmem>>, vector<1x40x32xf32>
    %289 = vector.shape_cast %288 : vector<1x40x32xf32> to vector<40x32xf32>
    %c1_241 = arith.constant 1 : index
    %c2_242 = arith.constant 2 : index
    %c0_243 = arith.constant 0 : index
    %290 = vector.load %arg18[%c1_241, %c2_242, %c0_243] : memref<2x48x32xf32, #tpu.memory_space<vmem>>, vector<1x40x32xf32>
    %291 = vector.shape_cast %290 : vector<1x40x32xf32> to vector<40x32xf32>
    %c1_244 = arith.constant 1 : index
    %c3_245 = arith.constant 3 : index
    %c0_246 = arith.constant 0 : index
    %292 = vector.load %arg18[%c1_244, %c3_245, %c0_246] : memref<2x48x32xf32, #tpu.memory_space<vmem>>, vector<1x40x32xf32>
    %293 = vector.shape_cast %292 : vector<1x40x32xf32> to vector<40x32xf32>
    %c1_247 = arith.constant 1 : index
    %c4_248 = arith.constant 4 : index
    %c0_249 = arith.constant 0 : index
    %294 = vector.load %arg18[%c1_247, %c4_248, %c0_249] : memref<2x48x32xf32, #tpu.memory_space<vmem>>, vector<1x40x32xf32>
    %295 = vector.shape_cast %294 : vector<1x40x32xf32> to vector<40x32xf32>
    %c1_250 = arith.constant 1 : index
    %c5_251 = arith.constant 5 : index
    %c0_252 = arith.constant 0 : index
    %296 = vector.load %arg18[%c1_250, %c5_251, %c0_252] : memref<2x48x32xf32, #tpu.memory_space<vmem>>, vector<1x40x32xf32>
    %297 = vector.shape_cast %296 : vector<1x40x32xf32> to vector<40x32xf32>
    %c1_253 = arith.constant 1 : index
    %c6_254 = arith.constant 6 : index
    %c0_255 = arith.constant 0 : index
    %298 = vector.load %arg18[%c1_253, %c6_254, %c0_255] : memref<2x48x32xf32, #tpu.memory_space<vmem>>, vector<1x40x32xf32>
    %299 = vector.shape_cast %298 : vector<1x40x32xf32> to vector<40x32xf32>
    %c1_256 = arith.constant 1 : index
    %c7_257 = arith.constant 7 : index
    %c0_258 = arith.constant 0 : index
    %300 = vector.load %arg18[%c1_256, %c7_257, %c0_258] : memref<2x48x32xf32, #tpu.memory_space<vmem>>, vector<1x40x32xf32>
    %301 = vector.shape_cast %300 : vector<1x40x32xf32> to vector<40x32xf32>
    %c1_259 = arith.constant 1 : index
    %c8_260 = arith.constant 8 : index
    %c0_261 = arith.constant 0 : index
    %302 = vector.load %arg18[%c1_259, %c8_260, %c0_261] : memref<2x48x32xf32, #tpu.memory_space<vmem>>, vector<1x40x32xf32>
    %303 = vector.shape_cast %302 : vector<1x40x32xf32> to vector<40x32xf32>
    %304 = tpu.concatenate %287, %289, %291, %293, %295, %297, %299, %301, %303 in 1 : vector<40x32xf32>, vector<40x32xf32>, vector<40x32xf32>, vector<40x32xf32>, vector<40x32xf32>, vector<40x32xf32>, vector<40x32xf32>, vector<40x32xf32>, vector<40x32xf32> -> vector<40x288xf32>
    %305 = arith.truncf %304 : vector<40x288xf32> to vector<40x288xbf16>
    %c0_262 = arith.constant 0 : index
    %c0_263 = arith.constant 0 : index
    %306 = vector.load %arg10[%c0_262, %c0_263] : memref<288x32xbf16, #tpu.memory_space<vmem>>, vector<288x32xbf16>
    %cst_264 = arith.constant dense<0.000000e+00> : vector<40x32xf32>
    %307 = tpu.matmul %305, %306, %cst_264 {dimension_numbers = #tpu.dot_dimension_numbers<[1], [0], [0], [1], [0, 0, 1, 1], [], []>} : vector<40x288xbf16>, vector<288x32xbf16>, vector<40x32xf32> -> vector<40x32xf32>
    %c0_265 = arith.constant 0 : index
    %c0_266 = arith.constant 0 : index
    %308 = vector.load %arg11[%c0_265, %c0_266] : memref<1x32xf32, #tpu.memory_space<vmem>>, vector<1x32xf32>
    %309 = vector.broadcast %308 : vector<1x32xf32> to vector<40x32xf32>
    %310 = arith.addf %307, %309 : vector<40x32xf32>
    %cst_267 = arith.constant dense<0.000000e+00> : vector<40xf32>
    %311 = vector.multi_reduction <add>, %310, %cst_267 [1] : vector<40x32xf32> to vector<40xf32>
    %312 = vector.shape_cast %311 : vector<40xf32> to vector<40x1xf32>
    %cst_268 = arith.constant 3.200000e+01 : f32
    %313 = vector.broadcast %cst_268 : f32 to vector<40x1xf32>
    %314 = arith.divf %312, %313 : vector<40x1xf32>
    %315 = arith.mulf %310, %310 : vector<40x32xf32>
    %cst_269 = arith.constant dense<0.000000e+00> : vector<40xf32>
    %316 = vector.multi_reduction <add>, %315, %cst_269 [1] : vector<40x32xf32> to vector<40xf32>
    %317 = vector.shape_cast %316 : vector<40xf32> to vector<40x1xf32>
    %cst_270 = arith.constant 3.200000e+01 : f32
    %318 = vector.broadcast %cst_270 : f32 to vector<40x1xf32>
    %319 = arith.divf %317, %318 : vector<40x1xf32>
    %320 = arith.mulf %314, %314 : vector<40x1xf32>
    %321 = arith.subf %319, %320 : vector<40x1xf32>
    %322 = vector.broadcast %314 : vector<40x1xf32> to vector<40x32xf32>
    %323 = arith.subf %310, %322 : vector<40x32xf32>
    %cst_271 = arith.constant 9.99999974E-6 : f32
    %324 = vector.broadcast %cst_271 : f32 to vector<40x1xf32>
    %325 = arith.addf %321, %324 : vector<40x1xf32>
    %326 = math.rsqrt %325 : vector<40x1xf32>
    %327 = vector.broadcast %326 : vector<40x1xf32> to vector<40x32xf32>
    %328 = arith.mulf %323, %327 : vector<40x32xf32>
    %c0_272 = arith.constant 0 : index
    %c0_273 = arith.constant 0 : index
    %329 = vector.load %arg12[%c0_272, %c0_273] : memref<1x32xf32, #tpu.memory_space<vmem>>, vector<1x32xf32>
    %330 = vector.broadcast %329 : vector<1x32xf32> to vector<40x32xf32>
    %331 = arith.mulf %328, %330 : vector<40x32xf32>
    %c0_274 = arith.constant 0 : index
    %c0_275 = arith.constant 0 : index
    %332 = vector.load %arg13[%c0_274, %c0_275] : memref<1x32xf32, #tpu.memory_space<vmem>>, vector<1x32xf32>
    %333 = vector.broadcast %332 : vector<1x32xf32> to vector<40x32xf32>
    %334 = arith.addf %331, %333 : vector<40x32xf32>
    %335 = arith.truncf %334 : vector<40x32xf32> to vector<40x32xbf16>
    %c0_276 = arith.constant 0 : index
    %c0_277 = arith.constant 0 : index
    %336 = vector.load %arg14[%c0_276, %c0_277] : memref<32x128xbf16, #tpu.memory_space<vmem>>, vector<32x128xbf16>
    %cst_278 = arith.constant dense<0.000000e+00> : vector<40x128xf32>
    %337 = tpu.matmul %335, %336, %cst_278 {dimension_numbers = #tpu.dot_dimension_numbers<[1], [0], [0], [1], [0, 0, 1, 1], [], []>} : vector<40x32xbf16>, vector<32x128xbf16>, vector<40x128xf32> -> vector<40x128xf32>
    %c0_279 = arith.constant 0 : index
    %c0_280 = arith.constant 0 : index
    %338 = vector.load %arg15[%c0_279, %c0_280] : memref<1x128xf32, #tpu.memory_space<vmem>>, vector<1x128xf32>
    %339 = vector.broadcast %338 : vector<1x128xf32> to vector<40x128xf32>
    %340 = arith.addf %337, %339 : vector<40x128xf32>
    %c1_281 = arith.constant 1 : index
    %c0_282 = arith.constant 0 : index
    %c0_283 = arith.constant 0 : index
    %341 = vector.load %arg16[%c1_281, %c0_282, %c0_283] : memref<2x40x128xf32, #tpu.memory_space<vmem>>, vector<1x40x128xf32>
    %342 = vector.shape_cast %341 : vector<1x40x128xf32> to vector<40x128xf32>
    %343 = arith.addf %340, %342 : vector<40x128xf32>
    %344 = arith.negf %343 : vector<40x128xf32>
    %345 = math.exp %344 : vector<40x128xf32>
    %cst_284 = arith.constant 1.000000e+00 : f32
    %346 = vector.broadcast %cst_284 : f32 to vector<40x128xf32>
    %347 = arith.addf %346, %345 : vector<40x128xf32>
    %348 = arith.divf %346, %347 : vector<40x128xf32>
    %c1_285 = arith.constant 1 : index
    %c0_286 = arith.constant 0 : index
    %c0_287 = arith.constant 0 : index
    %349 = vector.load %arg17[%c1_285, %c0_286, %c0_287] : memref<2x40x128xf32, #tpu.memory_space<vmem>>, vector<1x40x128xf32>
    %350 = vector.shape_cast %349 : vector<1x40x128xf32> to vector<40x128xf32>
    %351 = vector.shape_cast %348 : vector<40x128xf32> to vector<1x40x128xf32>
    tpu.vector_store %arg17[%c1_285, %c0_286, %c0_287], %351 {strides = array<i32>} : memref<2x40x128xf32, #tpu.memory_space<vmem>>, vector<1x40x128xf32>,
    return
  }
  func.func @transform_0(%arg0: i32) -> (i32, i32, i32) {
    %c0_i32 = arith.constant 0 : i32
    %c0_i32_0 = arith.constant 0 : i32
    %c0_i32_1 = arith.constant 0 : i32
    return %arg0, %c0_i32, %c0_i32_0 : i32, i32, i32
  }
  func.func @transform_1(%arg0: i32) -> (i32, i32) {
    %c0_i32 = arith.constant 0 : i32
    %c0_i32_0 = arith.constant 0 : i32
    %c0_i32_1 = arith.constant 0 : i32
    return %c0_i32, %c0_i32_0 : i32, i32
  }
  func.func @transform_2(%arg0: i32) -> (i32, i32) {
    %c0_i32 = arith.constant 0 : i32
    %c0_i32_0 = arith.constant 0 : i32
    %c0_i32_1 = arith.constant 0 : i32
    return %c0_i32, %c0_i32_0 : i32, i32
  }
  func.func @transform_3(%arg0: i32) -> (i32, i32) {
    %c0_i32 = arith.constant 0 : i32
    %c0_i32_0 = arith.constant 0 : i32
    %c0_i32_1 = arith.constant 0 : i32
    return %c0_i32, %c0_i32_0 : i32, i32
  }
  func.func @transform_4(%arg0: i32) -> (i32, i32) {
    %c0_i32 = arith.constant 0 : i32
    %c0_i32_0 = arith.constant 0 : i32
    %c0_i32_1 = arith.constant 0 : i32
    return %c0_i32, %c0_i32_0 : i32, i32
  }
  func.func @transform_5(%arg0: i32) -> (i32, i32) {
    %c0_i32 = arith.constant 0 : i32
    %c0_i32_0 = arith.constant 0 : i32
    %c0_i32_1 = arith.constant 0 : i32
    return %c0_i32, %c0_i32_0 : i32, i32
  }
  func.func @transform_6(%arg0: i32) -> (i32, i32) {
    %c0_i32 = arith.constant 0 : i32
    %c0_i32_0 = arith.constant 0 : i32
    %c0_i32_1 = arith.constant 0 : i32
    return %c0_i32, %c0_i32_0 : i32, i32
  }
  func.func @transform_7(%arg0: i32) -> (i32, i32) {
    %c0_i32 = arith.constant 0 : i32
    %c0_i32_0 = arith.constant 0 : i32
    %c0_i32_1 = arith.constant 0 : i32
    return %c0_i32, %c0_i32_0 : i32, i32
  }
  func.func @transform_8(%arg0: i32) -> (i32, i32) {
    %c0_i32 = arith.constant 0 : i32
    %c0_i32_0 = arith.constant 0 : i32
    %c0_i32_1 = arith.constant 0 : i32
    return %c0_i32, %c0_i32_0 : i32, i32
  }
  func.func @transform_9(%arg0: i32) -> (i32, i32) {
    %c0_i32 = arith.constant 0 : i32
    %c0_i32_0 = arith.constant 0 : i32
    %c0_i32_1 = arith.constant 0 : i32
    return %c0_i32, %c0_i32_0 : i32, i32
  }
  func.func @transform_10(%arg0: i32) -> (i32, i32) {
    %c0_i32 = arith.constant 0 : i32
    %c0_i32_0 = arith.constant 0 : i32
    %c0_i32_1 = arith.constant 0 : i32
    return %c0_i32, %c0_i32_0 : i32, i32
  }
  func.func @transform_11(%arg0: i32) -> (i32, i32) {
    %c0_i32 = arith.constant 0 : i32
    %c0_i32_0 = arith.constant 0 : i32
    %c0_i32_1 = arith.constant 0 : i32
    return %c0_i32, %c0_i32_0 : i32, i32
  }
  func.func @transform_12(%arg0: i32) -> (i32, i32) {
    %c0_i32 = arith.constant 0 : i32
    %c0_i32_0 = arith.constant 0 : i32
    %c0_i32_1 = arith.constant 0 : i32
    return %c0_i32, %c0_i32_0 : i32, i32
  }
  func.func @transform_13(%arg0: i32) -> (i32, i32) {
    %c0_i32 = arith.constant 0 : i32
    %c0_i32_0 = arith.constant 0 : i32
    %c0_i32_1 = arith.constant 0 : i32
    return %c0_i32, %c0_i32_0 : i32, i32
  }
  func.func @transform_14(%arg0: i32) -> (i32, i32) {
    %c0_i32 = arith.constant 0 : i32
    %c0_i32_0 = arith.constant 0 : i32
    %c0_i32_1 = arith.constant 0 : i32
    return %c0_i32, %c0_i32_0 : i32, i32
  }
  func.func @transform_15(%arg0: i32) -> (i32, i32, i32) {
    %c0_i32 = arith.constant 0 : i32
    %c0_i32_0 = arith.constant 0 : i32
    %c0_i32_1 = arith.constant 0 : i32
    return %arg0, %c0_i32, %c0_i32_0 : i32, i32, i32
  }
  func.func @transform_16(%arg0: i32) -> (i32, i32, i32) {
    %c0_i32 = arith.constant 0 : i32
    %c0_i32_0 = arith.constant 0 : i32
    %c0_i32_1 = arith.constant 0 : i32
    return %arg0, %c0_i32, %c0_i32_0 : i32, i32, i32
  }
}

</mosaic_0001>

<bundles_post_ra>
// kernel: tpu_custom_call.1
= control target key start
LH: loop header
LB: loop body
LE: loop exit
PB: predicated region body
PF: predicated region fallthrough
CT: control target
= control target key end

     0   :  { %s5619_s0 = inlined_call_operand.vmem [shape: f32[2,16,32], index: 0, kind: input, shape index: {}]   ;;  %s5620_s1 = inlined_call_operand.vmem [shape: bf16[288,32], index: 1, kind: input, shape index: {}]   ;;  %s5621_s2 = inlined_call_operand.vmem [shape: f32[1,32], index: 2, kind: input, shape index: {}]   ;;  %s5622_s3 = inlined_call_operand.vmem [shape: f32[1,32], index: 3, kind: input, shape index: {}]   ;;  %s5623_s4 = inlined_call_operand.vmem [shape: f32[1,32], index: 4, kind: input, shape index: {}]   ;;  %s5624_s5 = inlined_call_operand.vmem [shape: bf16[288,32], index: 5, kind: input, shape index: {}]   ;;  %s5625_s6 = inlined_call_operand.vmem [shape: f32[1,32], index: 6, kind: input, shape index: {}]   ;;  %s5626_s7 = inlined_call_operand.vmem [shape: f32[1,32], index: 7, kind: input, shape index: {}]   ;;  %s5627_s8 = inlined_call_operand.vmem [shape: f32[1,32], index: 8, kind: input, shape index: {}]   ;;  %s5628_s9 = inlined_call_operand.vmem [shape: bf16[288,32], index: 9, kind: input, shape index: {}]   ;;  %s5629_s10 = inlined_call_operand.vmem [shape: f32[1,32], index: 10, kind: input, shape index: {}]   ;;  %s5630_s11 = inlined_call_operand.vmem [shape: f32[1,32], index: 11, kind: input, shape index: {}]   ;;  %s5631_s12 = inlined_call_operand.vmem [shape: f32[1,32], index: 12, kind: input, shape index: {}]   ;;  %s5632_s13 = inlined_call_operand.vmem [shape: bf16[32,128], index: 13, kind: input, shape index: {}]   ;;  %s5633_s14 = inlined_call_operand.vmem [shape: f32[1,128], index: 14, kind: input, shape index: {}]   ;;  %s5634_s15 = inlined_call_operand.vmem [shape: f32[2,40,128], index: 15, kind: input, shape index: {}]   ;;  %s5635_s16 = inlined_call_operand.hbm [shape: f32[2,40,128], index: 16, kind: output, shape index: {}]  }
   0x1   :  { %5637 = sst [smem:[#allocation6_spill]] %s5619_s0 }
   0x2   :  { %vm55_vm0 = vcmask 261120   ;;  %s5638_s23 = sld [smem:[#allocation6_spill]]  ;;  %v4468_v2 = vmov 0.0   ;;  %v4246_v3 = vld [vmem:[%s5620_s1 + $0x78] sm:$0xff]   ;;  %v4248_v5 = vld [vmem:[%s5620_s1 + $0x70] sm:$0xff]   ;;  %v4250_v7 = vld [vmem:[%s5620_s1 + $0x68] sm:$0xff]  }
   0x3   :  { %56 = vst.msk [vmem:[#allocation2] sm:$0xff] %vm55_vm0, %v4468_v2  ;;  %57 = vst.msk [vmem:[#allocation2 + $0x8] sm:$0xff] %vm55_vm0, %v4468_v2  ;;  %v4247_v4 = vld [vmem:[%s5620_s1 + $0x38] sm:$0xff]   ;;  %3566 = vmatprep.subr.bf16.mxu0 %v4246_v3  ;;  %v4249_v6 = vld [vmem:[%s5620_s1 + $0x30] sm:$0xff]   ;;  %s4469_s26 = smov 64   ;;  %s4470_s29 = smov 32  }
   0x4   :  { %58 = vst.msk [vmem:[#allocation2 + $0x10] sm:$0xff] %vm55_vm0, %v4468_v2  ;;  %59 = vst.msk [vmem:[#allocation2 + $0x18] sm:$0xff] %vm55_vm0, %v4468_v2  ;;  %3567 = vmatpush3.bf16.msra.mxu0 %v4247_v4  ;;  %v4251_v8 = vld [vmem:[%s5620_s1 + $0x28] sm:$0xff]   ;;  %v4252_v9 = vld [vmem:[%s5620_s1 + $0x60] sm:$0xff]   ;;  %s4471_s24 = smov 96  }
   0x5   :  { %60 = vst.msk [vmem:[#allocation2 + $0x20] sm:$0xff] %vm55_vm0, %v4468_v2  ;;  %61 = vst.msk [vmem:[#allocation2 + $0x28] sm:$0xff] %vm55_vm0, %v4468_v2  ;;  %3568 = vmatprep.subr.bf16.mxu0 %v4248_v5  ;;  %v4253_v21 = vld [vmem:[%s5620_s1 + $0x20] sm:$0xff]   ;;  %v4254_v29 = vld [vmem:[%s5620_s1 + $0x58] sm:$0xff]  }
   0x6   :  { %62 = vst.msk [vmem:[#allocation2 + $0x30] sm:$0xff] %vm55_vm0, %v4468_v2  ;;  %63 = vst.msk [vmem:[#allocation2 + $0x38] sm:$0xff] %vm55_vm0, %v4468_v2  ;;  %v4255_v32 = vld [vmem:[%s5620_s1 + $0x18] sm:$0xff]   ;;  %v4256_v34 = vld [vmem:[%s5620_s1 + $0x50] sm:$0xff]  }
   0x7   :  { %64 = vst.msk [vmem:[#allocation2 + $0x40] sm:$0xff] %vm55_vm0, %v4468_v2  ;;  %65 = vst.msk [vmem:[#allocation2 + $0x48] sm:$0xff] %vm55_vm0, %v4468_v2  ;;  %v4257_v36 = vld [vmem:[%s5620_s1 + $0x10] sm:$0xff]   ;;  %v4258_v39 = vld [vmem:[%s5620_s1 + $0x88] sm:$0xff]  }
   0x8   :  { %v68_v0 = vld [vmem:[%s5638_s23] sm:$0xff]  ;;  %v69_v1 = vld [vmem:[%s5638_s23 + $0x8] sm:$0xff]  ;;  %66 = vst.msk [vmem:[#allocation2 + $0x50] sm:$0xff] %vm55_vm0, %v4468_v2  ;;  %67 = vst.msk [vmem:[#allocation2 + $0x58] sm:$0xff] %vm55_vm0, %v4468_v2  ;;  %3569 = vmatpush3.bf16.msra.mxu0 %v4249_v6  ;;  %3782 = vmatprep.subr.bf16.mxu1 %v4258_v39 }
   0x9   :  { %70 = vst.msk [vmem:[#allocation2 + $0x8] sm:$0xff] %vm55_vm0, %v68_v0  ;;  %71 = vst.msk [vmem:[#allocation2 + $0x10] sm:$0xff] %vm55_vm0, %v69_v1  ;;  %3570 = vmatprep.subr.bf16.mxu0 %v4250_v7  ;;  %v4259_v41 = vld [vmem:[%s5620_s1 + $0x48] sm:$0xff]   ;;  %3783 = vmatpush3.bf16.msra.mxu1 %v4258_v39  ;;  %v4261_v43 = vld [vmem:[%s5620_s1 + $0x80] sm:$0xff]  }
   0xa   :  { %v4260_v44 = vld [vmem:[%s5620_s1 + $0x8] sm:$0xff]   ;;  %v4262_v46 = vld [vmem:[%s5620_s1 + $0x40] sm:$0xff]   ;;  %3784 = vmatprep.subr.bf16.mxu1 %v4261_v43 }
   0xb   :  { %v96_v50 = vld [vmem:[#allocation2 + $0x18] sm:$0xff]  ;;  %v4263_v51 = vld [vmem:[%s5620_s1] sm:$0xff]  }
   0xc   :  { %3571 = vmatpush3.bf16.msra.mxu0 %v4251_v8  ;;  %v194_v52 = vpack.c.bf16 %v96_v50, %v96_v50 }
   0xd   :  { %3572 = vmatprep.subr.bf16.mxu0 %v4252_v9  ;;  %3785 = vmatpush3.bf16.msra.mxu1 %v4261_v43 }
  0x10   :  { %v90_v10 = vld [vmem:[#allocation2 + $0x6] sm:$0xff]  ;;  %v91_v11 = vld [vmem:[#allocation2 + $0xe] sm:$0xff]  ;;  %v92_v28 = vld [vmem:[#allocation2 + $0x16] sm:$0xff]  ;;  %3573 = vmatpush3.bf16.msra.mxu0 %v4253_v21 }
  0x11   :  { %v87_v12 = vld [vmem:[#allocation2 + $0x5] sm:$0xff]  ;;  %v3896_v13 = vpack.i.bf16 %v91_v11, %v90_v10  ;;  %v88_v14 = vld [vmem:[#allocation2 + $0xd] sm:$0xff]  ;;  %3574 = vmatprep.subr.bf16.mxu0 %v4254_v29  ;;  %v89_v35 = vld [vmem:[#allocation2 + $0x15] sm:$0xff] }
  0x12   :  { %v78_v15 = vld [vmem:[#allocation2 + $0x2] sm:$0xff]  ;;  %v79_v16 = vld [vmem:[#allocation2 + $0xa] sm:$0xff]  ;;  %v3886_v17 = vpack.i.bf16 %v88_v14, %v87_v12  ;;  %v80_v27 = vld [vmem:[#allocation2 + $0x12] sm:$0xff] }
  0x13   :  { %v75_v18 = vld [vmem:[#allocation2 + $0x1] sm:$0xff]  ;;  %v76_v19 = vld [vmem:[#allocation2 + $0x9] sm:$0xff]  ;;  %3897 = vrot.lane.b32.xlu1 %v3896_v13, %s4469_s26  ;;  %v3901_v20 = vpack.i.bf16 %v79_v16, %v78_v15  ;;  %v77_v31 = vld [vmem:[#allocation2 + $0x11] sm:$0xff]  ;;  %v3921_v37 = vpack.i.bf16 %v80_v27, %v92_v28 }
  0x14   :  { %3887 = vrot.lane.b32.xlu0 %v3886_v17, %s4470_s29  ;;  %v3891_v22 = vpack.i.bf16 %v76_v19, %v75_v18  ;;  %v81_v23 = vld [vmem:[#allocation2 + $0x3] sm:$0xff]  ;;  %v82_v24 = vld [vmem:[#allocation2 + $0xb] sm:$0xff]  ;;  %v83_v38 = vld [vmem:[#allocation2 + $0x13] sm:$0xff]  ;;  %3575 = vmatpush3.bf16.msra.mxu0 %v4255_v32  ;;  %v3916_v40 = vpack.i.bf16 %v77_v31, %v89_v35 }
  0x15   :  { %v93_v25 = vld [vmem:[#allocation2 + $0x7] sm:$0xff]  ;;  %v94_v26 = vld [vmem:[#allocation2 + $0xf] sm:$0xff]  ;;  %v3911_v30 = vpack.i.bf16 %v82_v24, %v81_v23  ;;  %3576 = vmatprep.subr.bf16.mxu0 %v4256_v34  ;;  %v95_v42 = vld [vmem:[#allocation2 + $0x17] sm:$0xff] }
  0x16   :  { %v3906_v33 = vpack.i.bf16 %v94_v26, %v93_v25  ;;  %v3926_v45 = vpack.i.bf16 %v83_v38, %v95_v42  ;;  %v73_v47 = vld [vmem:[#allocation2 + $0x8] sm:$0xff]  ;;  %v74_v48 = vld [vmem:[#allocation2 + $0x10] sm:$0xff] }
  0x17   :  { %3902 = vrot.lane.b32.xlu1 %v3901_v20, %s4469_s26  ;;  %v191_v49 = vpack.c.bf16 %v74_v48, %v73_v47 }
  0x18   :  { %3892 = vrot.lane.b32.xlu0 %v3891_v22, %s4470_s29  ;;  %3577 = vmatpush3.bf16.msra.mxu0 %v4257_v36 }
  0x19   :  { %3578 = vmatprep.subr.bf16.mxu0 %v4259_v41  ;;  %3786 = vmatprep.mubr.msk.bf16.mxu1 %vm55_vm0, %v191_v49 }
  0x1a   :  { %3787 = vmatmul.mubr.msk.bf16.vlgmr.msra.gmra.mxu1 %vm55_vm0, %v194_v52 }
  0x1b   :  { %3912 = vrot.lane.b32.xlu1 %v3911_v30, %s4471_s24 }
  0x1c   :  { %3907 = vrot.lane.b32.xlu0 %v3906_v33, %s4471_s24  ;;  %3579 = vmatpush3.bf16.msra.mxu0 %v4260_v44 }
  0x1d   :  { %3580 = vmatprep.subr.bf16.mxu0 %v4262_v46 }
  0x1f   :  { %3922 = vrot.lane.b32.xlu1 %v3921_v37, %s4469_s26 }
  0x20   :  { %3917 = vrot.lane.b32.xlu0 %v3916_v40, %s4470_s29  ;;  %3581 = vmatpush3.bf16.msra.mxu0 %v4263_v51 }
  0x24   :  { %3927 = vrot.lane.b32.xlu0 %v3926_v45, %s4471_s24 }
  0x25   :  { %21 = vsyncpa [#allocation4], 0  ;;  %v4658_v59 = vld [vmem:[#allocation2] sm:$0xff]  ;;  %v85_v61 = vld [vmem:[#allocation2 + $0xc] sm:$0xff]  ;;  %vm172_vm1 = vcmask 523264   ;;  %vm176_vm2 = vcmask 785408  }
  0x26   :  { %v84_v60 = vld [vmem:[#allocation2 + $0x4] sm:$0xff]  ;;  %v86_v25 = vld [vmem:[#allocation2 + $0x14] sm:$0xff]  ;;  %vm4472_vm3 = vmmov 0  }
  0x85   :  { %v3898_v53 = vpop.permute.xlu1 %3897 }
  0x86   :  { %v3888_v54 = vpop.permute.xlu0 %3887  ;;  %v3900_v3 = vunpack.i.h.bf16 %v3898_v53  ;;  %v3899_v4 = vunpack.i.l.bf16 %v3898_v53 }
  0x87   :  { %v3890_v55 = vunpack.i.h.bf16 %v3888_v54  ;;  %v3889_v56 = vunpack.i.l.bf16 %v3888_v54 }
  0x89   :  { %v3903_v57 = vpop.permute.xlu1 %3902  ;;  %v180_v8 = vsel %vm55_vm0, %v84_v60, %v3889_v56  ;;  %v181_v9 = vsel %vm55_vm0, %v85_v61, %v3890_v55 }
  0x8a   :  { %v3893_v58 = vpop.permute.xlu0 %3892  ;;  %v3905_v62 = vunpack.i.h.bf16 %v3903_v57  ;;  %v3904_v63 = vunpack.i.l.bf16 %v3903_v57  ;;  %v183_v17 = vsel %vm172_vm1, %v180_v8, %v3899_v4  ;;  %v184_v18 = vsel %vm172_vm1, %v181_v9, %v3900_v3 }
  0x8b   :  { %v3895_v0 = vunpack.i.h.bf16 %v3893_v58  ;;  %v3894_v1 = vunpack.i.l.bf16 %v3893_v58 }
  0x8d   :  { %v169_v5 = vsel %vm55_vm0, %v4658_v59, %v3894_v1  ;;  %v3913_v6 = vpop.permute.xlu1 %3912  ;;  %v170_v7 = vsel %vm55_vm0, %v73_v47, %v3895_v0  ;;  %v3397_v47 = vld [vmem:[%s5621_s2] ss:$0 sm:$0xff] }
  0x8e   :  { %v3915_v10 = vunpack.i.h.bf16 %v3913_v6  ;;  %v3914_v11 = vunpack.i.l.bf16 %v3913_v6  ;;  %v3908_v12 = vpop.permute.xlu0 %3907  ;;  %v173_v15 = vsel %vm172_vm1, %v169_v5, %v3904_v63  ;;  %v174_v16 = vsel %vm172_vm1, %v170_v7, %v3905_v62 }
  0x8f   :  { %v3910_v13 = vunpack.i.h.bf16 %v3908_v12  ;;  %v3909_v14 = vunpack.i.l.bf16 %v3908_v12  ;;  %v4264_v12 = vld [vmem:[%s5624_s5 + $0x88] sm:$0xff]  }
  0x90   :  { %v177_v19 = vsel %vm176_vm2, %v173_v15, %v3914_v11  ;;  %v178_v20 = vsel %vm176_vm2, %v174_v16, %v3915_v10  ;;  %3790 = vmatprep.subr.bf16.mxu0 %v4264_v12  ;;  %v4267_v15 = vld [vmem:[%s5624_s5 + $0x38] sm:$0xff]   ;;  %v4268_v16 = vld [vmem:[%s5624_s5 + $0x70] sm:$0xff]  }
  0x91   :  { %v186_v21 = vsel %vm176_vm2, %v183_v17, %v3909_v14  ;;  %v187_v22 = vsel %vm176_vm2, %v184_v18, %v3910_v13  ;;  %v3923_v23 = vpop.permute.xlu1 %3922  ;;  %v189_v24 = vpack.c.bf16 %v178_v20, %v177_v19  ;;  %v4265_v13 = vld [vmem:[%s5624_s5 + $0x80] sm:$0xff]   ;;  %v4266_v14 = vld [vmem:[%s5624_s5 + $0x78] sm:$0xff]   ;;  %v4269_v17 = vld [vmem:[%s5624_s5 + $0x30] sm:$0xff]  }
  0x92   :  { %v3918_v26 = vpop.permute.xlu0 %3917  ;;  %v190_v27 = vpack.c.bf16 %v187_v22, %v186_v21  ;;  %v3925_v28 = vunpack.i.h.bf16 %v3923_v23  ;;  %v3924_v29 = vunpack.i.l.bf16 %v3923_v23  ;;  %3598 = vmatprep.subr.bf16.mxu1 %v4266_v14  ;;  %v4270_v18 = vld [vmem:[%s5624_s5 + $0x68] sm:$0xff]   ;;  %v4272_v20 = vld [vmem:[%s5624_s5 + $0x60] sm:$0xff]   ;;  %v4274_v22 = vld [vmem:[%s5624_s5 + $0x58] sm:$0xff]  }
  0x93   :  { %v3920_v30 = vunpack.i.h.bf16 %v3918_v26  ;;  %v3919_v31 = vunpack.i.l.bf16 %v3918_v26  ;;  %3599 = vmatpush3.bf16.msra.mxu1 %v4267_v15  ;;  %v4271_v19 = vld [vmem:[%s5624_s5 + $0x28] sm:$0xff]   ;;  %v4273_v21 = vld [vmem:[%s5624_s5 + $0x20] sm:$0xff]   ;;  %v4275_v23 = vld [vmem:[%s5624_s5 + $0x18] sm:$0xff]  }
  0x94   :  { %384 = vmatprep.mubr.bf16.mxu0 %v190_v27  ;;  %3600 = vmatprep.subr.bf16.mxu1 %v4268_v16 }
  0x95   :  { %v171_v32 = vsel %vm55_vm0, %v74_v48, %v3920_v30  ;;  %v182_v33 = vsel %vm55_vm0, %v86_v25, %v3919_v31  ;;  %385 = vmatmul.mubr.bf16.vlgmr.msra.gmra.mxu0 %v189_v24 }
  0x96   :  { %v3928_v34 = vpop.permute.xlu0 %3927  ;;  %v185_v35 = vsel %vm172_vm1, %v182_v33, %v3924_v29  ;;  %v175_v36 = vsel %vm172_vm1, %v171_v32, %v3925_v28  ;;  %3791 = vmatpush3.bf16.msra.mxu0 %v4264_v12 }
  0x97   :  { %v3930_v37 = vunpack.i.h.bf16 %v3928_v34  ;;  %v3929_v38 = vunpack.i.l.bf16 %v3928_v34  ;;  %3792 = vmatprep.subr.bf16.mxu0 %v4265_v13  ;;  %3601 = vmatpush3.bf16.msra.mxu1 %v4269_v17  ;;  %v549_v17 = vld [vmem:[#allocation2 + $0x20] sm:$0xff] }
  0x98   :  { %3602 = vmatprep.subr.bf16.mxu1 %v4270_v18 }
  0x99   :  { %v188_v39 = vsel %vm176_vm2, %v185_v35, %v3929_v38  ;;  %v179_v40 = vsel %vm176_vm2, %v175_v36, %v3930_v37 }
  0x9a   :  { %v193_v41 = vpack.c.bf16 %v188_v39, %v188_v39  ;;  %v192_v42 = vpack.c.bf16 %v179_v40, %v179_v40  ;;  %3793 = vmatpush3.bf16.msra.mxu0 %v4265_v13 }
  0x9b   :  { %3798 = vmatprep.subr.bf16.mxu0 %v4468_v2  ;;  %3603 = vmatpush3.bf16.msra.mxu1 %v4271_v19  ;;  %v4280_v19 = vld [vmem:[%s5624_s5 + $0x40] sm:$0xff]  }
  0x9c   :  { %392 = vmatprep.mubr.bf16.mxu0 %v193_v41  ;;  %3604 = vmatprep.subr.bf16.mxu1 %v4272_v20  ;;  %v4281_v20 = vld [vmem:[%s5624_s5] sm:$0xff]  }
  0x9d   :  { %393 = vmatmul.mubr.bf16.gmra.mxu0 %v192_v42 }
  0x9f   :  { %3605 = vmatpush3.bf16.msra.mxu1 %v4273_v21 }
  0xa0   :  { %3606 = vmatprep.subr.bf16.mxu1 %v4274_v22 }
  0xa3   :  { %3607 = vmatpush3.bf16.msra.mxu1 %v4275_v23 }
  0xda   :  { %v3788_v43 = vpop.f32.mrf.mxu1 }
  0xdc   :  { %v434_v44 = vpop.f32.mrf.mxu1 }
  0xde   :  { %v3789_v45 = vpop.f32.mrf.mxu1 }
  0xe0   :  { %v437_v58 = vpop.f32.mrf.mxu1 }
 0x155   :  { %v3582_v46 = vpop.f32.mrf.mxu0 }
 0x157   :  { %v3583_v48 = vpop.f32.mrf.mxu0 }
 0x158   :  { %v3584_v49 = vadd.f32 %v3583_v48, %v3582_v46 }
 0x159   :  { %v3585_v50 = vpop.f32.mrf.mxu0 }
 0x15a   :  { %v387_v51 = vadd.f32 %v3584_v49, %v3397_v47 }
 0x15b   :  { %v3586_v52 = vpop.f32.mrf.mxu0 }
 0x15c   :  { %v4682_v53 = vadd.f32 %v434_v44, %v387_v51  ;;  %v3587_v54 = vadd.f32 %v3586_v52, %v3585_v50  ;;  %v3419_v51 = vld [vmem:[%s5623_s4] ss:$0 sm:$0xff] }
 0x15d   :  { %v3588_v55 = vpop.f32.mrf.mxu0 }
 0x15e   :  { %v390_v56 = vadd.f32 %v3587_v54, %v3397_v47  ;;  %v448_v57 = vsel %vm55_vm0, %v4682_v53, 0.0  ;;  %v461_v4 = vmul.f32 %v4682_v53, %v4682_v53 }
 0x15f   :  { %v3589_v60 = vpop.f32.mrf.mxu0  ;;  %449 = vadd.xlane.f32.xlu1 %v448_v57 }
 0x160   :  { %v4686_v61 = vadd.f32 %v437_v58, %v390_v56  ;;  %v3590_v62 = vadd.f32 %v3589_v60, %v3588_v55  ;;  %v464_v8 = vsel %vm55_vm0, %v461_v4, 0.0 }
 0x161   :  { %v3591_v63 = vpop.f32.mrf.mxu0 }
 0x162   :  { %v395_v0 = vadd.f32 %v3590_v62, %v3397_v47  ;;  %v451_v1 = vsel %vm55_vm0, %v4686_v61, 0.0  ;;  %v462_v3 = vmul.f32 %v4686_v61, %v4686_v61  ;;  %v3418_v47 = vld [vmem:[%s5622_s3] ss:$0 sm:$0xff]  ;;  %v4277_v62 = vld [vmem:[%s5624_s5 + $0x10] sm:$0xff]  }
 0x163   :  { %452 = vadd.xlane.f32.xlu0 %v451_v1  ;;  %v3592_v5 = vpop.f32.mrf.mxu0  ;;  %v4279_v1 = vld [vmem:[%s5624_s5 + $0x8] sm:$0xff]  }
 0x164   :  { %v4694_v6 = vadd.f32 %v3788_v43, %v395_v0  ;;  %v467_v7 = vsel %vm55_vm0, %v462_v3, 0.0  ;;  %v4278_v0 = vld [vmem:[%s5624_s5 + $0x48] sm:$0xff]  }
 0x165   :  { %468 = vadd.xlane.f32.xlu1 %v467_v7 }
 0x166   :  { %v463_v9 = vmul.f32 %v4694_v6, %v4694_v6  ;;  %v454_v11 = vsel %vm55_vm0, %v4694_v6, 0.0 }
 0x167   :  { %465 = vadd.xlane.f32.xlu0 %v464_v8 }
 0x168   :  { %v470_v10 = vsel %vm55_vm0, %v463_v9, 0.0 }
 0x169   :  { %471 = vadd.xlane.f32.xlu1 %v470_v10 }
 0x16b   :  { %455 = vadd.xlane.f32.xlu0 %v454_v11 }
 0x1e8   :  { %v450_v24 = vpop.xlane.xlu1 %449 }
 0x1e9   :  { %v458_v26 = vmul.f32 0.03125, %v450_v24 }
 0x1eb   :  { %v476_v32 = vmul.f32 %v458_v26, %v458_v26  ;;  %v482_v48 = vsub.f32 %v4682_v53, %v458_v26  ;;  %v4276_v53 = vld [vmem:[%s5624_s5 + $0x50] sm:$0xff]  }
 0x1ec   :  { %v453_v25 = vpop.xlane.xlu0 %452  ;;  %3608 = vmatprep.subr.bf16.mxu1 %v4276_v53 }
 0x1ed   :  { %v459_v27 = vmul.f32 0.03125, %v453_v25  ;;  %3609 = vmatpush3.bf16.msra.mxu1 %v4277_v62 }
 0x1ee   :  { %v469_v28 = vpop.xlane.xlu1 %468  ;;  %3610 = vmatprep.subr.bf16.mxu1 %v4278_v0 }
 0x1ef   :  { %v477_v29 = vmul.f32 %v459_v27, %v459_v27  ;;  %v474_v30 = vmul.f32 0.03125, %v469_v28  ;;  %v483_v45 = vsub.f32 %v4686_v61, %v459_v27 }
 0x1f0   :  { %v466_v31 = vpop.xlane.xlu0 %465 }
 0x1f1   :  { %v480_v33 = vsub.f32 %v474_v30, %v477_v29  ;;  %v473_v34 = vmul.f32 0.03125, %v466_v31  ;;  %3611 = vmatpush3.bf16.msra.mxu1 %v4279_v1 }
 0x1f2   :  { %v472_v37 = vpop.xlane.xlu1 %471  ;;  %3612 = vmatprep.subr.bf16.mxu1 %v4280_v19 }
 0x1f3   :  { %v486_v35 = vadd.f32 1e-05, %v480_v33  ;;  %v479_v36 = vsub.f32 %v473_v34, %v476_v32  ;;  %v475_v41 = vmul.f32 0.03125, %v472_v37 }
 0x1f4   :  { %v456_v38 = vpop.xlane.xlu0 %455 }
 0x1f5   :  { %4358 = vrsqrt.f32 %v486_v35  ;;  %v485_v39 = vadd.f32 1e-05, %v479_v36  ;;  %v460_v40 = vmul.f32 0.03125, %v456_v38  ;;  %3613 = vmatpush3.bf16.msra.mxu1 %v4281_v20 }
 0x1f7   :  { %4360 = vrsqrt.f32 %v485_v39  ;;  %v478_v42 = vmul.f32 %v460_v40, %v460_v40  ;;  %v484_v57 = vsub.f32 %v4694_v6, %v460_v40 }
 0x1f9   :  { %v481_v43 = vsub.f32 %v475_v41, %v478_v42 }
 0x1fb   :  { %v487_v44 = vadd.f32 1e-05, %v481_v43 }
 0x1fd   :  { %4362 = vrsqrt.f32 %v487_v44 }
 0x202   :  { %v4359_v46 = vpop.eup %4358 }
 0x203   :  { %v492_v49 = vmul.f32 %v4359_v46, %v483_v45 }
 0x204   :  { %v4361_v50 = vpop.eup %4360 }
 0x205   :  { %v491_v52 = vmul.f32 %v4361_v50, %v482_v48  ;;  %v502_v54 = vmul.f32 %v3418_v47, %v492_v49 }
 0x207   :  { %v501_v55 = vmul.f32 %v3418_v47, %v491_v52  ;;  %v512_v56 = vadd.f32 %v3419_v51, %v502_v54 }
 0x209   :  { %v511_v58 = vadd.f32 %v3419_v51, %v501_v55  ;;  %515 = vst.msk [vmem:[#allocation2 + $0x10] sm:$0xff] %vm55_vm0, %v512_v56 }
 0x20a   :  { %v4363_v60 = vpop.eup %4362 }
 0x20b   :  { %v493_v61 = vmul.f32 %v4363_v60, %v484_v57  ;;  %514 = vst.msk [vmem:[#allocation2 + $0x8] sm:$0xff] %vm55_vm0, %v511_v58 }
 0x20d   :  { %v503_v63 = vmul.f32 %v3418_v47, %v493_v61 }
 0x20f   :  { %v513_v3 = vadd.f32 %v3419_v51, %v503_v63 }
 0x210   :  { %v4766_v10 = vld [vmem:[#allocation2 + $0x10] sm:$0xff] }
 0x211   :  { %516 = vst.msk [vmem:[#allocation2 + $0x18] sm:$0xff] %vm55_vm0, %v513_v3 }
 0x212   :  { %v537_v4 = vld [vmem:[#allocation2 + $0x5] sm:$0xff]  ;;  %v538_v5 = vld [vmem:[#allocation2 + $0xd] sm:$0xff] }
 0x213   :  { %v521_v6 = vld [vmem:[#allocation2 + $0x1] sm:$0xff]  ;;  %v3931_v7 = vpack.i.bf16 %v538_v5, %v537_v4  ;;  %v522_v8 = vld [vmem:[#allocation2 + $0x9] sm:$0xff] }
 0x214   :  { %v4764_v9 = vld [vmem:[#allocation2 + $0x8] sm:$0xff]  ;;  %v3936_v11 = vpack.i.bf16 %v522_v8, %v521_v6 }
 0x215   :  { %v672_v12 = vpack.c.bf16 %v4766_v10, %v4764_v9  ;;  %v525_v13 = vld [vmem:[#allocation2 + $0x2] sm:$0xff]  ;;  %v526_v14 = vld [vmem:[#allocation2 + $0xa] sm:$0xff]  ;;  %3932 = vrot.lane.b32.xlu0 %v3931_v7, %s4470_s29 }
 0x216   :  { %v541_v15 = vld [vmem:[#allocation2 + $0x6] sm:$0xff]  ;;  %v542_v16 = vld [vmem:[#allocation2 + $0xe] sm:$0xff]  ;;  %3937 = vrot.lane.b32.xlu1 %v3936_v11, %s4470_s29  ;;  %v3946_v18 = vpack.i.bf16 %v526_v14, %v525_v13 }
 0x217   :  { %3794 = vmatprep.mubr.msk.bf16.mxu0 %vm55_vm0, %v672_v12  ;;  %v3941_v21 = vpack.i.bf16 %v542_v16, %v541_v15  ;;  %v529_v23 = vld [vmem:[#allocation2 + $0x3] sm:$0xff]  ;;  %v530_v24 = vld [vmem:[#allocation2 + $0xb] sm:$0xff] }
 0x218   :  { %v4779_v22 = vld [vmem:[#allocation2 + $0x18] sm:$0xff]  ;;  %v545_v26 = vld [vmem:[#allocation2 + $0x7] sm:$0xff]  ;;  %v546_v27 = vld [vmem:[#allocation2 + $0xf] sm:$0xff]  ;;  %v3956_v28 = vpack.i.bf16 %v530_v24, %v529_v23 }
 0x219   :  { %3947 = vrot.lane.b32.xlu0 %v3946_v18, %s4469_s26  ;;  %v675_v25 = vpack.c.bf16 %v549_v17, %v4779_v22  ;;  %v3951_v29 = vpack.i.bf16 %v546_v27, %v545_v26  ;;  %v523_v30 = vld [vmem:[#allocation2 + $0x11] sm:$0xff]  ;;  %v524_v31 = vld [vmem:[#allocation2 + $0x19] sm:$0xff]  ;;  %v533_v60 = vld [vmem:[#allocation2 + $0x4] sm:$0xff] }
 0x21a   :  { %3942 = vrot.lane.b32.xlu1 %v3941_v21, %s4469_s26  ;;  %v539_v32 = vld [vmem:[#allocation2 + $0x15] sm:$0xff]  ;;  %v540_v33 = vld [vmem:[#allocation2 + $0x1d] sm:$0xff]  ;;  %v3966_v34 = vpack.i.bf16 %v524_v31, %v523_v30  ;;  %v534_v61 = vld [vmem:[#allocation2 + $0xc] sm:$0xff] }
 0x21b   :  { %3795 = vmatmul.mubr.msk.bf16.vlgmr.msra.gmra.mxu0 %vm55_vm0, %v675_v25  ;;  %v3961_v35 = vpack.i.bf16 %v540_v33, %v539_v32  ;;  %v527_v36 = vld [vmem:[#allocation2 + $0x12] sm:$0xff]  ;;  %v528_v37 = vld [vmem:[#allocation2 + $0x1a] sm:$0xff] }
 0x21c   :  { %v543_v38 = vld [vmem:[#allocation2 + $0x16] sm:$0xff]  ;;  %v544_v39 = vld [vmem:[#allocation2 + $0x1e] sm:$0xff]  ;;  %v3976_v40 = vpack.i.bf16 %v528_v37, %v527_v36  ;;  %3802 = vmatprep.mubr.msk.bf16.mxu0 %vm4472_vm3, %v4468_v2 }
 0x21d   :  { %3957 = vrot.lane.b32.xlu0 %v3956_v28, %s4471_s24  ;;  %v3971_v41 = vpack.i.bf16 %v544_v39, %v543_v38  ;;  %v531_v42 = vld [vmem:[#allocation2 + $0x13] sm:$0xff]  ;;  %v532_v43 = vld [vmem:[#allocation2 + $0x1b] sm:$0xff] }
 0x21e   :  { %3952 = vrot.lane.b32.xlu1 %v3951_v29, %s4471_s24  ;;  %v547_v44 = vld [vmem:[#allocation2 + $0x17] sm:$0xff]  ;;  %v548_v45 = vld [vmem:[#allocation2 + $0x1f] sm:$0xff]  ;;  %v3986_v46 = vpack.i.bf16 %v532_v43, %v531_v42 }
 0x21f   :  { %v3981_v47 = vpack.i.bf16 %v548_v45, %v547_v44  ;;  %v536_v36 = vld [vmem:[#allocation2 + $0x1c] sm:$0xff] }
 0x221   :  { %3967 = vrot.lane.b32.xlu0 %v3966_v34, %s4470_s29 }
 0x222   :  { %3962 = vrot.lane.b32.xlu1 %v3961_v35, %s4470_s29  ;;  %v535_v35 = vld [vmem:[#allocation2 + $0x14] sm:$0xff] }
 0x225   :  { %3977 = vrot.lane.b32.xlu0 %v3976_v40, %s4469_s26 }
 0x226   :  { %3972 = vrot.lane.b32.xlu1 %v3971_v41, %s4469_s26 }
 0x229   :  { %3987 = vrot.lane.b32.xlu0 %v3986_v46, %s4471_s24 }
 0x22a   :  { %3982 = vrot.lane.b32.xlu1 %v3981_v47, %s4471_s24 }
 0x287   :  { %v3933_v48 = vpop.permute.xlu0 %3932 }
 0x288   :  { %v3938_v49 = vpop.permute.xlu1 %3937  ;;  %v3935_v50 = vunpack.i.h.bf16 %v3933_v48  ;;  %v3934_v51 = vunpack.i.l.bf16 %v3933_v48 }
 0x289   :  { %v3940_v54 = vunpack.i.h.bf16 %v3938_v49  ;;  %v3939_v55 = vunpack.i.l.bf16 %v3938_v49 }
 0x28a   :  { %v658_v63 = vsel %vm55_vm0, %v533_v60, %v3934_v51  ;;  %v659_v0 = vsel %vm55_vm0, %v534_v61, %v3935_v50 }
 0x28b   :  { %v3948_v52 = vpop.permute.xlu0 %3947  ;;  %v647_v3 = vsel %vm55_vm0, %v4764_v9, %v3940_v54  ;;  %v646_v4 = vsel %vm55_vm0, %v4658_v59, %v3939_v55 }
 0x28c   :  { %v3943_v56 = vpop.permute.xlu1 %3942  ;;  %v3950_v57 = vunpack.i.h.bf16 %v3948_v52  ;;  %v3949_v58 = vunpack.i.l.bf16 %v3948_v52 }
 0x28d   :  { %v3945_v53 = vunpack.i.h.bf16 %v3943_v56  ;;  %v3944_v62 = vunpack.i.l.bf16 %v3943_v56 }
 0x28e   :  { %v650_v8 = vsel %vm172_vm1, %v646_v4, %v3949_v58  ;;  %v651_v11 = vsel %vm172_vm1, %v647_v3, %v3950_v57  ;;  %v3420_v57 = vld [vmem:[%s5625_s6] ss:$0 sm:$0xff] }
 0x28f   :  { %v3958_v1 = vpop.permute.xlu0 %3957  ;;  %v662_v16 = vsel %vm172_vm1, %v658_v63, %v3944_v62  ;;  %v663_v9 = vsel %vm172_vm1, %v659_v0, %v3945_v53 }
 0x290   :  { %v3960_v5 = vunpack.i.h.bf16 %v3958_v1  ;;  %v3959_v6 = vunpack.i.l.bf16 %v3958_v1  ;;  %v3953_v7 = vpop.permute.xlu1 %3952 }
 0x291   :  { %v3955_v12 = vunpack.i.h.bf16 %v3953_v7  ;;  %v3954_v13 = vunpack.i.l.bf16 %v3953_v7 }
 0x292   :  { %v654_v14 = vsel %vm176_vm2, %v650_v8, %v3959_v6  ;;  %v655_v15 = vsel %vm176_vm2, %v651_v11, %v3960_v5 }
 0x293   :  { %v3968_v17 = vpop.permute.xlu0 %3967  ;;  %v666_v59 = vsel %vm176_vm2, %v662_v16, %v3954_v13  ;;  %v667_v18 = vsel %vm176_vm2, %v663_v9, %v3955_v12  ;;  %v670_v19 = vpack.c.bf16 %v655_v15, %v654_v14 }
 0x294   :  { %v3963_v20 = vpop.permute.xlu1 %3962  ;;  %v671_v21 = vpack.c.bf16 %v667_v18, %v666_v59  ;;  %v3970_v23 = vunpack.i.h.bf16 %v3968_v17  ;;  %v3969_v24 = vunpack.i.l.bf16 %v3968_v17 }
 0x295   :  { %v3965_v26 = vunpack.i.h.bf16 %v3963_v20  ;;  %v3964_v27 = vunpack.i.l.bf16 %v3963_v20 }
 0x296   :  { %865 = vmatprep.mubr.bf16.mxu1 %v671_v21  ;;  %v648_v33 = vsel %vm55_vm0, %v4766_v10, %v3969_v24  ;;  %v649_v34 = vsel %vm55_vm0, %v4779_v22, %v3970_v23 }
 0x297   :  { %866 = vmatmul.mubr.bf16.vlgmr.msra.gmra.mxu1 %v670_v19  ;;  %v3978_v25 = vpop.permute.xlu0 %3977  ;;  %v661_v38 = vsel %vm55_vm0, %v536_v36, %v3965_v26  ;;  %v660_v39 = vsel %vm55_vm0, %v535_v35, %v3964_v27  ;;  %v4286_v35 = vld [vmem:[%s5628_s9 + $0x70] sm:$0xff]  }
 0x298   :  { %v3973_v28 = vpop.permute.xlu1 %3972  ;;  %v3980_v29 = vunpack.i.h.bf16 %v3978_v25  ;;  %v3979_v30 = vunpack.i.l.bf16 %v3978_v25  ;;  %v4287_v36 = vld [vmem:[%s5628_s9 + $0x30] sm:$0xff]  }
 0x299   :  { %v3975_v31 = vunpack.i.h.bf16 %v3973_v28  ;;  %v3974_v32 = vunpack.i.l.bf16 %v3973_v28 }
 0x29a   :  { %v652_v43 = vsel %vm172_vm1, %v648_v33, %v3979_v30  ;;  %v653_v44 = vsel %vm172_vm1, %v649_v34, %v3980_v29  ;;  %v4282_v29 = vld [vmem:[%s5628_s9 + $0x88] sm:$0xff]   ;;  %v4283_v30 = vld [vmem:[%s5628_s9 + $0x80] sm:$0xff]   ;;  %v4284_v33 = vld [vmem:[%s5628_s9 + $0x78] sm:$0xff]  }
 0x29b   :  { %v3988_v37 = vpop.permute.xlu0 %3987  ;;  %v664_v10 = vsel %vm172_vm1, %v660_v39, %v3974_v32  ;;  %v665_v22 = vsel %vm172_vm1, %v661_v38, %v3975_v31  ;;  %3799 = vmatpush3.bf16.msra.mxu0 %v4282_v29  ;;  %v3478_v31 = vld [vmem:[%s5638_s23 + $0x10] sm:$0xff]  ;;  %v3479_v32 = vld [vmem:[%s5638_s23 + $0x18] sm:$0xff]  ;;  %3630 = vmatprep.subr.bf16.mxu1 %v4284_v33  ;;  %v4289_v38 = vld [vmem:[%s5628_s9 + $0x28] sm:$0xff]  }
 0x29c   :  { %v3990_v40 = vunpack.i.h.bf16 %v3988_v37  ;;  %v3989_v41 = vunpack.i.l.bf16 %v3988_v37  ;;  %v3983_v42 = vpop.permute.xlu1 %3982  ;;  %3800 = vmatprep.subr.bf16.mxu0 %v4468_v2  ;;  %1728 = vst.msk [vmem:[#allocation2 + $0x38] sm:$0xff] %vm55_vm0, %v3478_v31  ;;  %1729 = vst.msk [vmem:[#allocation2 + $0x40] sm:$0xff] %vm55_vm0, %v3479_v32  ;;  %v4285_v34 = vld [vmem:[%s5628_s9 + $0x38] sm:$0xff]   ;;  %v4288_v37 = vld [vmem:[%s5628_s9 + $0x68] sm:$0xff]  }
 0x29d   :  { %v3985_v45 = vunpack.i.h.bf16 %v3983_v42  ;;  %v3984_v46 = vunpack.i.l.bf16 %v3983_v42  ;;  %3631 = vmatpush3.bf16.msra.mxu1 %v4285_v34  ;;  %v4290_v39 = vld [vmem:[%s5628_s9 + $0x60] sm:$0xff]   ;;  %v4293_v42 = vld [vmem:[%s5628_s9 + $0x18] sm:$0xff]   ;;  %v4296_v29 = vld [vmem:[%s5628_s9 + $0x48] sm:$0xff]  }
 0x29e   :  { %v656_v47 = vsel %vm176_vm2, %v652_v43, %v3989_v41  ;;  %v657_v48 = vsel %vm176_vm2, %v653_v44, %v3990_v40  ;;  %3632 = vmatprep.subr.bf16.mxu1 %v4286_v35  ;;  %v4291_v40 = vld [vmem:[%s5628_s9 + $0x20] sm:$0xff]   ;;  %v4292_v41 = vld [vmem:[%s5628_s9 + $0x58] sm:$0xff]  }
 0x29f   :  { %v668_v49 = vsel %vm176_vm2, %v664_v10, %v3984_v46  ;;  %v669_v50 = vsel %vm176_vm2, %v665_v22, %v3985_v45  ;;  %v673_v51 = vpack.c.bf16 %v657_v48, %v656_v47  ;;  %3801 = vmatpush3.bf16.msra.mxu0 %v4283_v30 }
 0x2a0   :  { %v674_v52 = vpack.c.bf16 %v669_v50, %v668_v49  ;;  %3814 = vmatprep.subr.bf16.mxu0 %v4468_v2 }
 0x2a1   :  { %3633 = vmatpush3.bf16.msra.mxu1 %v4287_v36 }
 0x2a2   :  { %873 = vmatprep.mubr.bf16.mxu1 %v674_v52  ;;  %3634 = vmatprep.subr.bf16.mxu1 %v4288_v37 }
 0x2a3   :  { %874 = vmatmul.mubr.bf16.gmra.mxu1 %v673_v51 }
 0x2a5   :  { %3635 = vmatpush3.bf16.msra.mxu1 %v4289_v38 }
 0x2a6   :  { %3636 = vmatprep.subr.bf16.mxu1 %v4290_v39 }
 0x2a9   :  { %3637 = vmatpush3.bf16.msra.mxu1 %v4291_v40 }
 0x2aa   :  { %3638 = vmatprep.subr.bf16.mxu1 %v4292_v41 }
 0x2ad   :  { %3639 = vmatpush3.bf16.msra.mxu1 %v4293_v42 }
 0x2db   :  { %v3796_v54 = vpop.f32.mrf.mxu0 }
 0x2dd   :  { %v916_v56 = vpop.f32.mrf.mxu0 }
 0x2df   :  { %v3797_v62 = vpop.f32.mrf.mxu0 }
 0x2e1   :  { %v919_v5 = vpop.f32.mrf.mxu0 }
 0x357   :  { %v3614_v55 = vpop.f32.mrf.mxu1 }
 0x359   :  { %v3615_v58 = vpop.f32.mrf.mxu1 }
 0x35a   :  { %v3616_v60 = vadd.f32 %v3615_v58, %v3614_v55 }
 0x35b   :  { %v3617_v61 = vpop.f32.mrf.mxu1 }
 0x35c   :  { %v868_v53 = vadd.f32 %v3616_v60, %v3420_v57 }
 0x35d   :  { %v3618_v63 = vpop.f32.mrf.mxu1 }
 0x35e   :  { %v4824_v0 = vadd.f32 %v916_v56, %v868_v53  ;;  %v3619_v1 = vadd.f32 %v3618_v63, %v3617_v61 }
 0x360   :  { %v871_v3 = vadd.f32 %v3619_v1, %v3420_v57  ;;  %v931_v4 = vsel %vm55_vm0, %v4824_v0, 0.0  ;;  %v947_v12 = vmul.f32 %v4824_v0, %v4824_v0 }
 0x361   :  { %932 = vadd.xlane.f32.xlu1 %v931_v4 }
 0x362   :  { %v4828_v6 = vadd.f32 %v919_v5, %v871_v3  ;;  %v951_v17 = vsel %vm55_vm0, %v947_v12, 0.0 }
 0x363   :  { %v3620_v7 = vpop.f32.mrf.mxu1 }
 0x364   :  { %v934_v8 = vsel %vm55_vm0, %v4828_v6, 0.0  ;;  %v948_v11 = vmul.f32 %v4828_v6, %v4828_v6 }
 0x365   :  { %v3621_v13 = vpop.f32.mrf.mxu1  ;;  %935 = vadd.xlane.f32.xlu0 %v934_v8 }
 0x366   :  { %v3622_v14 = vadd.f32 %v3621_v13, %v3620_v7  ;;  %v954_v15 = vsel %vm55_vm0, %v948_v11, 0.0  ;;  %v3441_v13 = vld [vmem:[%s5626_s7] ss:$0 sm:$0xff] }
 0x367   :  { %v3623_v16 = vpop.f32.mrf.mxu1  ;;  %955 = vadd.xlane.f32.xlu1 %v954_v15 }
 0x368   :  { %v876_v9 = vadd.f32 %v3622_v14, %v3420_v57 }
 0x369   :  { %v3624_v59 = vpop.f32.mrf.mxu1  ;;  %952 = vadd.xlane.f32.xlu0 %v951_v17 }
 0x36a   :  { %v4838_v18 = vadd.f32 %v3796_v54, %v876_v9  ;;  %v3625_v19 = vadd.f32 %v3624_v59, %v3623_v16  ;;  %v3442_v9 = vld [vmem:[%s5627_s8] ss:$0 sm:$0xff] }
 0x36c   :  { %v879_v20 = vadd.f32 %v3625_v19, %v3420_v57  ;;  %v937_v21 = vsel %vm55_vm0, %v4838_v18, 0.0  ;;  %v949_v23 = vmul.f32 %v4838_v18, %v4838_v18 }
 0x36d   :  { %938 = vadd.xlane.f32.xlu0 %v937_v21 }
 0x36e   :  { %v4844_v24 = vadd.f32 %v3797_v62, %v879_v20  ;;  %v957_v25 = vsel %vm55_vm0, %v949_v23, 0.0  ;;  %v4295_v23 = vld [vmem:[%s5628_s9 + $0x10] sm:$0xff]  }
 0x370   :  { %v940_v26 = vsel %vm55_vm0, %v4844_v24, 0.0  ;;  %v950_v27 = vmul.f32 %v4844_v24, %v4844_v24 }
 0x371   :  { %958 = vadd.xlane.f32.xlu0 %v957_v25  ;;  %941 = vadd.xlane.f32.xlu1 %v940_v26 }
 0x372   :  { %v960_v28 = vsel %vm55_vm0, %v950_v27, 0.0 }
 0x375   :  { %961 = vadd.xlane.f32.xlu1 %v960_v28 }
 0x3ea   :  { %v933_v43 = vpop.xlane.xlu1 %932 }
 0x3eb   :  { %v943_v45 = vmul.f32 0.03125, %v933_v43 }
 0x3ed   :  { %v967_v49 = vmul.f32 %v943_v45, %v943_v45  ;;  %v975_v14 = vsub.f32 %v4824_v0, %v943_v45  ;;  %v4294_v0 = vld [vmem:[%s5628_s9 + $0x50] sm:$0xff]  }
 0x3ee   :  { %v936_v44 = vpop.xlane.xlu0 %935  ;;  %3640 = vmatprep.subr.bf16.mxu1 %v4294_v0  ;;  %v1746_v0 = vld [vmem:[#allocation2 + $0x3d] sm:$0xff] }
 0x3ef   :  { %v944_v46 = vmul.f32 0.03125, %v936_v44  ;;  %3641 = vmatpush3.bf16.msra.mxu1 %v4295_v23 }
 0x3f0   :  { %v956_v10 = vpop.xlane.xlu1 %955  ;;  %3642 = vmatprep.subr.bf16.mxu1 %v4296_v29  ;;  %v1748_v29 = vld [vmem:[#allocation2 + $0x36] sm:$0xff] }
 0x3f1   :  { %v968_v22 = vmul.f32 %v944_v46, %v944_v46  ;;  %v964_v47 = vmul.f32 0.03125, %v956_v10  ;;  %v976_v8 = vsub.f32 %v4828_v6, %v944_v46 }
 0x3f2   :  { %v953_v48 = vpop.xlane.xlu0 %952 }
 0x3f3   :  { %v972_v50 = vsub.f32 %v964_v47, %v968_v22  ;;  %v963_v51 = vmul.f32 0.03125, %v953_v48  ;;  %v4298_v22 = vld [vmem:[%s5628_s9 + $0x40] sm:$0xff]   ;;  %v4300_v48 = vld [vmem:[%s5620_s1 + $0x78] sm:$0xff]  }
 0x3f4   :  { %v4299_v47 = vld [vmem:[%s5628_s9] sm:$0xff]  }
 0x3f5   :  { %v980_v52 = vadd.f32 1e-05, %v972_v50  ;;  %v971_v54 = vsub.f32 %v963_v51, %v967_v49 }
 0x3f6   :  { %v939_v55 = vpop.xlane.xlu0 %938 }
 0x3f7   :  { %4364 = vrsqrt.f32 %v980_v52  ;;  %v979_v56 = vadd.f32 1e-05, %v971_v54  ;;  %v945_v57 = vmul.f32 0.03125, %v939_v55 }
 0x3f9   :  { %4366 = vrsqrt.f32 %v979_v56  ;;  %v969_v61 = vmul.f32 %v945_v57, %v945_v57  ;;  %v977_v21 = vsub.f32 %v4838_v18, %v945_v57  ;;  %v4297_v18 = vld [vmem:[%s5628_s9 + $0x8] sm:$0xff]  }
 0x3fa   :  { %v959_v58 = vpop.xlane.xlu0 %958  ;;  %v942_v60 = vpop.xlane.xlu1 %941  ;;  %3643 = vmatpush3.bf16.msra.mxu1 %v4297_v18  ;;  %v1749_v18 = vld [vmem:[#allocation2 + $0x3e] sm:$0xff] }
 0x3fb   :  { %v965_v53 = vmul.f32 0.03125, %v959_v58  ;;  %v946_v62 = vmul.f32 0.03125, %v942_v60  ;;  %3644 = vmatprep.subr.bf16.mxu1 %v4298_v22 }
 0x3fd   :  { %v973_v63 = vsub.f32 %v965_v53, %v969_v61  ;;  %v970_v4 = vmul.f32 %v946_v62, %v946_v62  ;;  %v978_v28 = vsub.f32 %v4844_v24, %v946_v62 }
 0x3fe   :  { %v962_v1 = vpop.xlane.xlu1 %961  ;;  %3645 = vmatpush3.bf16.msra.mxu1 %v4299_v47 }
 0x3ff   :  { %v981_v3 = vadd.f32 1e-05, %v973_v63  ;;  %v966_v5 = vmul.f32 0.03125, %v962_v1  ;;  %3674 = vmatprep.subr.bf16.mxu1 %v4300_v48  ;;  %v1741_v48 = vld [vmem:[#allocation2 + $0x43] sm:$0xff] }
 0x401   :  { %4368 = vrsqrt.f32 %v981_v3  ;;  %v974_v7 = vsub.f32 %v966_v5, %v970_v4 }
 0x403   :  { %v982_v11 = vadd.f32 1e-05, %v974_v7 }
 0x404   :  { %v4365_v12 = vpop.eup %4364 }
 0x405   :  { %v988_v15 = vmul.f32 %v4365_v12, %v976_v8  ;;  %4370 = vrsqrt.f32 %v982_v11 }
 0x406   :  { %v4367_v16 = vpop.eup %4366 }
 0x407   :  { %v999_v17 = vmul.f32 %v3441_v13, %v988_v15  ;;  %v987_v59 = vmul.f32 %v4367_v16, %v975_v14 }
 0x409   :  { %v1010_v19 = vadd.f32 %v3442_v9, %v999_v17  ;;  %v998_v20 = vmul.f32 %v3441_v13, %v987_v59 }
 0x40b   :  { %1014 = vst.msk [vmem:[#allocation2 + $0x10] sm:$0xff] %vm55_vm0, %v1010_v19  ;;  %v1009_v6 = vadd.f32 %v3442_v9, %v998_v20 }
 0x40d   :  { %1013 = vst.msk [vmem:[#allocation2 + $0x8] sm:$0xff] %vm55_vm0, %v1009_v6 }
 0x40e   :  { %v4369_v25 = vpop.eup %4368 }
 0x40f   :  { %v989_v26 = vmul.f32 %v4369_v25, %v977_v21  ;;  %v1745_v21 = vld [vmem:[#allocation2 + $0x35] sm:$0xff] }
 0x411   :  { %v1000_v27 = vmul.f32 %v3441_v13, %v989_v26 }
 0x412   :  { %v4371_v30 = vpop.eup %4370  ;;  %v4927_v39 = vld [vmem:[#allocation2 + $0x10] sm:$0xff] }
 0x413   :  { %v1011_v31 = vadd.f32 %v3442_v9, %v1000_v27  ;;  %v990_v32 = vmul.f32 %v4371_v30, %v978_v28  ;;  %v4061_v28 = vpack.i.bf16 %v1746_v0, %v1745_v21  ;;  %v1733_v30 = vld [vmem:[#allocation2 + $0x31] sm:$0xff] }
 0x414   :  { %v1042_v33 = vld [vmem:[#allocation2 + $0x5] sm:$0xff]  ;;  %v1043_v34 = vld [vmem:[#allocation2 + $0xd] sm:$0xff] }
 0x415   :  { %v1022_v35 = vld [vmem:[#allocation2 + $0x1] sm:$0xff]  ;;  %1015 = vst.msk [vmem:[#allocation2 + $0x18] sm:$0xff] %vm55_vm0, %v1011_v31  ;;  %v1001_v36 = vmul.f32 %v3441_v13, %v990_v32  ;;  %v3991_v24 = vpack.i.bf16 %v1043_v34, %v1042_v33  ;;  %v1023_v37 = vld [vmem:[#allocation2 + $0x9] sm:$0xff]  ;;  %v1734_v31 = vld [vmem:[#allocation2 + $0x39] sm:$0xff]  ;;  %v4076_v33 = vpack.i.bf16 %v1749_v18, %v1748_v29 }
 0x416   :  { %v4925_v38 = vld [vmem:[#allocation2 + $0x8] sm:$0xff]  ;;  %v3996_v40 = vpack.i.bf16 %v1023_v37, %v1022_v35  ;;  %v4071_v35 = vpack.i.bf16 %v1734_v31, %v1733_v30 }
 0x417   :  { %v1210_v41 = vpack.c.bf16 %v4927_v39, %v4925_v38  ;;  %v1027_v42 = vld [vmem:[#allocation2 + $0x2] sm:$0xff]  ;;  %v1028_v43 = vld [vmem:[#allocation2 + $0xa] sm:$0xff]  ;;  %v1012_v44 = vadd.f32 %v3442_v9, %v1001_v36  ;;  %3992 = vrot.lane.b32.xlu0 %v3991_v24, %s4470_s29  ;;  %v1751_v36 = vld [vmem:[#allocation2 + $0x37] sm:$0xff] }
 0x418   :  { %v1047_v45 = vld [vmem:[#allocation2 + $0x6] sm:$0xff]  ;;  %v1048_v46 = vld [vmem:[#allocation2 + $0xe] sm:$0xff]  ;;  %3997 = vrot.lane.b32.xlu1 %v3996_v40, %s4470_s29  ;;  %v4006_v10 = vpack.i.bf16 %v1028_v43, %v1027_v42 }
 0x419   :  { %3803 = vmatmul.mubr.msk.bf16.vlgmr.msra.gmra.mxu0 %vm55_vm0, %v1210_v41  ;;  %1016 = vst.msk [vmem:[#allocation2 + $0x20] sm:$0xff] %vm55_vm0, %v1012_v44  ;;  %v4001_v49 = vpack.i.bf16 %v1048_v46, %v1047_v45  ;;  %v1032_v50 = vld [vmem:[#allocation2 + $0x3] sm:$0xff]  ;;  %v1033_v51 = vld [vmem:[#allocation2 + $0xb] sm:$0xff]  ;;  %v1737_v41 = vld [vmem:[#allocation2 + $0x3a] sm:$0xff] }
 0x41a   :  { %3806 = vmatprep.mubr.msk.bf16.mxu0 %vm4472_vm3, %v4468_v2  ;;  %v1052_v52 = vld [vmem:[#allocation2 + $0x7] sm:$0xff]  ;;  %v1053_v54 = vld [vmem:[#allocation2 + $0xf] sm:$0xff]  ;;  %v4016_v55 = vpack.i.bf16 %v1033_v51, %v1032_v50  ;;  %v1752_v24 = vld [vmem:[#allocation2 + $0x3f] sm:$0xff] }
 0x41b   :  { %4007 = vrot.lane.b32.xlu0 %v4006_v10, %s4469_s26  ;;  %v4011_v56 = vpack.i.bf16 %v1053_v54, %v1052_v52  ;;  %v1057_v34 = vld [vmem:[#allocation2 + $0x28] sm:$0xff]  ;;  %v1736_v40 = vld [vmem:[#allocation2 + $0x32] sm:$0xff]  ;;  %v4086_v42 = vpack.i.bf16 %v1752_v24, %v1751_v36  ;;  %v1740_v10 = vld [vmem:[#allocation2 + $0x3b] sm:$0xff] }
 0x41c   :  { %4002 = vrot.lane.b32.xlu1 %v4001_v49, %s4469_s26  ;;  %v1044_v57 = vld [vmem:[#allocation2 + $0x15] sm:$0xff]  ;;  %v1216_v37 = vpack.c.bf16 %v1057_v34, %v1057_v34  ;;  %v4081_v43 = vpack.i.bf16 %v1737_v41, %v1736_v40  ;;  %v1735_v44 = vld [vmem:[#allocation2 + $0x41] sm:$0xff] }
 0x41d   :  { %v1024_v58 = vld [vmem:[#allocation2 + $0x11] sm:$0xff]  ;;  %v1747_v45 = vld [vmem:[#allocation2 + $0x45] sm:$0xff] }
 0x41e   :  { %v4949_v60 = vld [vmem:[#allocation2 + $0x18] sm:$0xff]  ;;  %v4096_v22 = vpack.i.bf16 %v1735_v44, %v1747_v45  ;;  %v1753_v49 = vld [vmem:[#allocation2 + $0x47] sm:$0xff]  ;;  %v4303_v41 = vld [vmem:[%s5620_s1 + $0x30] sm:$0xff]  }
 0x41f   :  { %4017 = vrot.lane.b32.xlu0 %v4016_v55, %s4471_s24  ;;  %v1029_v7 = vld [vmem:[#allocation2 + $0x12] sm:$0xff]  ;;  %v1738_v50 = vld [vmem:[#allocation2 + $0x42] sm:$0xff]  ;;  %v4106_v52 = vpack.i.bf16 %v1741_v48, %v1753_v49 }
 0x420   :  { %4012 = vrot.lane.b32.xlu1 %v4011_v56, %s4471_s24  ;;  %v1045_v61 = vld [vmem:[#allocation2 + $0x1d] sm:$0xff]  ;;  %v1034_v15 = vld [vmem:[#allocation2 + $0x13] sm:$0xff]  ;;  %v1051_v19 = vld [vmem:[#allocation2 + $0x26] sm:$0xff] }
 0x421   :  { %v1025_v53 = vld [vmem:[#allocation2 + $0x19] sm:$0xff]  ;;  %v4021_v63 = vpack.i.bf16 %v1045_v61, %v1044_v57  ;;  %v1031_v59 = vld [vmem:[#allocation2 + $0x22] sm:$0xff] }
 0x422   :  { %v4952_v62 = vld [vmem:[#allocation2 + $0x20] sm:$0xff]  ;;  %v4026_v1 = vpack.i.bf16 %v1025_v53, %v1024_v58  ;;  %v1049_v8 = vld [vmem:[#allocation2 + $0x16] sm:$0xff]  ;;  %v4056_v23 = vpack.i.bf16 %v1031_v59, %v1051_v19  ;;  %v4304_v44 = vld [vmem:[%s5620_s1 + $0x68] sm:$0xff]  }
 0x423   :  { %v1213_v3 = vpack.c.bf16 %v4952_v62, %v4949_v60  ;;  %v1030_v4 = vld [vmem:[#allocation2 + $0x1a] sm:$0xff]  ;;  %v1046_v6 = vld [vmem:[#allocation2 + $0x25] sm:$0xff] }
 0x424   :  { %4027 = vrot.lane.b32.xlu0 %v4026_v1, %s4470_s29  ;;  %v1050_v5 = vld [vmem:[#allocation2 + $0x1e] sm:$0xff]  ;;  %4022 = vrot.lane.b32.xlu1 %v4021_v63, %s4470_s29  ;;  %v4036_v11 = vpack.i.bf16 %v1030_v4, %v1029_v7  ;;  %v1056_v27 = vld [vmem:[#allocation2 + $0x27] sm:$0xff]  ;;  %v1739_v46 = vld [vmem:[#allocation2 + $0x33] sm:$0xff] }
 0x425   :  { %3807 = vmatmul.mubr.msk.bf16.gmra.mxu0 %vm55_vm0, %v1213_v3  ;;  %v4031_v12 = vpack.i.bf16 %v1050_v5, %v1049_v8  ;;  %v1035_v13 = vld [vmem:[#allocation2 + $0x1b] sm:$0xff]  ;;  %v1036_v26 = vld [vmem:[#allocation2 + $0x23] sm:$0xff]  ;;  %v4091_v47 = vpack.i.bf16 %v1740_v10, %v1739_v46  ;;  %v1038_v8 = vld [vmem:[#allocation2 + $0xc] sm:$0xff] }
 0x426   :  { %3810 = vmatprep.mubr.msk.bf16.mxu0 %vm4472_vm3, %v4468_v2  ;;  %v1055_v14 = vld [vmem:[#allocation2 + $0x1f] sm:$0xff]  ;;  %v1054_v16 = vld [vmem:[#allocation2 + $0x17] sm:$0xff]  ;;  %v4046_v9 = vpack.i.bf16 %v1035_v13, %v1034_v15  ;;  %v4066_v32 = vpack.i.bf16 %v1036_v26, %v1056_v27 }
 0x427   :  { %v4041_v17 = vpack.i.bf16 %v1055_v14, %v1054_v16  ;;  %v1026_v20 = vld [vmem:[#allocation2 + $0x21] sm:$0xff] }
 0x428   :  { %4037 = vrot.lane.b32.xlu0 %v4036_v11, %s4469_s26  ;;  %4032 = vrot.lane.b32.xlu1 %v4031_v12, %s4469_s26  ;;  %v4051_v25 = vpack.i.bf16 %v1026_v20, %v1046_v6  ;;  %v1750_v51 = vld [vmem:[#allocation2 + $0x46] sm:$0xff]  ;;  %v1040_v48 = vld [vmem:[#allocation2 + $0x1c] sm:$0xff] }
 0x429   :  { %v4101_v54 = vpack.i.bf16 %v1738_v50, %v1750_v51  ;;  %v1017_v3 = vld [vmem:[#allocation2] sm:$0xff] }
 0x42a   :  { %v1037_v7 = vld [vmem:[#allocation2 + $0x4] sm:$0xff] }
 0x42c   :  { %4047 = vrot.lane.b32.xlu0 %v4046_v9, %s4471_s24  ;;  %4042 = vrot.lane.b32.xlu1 %v4041_v17, %s4471_s24 }
 0x42d   :  { %3811 = vmatmul.mubr.msk.bf16.gmra.mxu0 %vm55_vm0, %v1216_v37 }
 0x42e   :  { %3818 = vmatprep.mubr.msk.bf16.mxu0 %vm4472_vm3, %v4468_v2 }
 0x430   :  { %4057 = vrot.lane.b32.xlu0 %v4056_v23, %s4469_s26  ;;  %4052 = vrot.lane.b32.xlu1 %v4051_v25, %s4470_s29 }
 0x434   :  { %4062 = vrot.lane.b32.xlu0 %v4061_v28, %s4470_s29  ;;  %4067 = vrot.lane.b32.xlu1 %v4066_v32, %s4471_s24  ;;  %v4301_v32 = vld [vmem:[%s5620_s1 + $0x38] sm:$0xff]  }
 0x438   :  { %4077 = vrot.lane.b32.xlu0 %v4076_v33, %s4469_s26  ;;  %4072 = vrot.lane.b32.xlu1 %v4071_v35, %s4470_s29  ;;  %v4302_v33 = vld [vmem:[%s5620_s1 + $0x70] sm:$0xff]  }
 0x43c   :  { %4087 = vrot.lane.b32.xlu0 %v4086_v42, %s4471_s24  ;;  %4082 = vrot.lane.b32.xlu1 %v4081_v43, %s4469_s26 }
 0x440   :  { %4097 = vrot.lane.b32.xlu0 %v4096_v22, %s4470_s29  ;;  %4092 = vrot.lane.b32.xlu1 %v4091_v47, %s4471_s24  ;;  %v1039_v47 = vld [vmem:[#allocation2 + $0x14] sm:$0xff] }
 0x444   :  { %4107 = vrot.lane.b32.xlu0 %v4106_v52, %s4471_s24  ;;  %4102 = vrot.lane.b32.xlu1 %v4101_v54, %s4469_s26 }
 0x489   :  { %v3993_v55 = vpop.permute.xlu0 %3992 }
 0x48a   :  { %v3998_v56 = vpop.permute.xlu1 %3997  ;;  %v3995_v57 = vunpack.i.h.bf16 %v3993_v55  ;;  %v3994_v58 = vunpack.i.l.bf16 %v3993_v55 }
 0x48b   :  { %v4000_v53 = vunpack.i.h.bf16 %v3998_v56  ;;  %v3999_v63 = vunpack.i.l.bf16 %v3998_v56  ;;  %v4305_v56 = vld [vmem:[%s5620_s1 + $0x28] sm:$0xff]  }
 0x48c   :  { %v1193_v13 = vsel %vm55_vm0, %v1037_v7, %v3994_v58  ;;  %v1194_v14 = vsel %vm55_vm0, %v1038_v8, %v3995_v57 }
 0x48d   :  { %v4008_v61 = vpop.permute.xlu0 %4007  ;;  %v1179_v16 = vsel %vm55_vm0, %v4925_v38, %v4000_v53  ;;  %v1178_v9 = vsel %vm55_vm0, %v1017_v3, %v3999_v63 }
 0x48e   :  { %v4003_v1 = vpop.permute.xlu1 %4002  ;;  %v4010_v4 = vunpack.i.h.bf16 %v4008_v61  ;;  %v4009_v5 = vunpack.i.l.bf16 %v4008_v61  ;;  %v4306_v61 = vld [vmem:[%s5620_s1 + $0x60] sm:$0xff]  }
 0x48f   :  { %v4005_v11 = vunpack.i.h.bf16 %v4003_v1  ;;  %v4004_v12 = vunpack.i.l.bf16 %v4003_v1 }
 0x490   :  { %v1183_v20 = vsel %vm172_vm1, %v1178_v9, %v4009_v5  ;;  %v1184_v6 = vsel %vm172_vm1, %v1179_v16, %v4010_v4  ;;  %v4308_v16 = vld [vmem:[%s5620_s1 + $0x58] sm:$0xff]  }
 0x491   :  { %v4018_v15 = vpop.permute.xlu0 %4017  ;;  %v1199_v23 = vsel %vm172_vm1, %v1194_v14, %v4005_v11  ;;  %v1198_v25 = vsel %vm172_vm1, %v1193_v13, %v4004_v12  ;;  %v4307_v13 = vld [vmem:[%s5620_s1 + $0x20] sm:$0xff]  }
 0x492   :  { %v4020_v17 = vunpack.i.h.bf16 %v4018_v15  ;;  %v4019_v59 = vunpack.i.l.bf16 %v4018_v15  ;;  %v4013_v19 = vpop.permute.xlu1 %4012 }
 0x493   :  { %v4015_v21 = vunpack.i.h.bf16 %v4013_v19  ;;  %v4014_v0 = vunpack.i.l.bf16 %v4013_v19 }
 0x494   :  { %v1188_v26 = vsel %vm176_vm2, %v1183_v20, %v4019_v59  ;;  %v1189_v27 = vsel %vm176_vm2, %v1184_v6, %v4020_v17  ;;  %v1041_v59 = vld [vmem:[#allocation2 + $0x24] sm:$0xff] }
 0x495   :  { %v1208_v38 = vpack.c.bf16 %v1189_v27, %v1188_v26  ;;  %v1203_v29 = vsel %vm176_vm2, %v1198_v25, %v4014_v0  ;;  %v1204_v18 = vsel %vm176_vm2, %v1199_v23, %v4015_v21  ;;  %v4309_v0 = vld [vmem:[%s5620_s1 + $0x18] sm:$0xff]   ;;  %v4310_v26 = vld [vmem:[%s5620_s1 + $0x50] sm:$0xff]  }
 0x496   :  { %v4028_v28 = vpop.permute.xlu0 %4027  ;;  %v4023_v30 = vpop.permute.xlu1 %4022  ;;  %v1209_v31 = vpack.c.bf16 %v1204_v18, %v1203_v29  ;;  %v1742_v29 = vld [vmem:[#allocation2 + $0x34] sm:$0xff]  ;;  %v1743_v18 = vld [vmem:[#allocation2 + $0x3c] sm:$0xff] }
 0x497   :  { %v4030_v34 = vunpack.i.h.bf16 %v4028_v28  ;;  %v4029_v35 = vunpack.i.l.bf16 %v4028_v28  ;;  %v4025_v24 = vunpack.i.h.bf16 %v4023_v30  ;;  %v4024_v37 = vunpack.i.l.bf16 %v4023_v30 }
 0x498   :  { %1409 = vmatprep.mubr.bf16.mxu1 %v1209_v31 }
 0x499   :  { %1410 = vmatmul.mubr.bf16.vlgmr.msra.gmra.mxu1 %v1208_v38  ;;  %v1181_v10 = vsel %vm55_vm0, %v4949_v60, %v4030_v34  ;;  %v1180_v22 = vsel %vm55_vm0, %v4927_v39, %v4029_v35  ;;  %v1196_v50 = vsel %vm55_vm0, %v1040_v48, %v4025_v24  ;;  %v1195_v51 = vsel %vm55_vm0, %v1039_v47, %v4024_v37 }
 0x49a   :  { %v4038_v36 = vpop.permute.xlu0 %4037  ;;  %3675 = vmatpush3.bf16.msra.mxu1 %v4301_v32  ;;  %v4033_v40 = vpop.permute.xlu1 %4032 }
 0x49b   :  { %v4040_v42 = vunpack.i.h.bf16 %v4038_v36  ;;  %v4039_v43 = vunpack.i.l.bf16 %v4038_v36  ;;  %3676 = vmatprep.subr.bf16.mxu1 %v4302_v33  ;;  %v4035_v45 = vunpack.i.h.bf16 %v4033_v40  ;;  %v4034_v46 = vunpack.i.l.bf16 %v4033_v40  ;;  %v4311_v36 = vld [vmem:[%s5620_s1 + $0x10] sm:$0xff]   ;;  %v4312_v40 = vld [vmem:[%s5620_s1 + $0x48] sm:$0xff]  }
 0x49d   :  { %v1185_v60 = vsel %vm172_vm1, %v1180_v22, %v4039_v43  ;;  %v1186_v57 = vsel %vm172_vm1, %v1181_v10, %v4040_v42  ;;  %v1200_v53 = vsel %vm172_vm1, %v1195_v51, %v4034_v46  ;;  %v1201_v63 = vsel %vm172_vm1, %v1196_v50, %v4035_v45  ;;  %v4313_v10 = vld [vmem:[%s5620_s1 + $0x8] sm:$0xff]   ;;  %v4314_v50 = vld [vmem:[%s5620_s1 + $0x40] sm:$0xff]   ;;  %v5060_v51 = vld [vmem:[#allocation2 + $0x30] sm:$0xff] }
 0x49e   :  { %v4048_v49 = vpop.permute.xlu0 %4047  ;;  %3677 = vmatpush3.bf16.msra.mxu1 %v4303_v41  ;;  %v4043_v55 = vpop.permute.xlu1 %4042 }
 0x49f   :  { %v4050_v52 = vunpack.i.h.bf16 %v4048_v49  ;;  %v4049_v54 = vunpack.i.l.bf16 %v4048_v49  ;;  %v4045_v39 = vunpack.i.h.bf16 %v4043_v55  ;;  %v4044_v58 = vunpack.i.l.bf16 %v4043_v55  ;;  %3678 = vmatprep.subr.bf16.mxu1 %v4304_v44 }
 0x4a1   :  { %v1190_v1 = vsel %vm176_vm2, %v1185_v60, %v4049_v54  ;;  %v1191_v3 = vsel %vm176_vm2, %v1186_v57, %v4050_v52  ;;  %v1205_v5 = vsel %vm176_vm2, %v1200_v53, %v4044_v58  ;;  %v1206_v7 = vsel %vm176_vm2, %v1201_v63, %v4045_v39  ;;  %v1731_v52 = vld [vmem:[#allocation2 + $0x38] sm:$0xff]  ;;  %v4315_v63 = vld [vmem:[%s5620_s1] sm:$0xff]  }
 0x4a2   :  { %v4058_v4 = vpop.permute.xlu0 %4057  ;;  %v1211_v8 = vpack.c.bf16 %v1191_v3, %v1190_v1  ;;  %3679 = vmatpush3.bf16.msra.mxu1 %v4305_v56  ;;  %v4053_v11 = vpop.permute.xlu1 %4052  ;;  %v1212_v12 = vpack.c.bf16 %v1206_v7, %v1205_v5  ;;  %v1732_v7 = vld [vmem:[#allocation2 + $0x40] sm:$0xff] }
 0x4a3   :  { %v4055_v14 = vunpack.i.h.bf16 %v4053_v11  ;;  %v4054_v15 = vunpack.i.l.bf16 %v4053_v11  ;;  %3680 = vmatprep.subr.bf16.mxu1 %v4306_v61  ;;  %v4060_v9 = vunpack.i.h.bf16 %v4058_v4  ;;  %v4059_v17 = vunpack.i.l.bf16 %v4058_v4  ;;  %v4316_v11 = vld [vmem:[%s5620_s1 + $0x88] sm:$0xff]  }
 0x4a4   :  { %1417 = vmatprep.mubr.bf16.mxu1 %v1212_v12 }
 0x4a5   :  { %v1182_v19 = vsel %vm55_vm0, %v4952_v62, %v4055_v14  ;;  %v1197_v20 = vsel %vm55_vm0, %v1041_v59, %v4054_v15  ;;  %1418 = vmatmul.mubr.bf16.gmra.mxu1 %v1211_v8  ;;  %v1744_v8 = vld [vmem:[#allocation2 + $0x44] sm:$0xff] }
 0x4a6   :  { %v4063_v6 = vpop.permute.xlu0 %4062  ;;  %3681 = vmatpush3.bf16.msra.mxu1 %v4307_v13  ;;  %v4068_v21 = vpop.permute.xlu1 %4067  ;;  %v1202_v62 = vsel %vm172_vm1, %v1197_v20, %v4059_v17  ;;  %v1187_v28 = vsel %vm172_vm1, %v1182_v19, %v4060_v9 }
 0x4a7   :  { %v4070_v23 = vunpack.i.h.bf16 %v4068_v21  ;;  %v4069_v25 = vunpack.i.l.bf16 %v4068_v21  ;;  %3682 = vmatprep.subr.bf16.mxu1 %v4308_v16  ;;  %v4065_v27 = vunpack.i.h.bf16 %v4063_v6  ;;  %v4064_v38 = vunpack.i.l.bf16 %v4063_v6 }
 0x4a9   :  { %v1207_v31 = vsel %vm176_vm2, %v1202_v62, %v4069_v25  ;;  %v1192_v32 = vsel %vm176_vm2, %v1187_v28, %v4070_v23  ;;  %v1837_v41 = vsel %vm55_vm0, %v1743_v18, %v4065_v27  ;;  %v1836_v42 = vsel %vm55_vm0, %v1742_v29, %v4064_v38  ;;  %v1754_v18 = vld [vmem:[#allocation2 + $0x48] sm:$0xff] }
 0x4aa   :  { %v4078_v30 = vpop.permute.xlu0 %4077  ;;  %3683 = vmatpush3.bf16.msra.mxu1 %v4309_v0  ;;  %v4073_v33 = vpop.permute.xlu1 %4072  ;;  %v1215_v34 = vpack.c.bf16 %v1207_v31, %v1207_v31  ;;  %v1214_v35 = vpack.c.bf16 %v1192_v32, %v1192_v32  ;;  %v4317_v0 = vld [vmem:[%s5620_s1 + $0x80] sm:$0xff]   ;;  %v1847_v28 = vpack.c.bf16 %v1732_v7, %v1731_v52 }
 0x4ab   :  { %v4080_v24 = vunpack.i.h.bf16 %v4078_v30  ;;  %v4079_v37 = vunpack.i.l.bf16 %v4078_v30  ;;  %3684 = vmatprep.subr.bf16.mxu1 %v4310_v26  ;;  %v4075_v48 = vunpack.i.h.bf16 %v4073_v33  ;;  %v4074_v49 = vunpack.i.l.bf16 %v4073_v33 }
 0x4ac   :  { %1425 = vmatprep.mubr.bf16.mxu1 %v1215_v34  ;;  %v1850_v30 = vpack.c.bf16 %v1754_v18, %v1754_v18 }
 0x4ad   :  { %1426 = vmatmul.mubr.bf16.gmra.mxu1 %v1214_v35  ;;  %v1839_v22 = vsel %vm172_vm1, %v1836_v42, %v4079_v37  ;;  %v1840_v47 = vsel %vm172_vm1, %v1837_v41, %v4080_v24  ;;  %v1828_v1 = vsel %vm55_vm0, %v1731_v52, %v4075_v48  ;;  %v1827_v3 = vsel %vm55_vm0, %v5060_v51, %v4074_v49 }
 0x4ae   :  { %v4088_v43 = vpop.permute.xlu0 %4087  ;;  %3685 = vmatpush3.bf16.msra.mxu1 %v4311_v36  ;;  %v4083_v46 = vpop.permute.xlu1 %4082 }
 0x4af   :  { %v4090_v44 = vunpack.i.h.bf16 %v4088_v43  ;;  %v4089_v45 = vunpack.i.l.bf16 %v4088_v43  ;;  %3686 = vmatprep.subr.bf16.mxu1 %v4312_v40  ;;  %v4085_v54 = vunpack.i.h.bf16 %v4083_v46  ;;  %v4084_v55 = vunpack.i.l.bf16 %v4083_v46 }
 0x4b1   :  { %v1842_v56 = vsel %vm176_vm2, %v1839_v22, %v4089_v45  ;;  %v1843_v60 = vsel %vm176_vm2, %v1840_v47, %v4090_v44  ;;  %v1830_v12 = vsel %vm172_vm1, %v1827_v3, %v4084_v55  ;;  %v1831_v13 = vsel %vm172_vm1, %v1828_v1, %v4085_v54  ;;  %v3480_v3 = vld [vmem:[%s5621_s2] ss:$0 sm:$0xff] }
 0x4b2   :  { %v4098_v57 = vpop.permute.xlu0 %4097  ;;  %v1846_v39 = vpack.c.bf16 %v1843_v60, %v1842_v56  ;;  %3687 = vmatpush3.bf16.msra.mxu1 %v4313_v10  ;;  %v4093_v58 = vpop.permute.xlu1 %4092 }
 0x4b3   :  { %v4100_v61 = vunpack.i.h.bf16 %v4098_v57  ;;  %v4099_v53 = vunpack.i.l.bf16 %v4098_v57  ;;  %v4095_v4 = vunpack.i.h.bf16 %v4093_v58  ;;  %v4094_v5 = vunpack.i.l.bf16 %v4093_v58  ;;  %3688 = vmatprep.subr.bf16.mxu1 %v4314_v50 }
 0x4b4   :  { %2040 = vmatprep.mubr.bf16.mxu1 %v1846_v39 }
 0x4b5   :  { %v1833_v14 = vsel %vm176_vm2, %v1830_v12, %v4094_v5  ;;  %v1834_v15 = vsel %vm176_vm2, %v1831_v13, %v4095_v4  ;;  %v1829_v17 = vsel %vm55_vm0, %v1732_v7, %v4100_v61  ;;  %v1838_v59 = vsel %vm55_vm0, %v1744_v8, %v4099_v53 }
 0x4b6   :  { %v4108_v16 = vpop.permute.xlu0 %4107  ;;  %v1845_v9 = vpack.c.bf16 %v1834_v15, %v1833_v14  ;;  %3689 = vmatpush3.bf16.msra.mxu1 %v4315_v63  ;;  %v4103_v19 = vpop.permute.xlu1 %4102 }
 0x4b7   :  { %v4109_v20 = vunpack.i.l.bf16 %v4108_v16  ;;  %v4105_v6 = vunpack.i.h.bf16 %v4103_v19  ;;  %v4104_v21 = vunpack.i.l.bf16 %v4103_v19  ;;  %3830 = vmatprep.subr.bf16.mxu1 %v4316_v11  ;;  %v4110_v23 = vunpack.i.h.bf16 %v4108_v16 }
 0x4b9   :  { %v1832_v25 = vsel %vm172_vm1, %v1829_v17, %v4105_v6  ;;  %v1841_v26 = vsel %vm172_vm1, %v1838_v59, %v4104_v21  ;;  %2041 = vmatmul.mubr.bf16.vlgmr.msra.gmra.mxu1 %v1845_v9 }
 0x4ba   :  { %3831 = vmatpush3.bf16.msra.mxu1 %v4316_v11  ;;  %v1844_v27 = vsel %vm176_vm2, %v1841_v26, %v4109_v20  ;;  %v1835_v62 = vsel %vm176_vm2, %v1832_v25, %v4110_v23  ;;  %v3443_v23 = vld [vmem:[%s5629_s10] ss:$0 sm:$0xff] }
 0x4bb   :  { %v1849_v38 = vpack.c.bf16 %v1844_v27, %v1844_v27  ;;  %3832 = vmatprep.subr.bf16.mxu1 %v4317_v0  ;;  %v1848_v29 = vpack.c.bf16 %v1835_v62, %v1835_v62 }
 0x4bd   :  { %2048 = vmatprep.mubr.bf16.mxu1 %v1849_v38 }
 0x4be   :  { %3833 = vmatpush3.bf16.msra.mxu1 %v4317_v0 }
 0x4c1   :  { %2049 = vmatmul.mubr.bf16.gmra.mxu1 %v1848_v29 }
 0x4c2   :  { %3834 = vmatprep.mubr.msk.bf16.mxu1 %vm55_vm0, %v1847_v28 }
 0x4c9   :  { %3835 = vmatmul.mubr.msk.bf16.vlgmr.msra.gmra.mxu1 %vm55_vm0, %v1850_v30 }
 0x4d9   :  { %v5088_v31 = vpop.f32.mrf.mxu0 }
 0x4db   :  { %v3804_v32 = vpop.f32.mrf.mxu0 }
 0x4dd   :  { %v1470_v33 = vpop.f32.mrf.mxu0 }
 0x4df   :  { %v3805_v34 = vpop.f32.mrf.mxu0 }
 0x4e5   :  { %v5090_v35 = vpop.f32.mrf.mxu0 }
 0x4e7   :  { %v3808_v36 = vpop.f32.mrf.mxu0 }
 0x4e9   :  { %v5092_v24 = vpop.f32.mrf.mxu0 }
 0x4eb   :  { %v3809_v37 = vpop.f32.mrf.mxu0 }
 0x4ed   :  { %v5094_v40 = vpop.f32.mrf.mxu0 }
 0x4ef   :  { %v3812_v41 = vpop.f32.mrf.mxu0 }
 0x4f1   :  { %v1486_v42 = vpop.f32.mrf.mxu0 }
 0x4f3   :  { %v3813_v43 = vpop.f32.mrf.mxu0 }
 0x559   :  { %v3646_v44 = vpop.f32.mrf.mxu1 }
 0x55b   :  { %v3647_v45 = vpop.f32.mrf.mxu1 }
 0x55c   :  { %v3648_v20 = vadd.f32 %v3647_v45, %v3646_v44 }
 0x55d   :  { %v3649_v46 = vpop.f32.mrf.mxu1 }
 0x55e   :  { %v1412_v38 = vadd.f32 %v3648_v20, %v3443_v23 }
 0x55f   :  { %v3650_v10 = vpop.f32.mrf.mxu1 }
 0x560   :  { %v3651_v17 = vadd.f32 %v3650_v10, %v3649_v46  ;;  %v5124_v30 = vadd.f32 %v5088_v31, %v1412_v38 }
 0x562   :  { %v1415_v25 = vadd.f32 %v3651_v17, %v3443_v23  ;;  %v1489_v43 = vsel %vm55_vm0, %v5124_v30, 0.0  ;;  %v1509_v31 = vmul.f32 %v5124_v30, %v5124_v30 }
 0x564   :  { %v5120_v28 = vadd.f32 %v1470_v33, %v1415_v25 }
 0x565   :  { %v3652_v22 = vpop.f32.mrf.mxu1 }
 0x566   :  { %v1492_v41 = vsel %vm55_vm0, %v5120_v28, 0.0  ;;  %v1510_v33 = vmul.f32 %v5120_v28, %v5120_v28 }
 0x567   :  { %v3653_v47 = vpop.f32.mrf.mxu1 }
 0x568   :  { %v3654_v32 = vadd.f32 %v3653_v47, %v3652_v22  ;;  %v1517_v46 = vsel %vm55_vm0, %v1510_v33, 0.0  ;;  %v1514_v22 = vsel %vm55_vm0, %v1509_v31, 0.0 }
 0x569   :  { %v3655_v48 = vpop.f32.mrf.mxu1 }
 0x56a   :  { %v1420_v42 = vadd.f32 %v3654_v32, %v3443_v23 }
 0x56b   :  { %v3656_v49 = vpop.f32.mrf.mxu1 }
 0x56c   :  { %v3657_v29 = vadd.f32 %v3656_v49, %v3655_v48  ;;  %v5141_v10 = vadd.f32 %v5090_v35, %v1420_v42 }
 0x56d   :  { %v3658_v50 = vpop.f32.mrf.mxu1 }
 0x56e   :  { %v1423_v36 = vadd.f32 %v3657_v29, %v3443_v23  ;;  %v1495_v49 = vsel %vm55_vm0, %v5141_v10, 0.0  ;;  %v1511_v35 = vmul.f32 %v5141_v10, %v5141_v10 }
 0x56f   :  { %v3659_v52 = vpop.f32.mrf.mxu1 }
 0x570   :  { %v3660_v37 = vadd.f32 %v3659_v52, %v3658_v50  ;;  %v5137_v44 = vadd.f32 %v5092_v24, %v1423_v36  ;;  %v1520_v52 = vsel %vm55_vm0, %v1511_v35, 0.0 }
 0x571   :  { %v3661_v54 = vpop.f32.mrf.mxu1 }
 0x572   :  { %v1428_v45 = vadd.f32 %v3660_v37, %v3443_v23  ;;  %v1498_v48 = vsel %vm55_vm0, %v5137_v44, 0.0  ;;  %v1512_v24 = vmul.f32 %v5137_v44, %v5137_v44 }
 0x573   :  { %v3662_v55 = vpop.f32.mrf.mxu1 }
 0x574   :  { %v5145_v47 = vadd.f32 %v5094_v40, %v1428_v45  ;;  %v1523_v50 = vsel %vm55_vm0, %v1512_v24, 0.0  ;;  %v3501_v24 = vld [vmem:[%s5622_s3] ss:$0 sm:$0xff] }
 0x576   :  { %v1513_v40 = vmul.f32 %v5145_v47, %v5145_v47  ;;  %v1501_v55 = vsel %vm55_vm0, %v5145_v47, 0.0 }
 0x578   :  { %v1526_v54 = vsel %vm55_vm0, %v1513_v40, 0.0 }
 0x579   :  { %v3690_v56 = vpop.f32.mrf.mxu1 }
 0x57b   :  { %v3691_v60 = vpop.f32.mrf.mxu1 }
 0x57c   :  { %v3692_v63 = vadd.f32 %v3691_v60, %v3690_v56  ;;  %v4318_v56 = vld [vmem:[%s5632_s13 + $0x8] sm:$0xff]  }
 0x57d   :  { %v3693_v57 = vpop.f32.mrf.mxu1  ;;  %v4319_v60 = vld [vmem:[%s5624_s5 + $0x88] sm:$0xff]   ;;  %3815 = vmatpush3.bf16.msra.mxu0 %v4318_v56 }
 0x57e   :  { %v2043_v8 = vadd.f32 %v3692_v63, %v3480_v3  ;;  %3838 = vmatprep.subr.bf16.mxu1 %v4319_v60  ;;  %3816 = vmatprep.subr.bf16.mxu0 %v4468_v2 }
 0x57f   :  { %v3694_v39 = vpop.f32.mrf.mxu1  ;;  %3839 = vmatpush3.bf16.msra.mxu1 %v4319_v60 }
 0x580   :  { %v3695_v5 = vadd.f32 %v3694_v39, %v3693_v57  ;;  %v4320_v57 = vld [vmem:[%s5632_s13] sm:$0xff]  }
 0x581   :  { %v3696_v58 = vpop.f32.mrf.mxu1  ;;  %v4321_v39 = vld [vmem:[%s5624_s5 + $0x80] sm:$0xff]   ;;  %3817 = vmatpush3.bf16.msra.mxu0 %v4320_v57 }
 0x582   :  { %v2046_v15 = vadd.f32 %v3695_v5, %v3480_v3  ;;  %3840 = vmatprep.subr.bf16.mxu1 %v4321_v39 }
 0x583   :  { %v3697_v61 = vpop.f32.mrf.mxu1  ;;  %3841 = vmatpush3.bf16.msra.mxu1 %v4321_v39 }
 0x584   :  { %v3698_v7 = vadd.f32 %v3697_v61, %v3696_v58  ;;  %v4322_v58 = vld [vmem:[%s5624_s5 + $0x78] sm:$0xff]  }
 0x585   :  { %v3699_v53 = vpop.f32.mrf.mxu1  ;;  %3706 = vmatprep.subr.bf16.mxu0 %v4322_v58 }
 0x586   :  { %v2051_v14 = vadd.f32 %v3698_v7, %v3480_v3 }
 0x587   :  { %v3700_v1 = vpop.f32.mrf.mxu1 }
 0x589   :  { %v3836_v4 = vpop.f32.mrf.mxu1 }
 0x58a   :  { %v5103_v59 = vadd.f32 %v3836_v4, %v2051_v14 }
 0x58b   :  { %v2090_v11 = vpop.f32.mrf.mxu1 }
 0x58c   :  { %v5099_v12 = vadd.f32 %v2090_v11, %v2043_v8  ;;  %v2118_v27 = vmul.f32 %v5103_v59, %v5103_v59  ;;  %v2110_v34 = vsel %vm55_vm0, %v5103_v59, 0.0 }
 0x58d   :  { %v3837_v13 = vpop.f32.mrf.mxu1 }
 0x58e   :  { %v2104_v16 = vsel %vm55_vm0, %v5099_v12, 0.0  ;;  %v2116_v0 = vmul.f32 %v5099_v12, %v5099_v12  ;;  %v2125_v18 = vsel %vm55_vm0, %v2118_v27, 0.0 }
 0x58f   :  { %v2093_v9 = vpop.f32.mrf.mxu1  ;;  %2105 = vadd.xlane.f32.xlu1 %v2104_v16 }
 0x590   :  { %v5105_v19 = vadd.f32 %v2093_v9, %v2046_v15  ;;  %v2119_v62 = vsel %vm55_vm0, %v2116_v0, 0.0 }
 0x592   :  { %v2107_v6 = vsel %vm55_vm0, %v5105_v19, 0.0  ;;  %v2117_v21 = vmul.f32 %v5105_v19, %v5105_v19 }
 0x593   :  { %2108 = vadd.xlane.f32.xlu0 %v2107_v6 }
 0x594   :  { %v2122_v26 = vsel %vm55_vm0, %v2117_v21, 0.0 }
 0x595   :  { %2123 = vadd.xlane.f32.xlu1 %v2122_v26 }
 0x597   :  { %2120 = vadd.xlane.f32.xlu0 %v2119_v62 }
 0x599   :  { %2126 = vadd.xlane.f32.xlu1 %v2125_v18 }
 0x59b   :  { %2111 = vadd.xlane.f32.xlu0 %v2110_v34 }
 0x59d   :  { %1493 = vadd.xlane.f32.xlu1 %v1492_v41 }
 0x59f   :  { %1490 = vadd.xlane.f32.xlu0 %v1489_v43 }
 0x5a1   :  { %1518 = vadd.xlane.f32.xlu1 %v1517_v46 }
 0x5a3   :  { %1515 = vadd.xlane.f32.xlu0 %v1514_v22 }
 0x5a5   :  { %1499 = vadd.xlane.f32.xlu1 %v1498_v48 }
 0x5a7   :  { %1496 = vadd.xlane.f32.xlu0 %v1495_v49 }
 0x5a9   :  { %1524 = vadd.xlane.f32.xlu1 %v1523_v50 }
 0x5ab   :  { %1521 = vadd.xlane.f32.xlu0 %v1520_v52 }
 0x5ad   :  { %1527 = vadd.xlane.f32.xlu1 %v1526_v54 }
 0x5af   :  { %1502 = vadd.xlane.f32.xlu0 %v1501_v55 }
 0x618   :  { %v2106_v61 = vpop.xlane.xlu1 %2105 }
 0x619   :  { %v2113_v63 = vmul.f32 0.03125, %v2106_v61 }
 0x61b   :  { %v2131_v8 = vmul.f32 %v2113_v63, %v2113_v63  ;;  %v2137_v48 = vsub.f32 %v5099_v12, %v2113_v63 }
 0x61c   :  { %v2109_v53 = vpop.xlane.xlu0 %2108 }
 0x61d   :  { %v2114_v1 = vmul.f32 0.03125, %v2109_v53 }
 0x61e   :  { %v2124_v3 = vpop.xlane.xlu1 %2123 }
 0x61f   :  { %v2132_v4 = vmul.f32 %v2114_v1, %v2114_v1  ;;  %v2129_v5 = vmul.f32 0.03125, %v2124_v3  ;;  %v2138_v45 = vsub.f32 %v5105_v19, %v2114_v1  ;;  %v3502_v19 = vld [vmem:[%s5623_s4] ss:$0 sm:$0xff] }
 0x620   :  { %v2121_v7 = vpop.xlane.xlu0 %2120 }
 0x621   :  { %v2135_v11 = vsub.f32 %v2129_v5, %v2132_v4  ;;  %v2128_v13 = vmul.f32 0.03125, %v2121_v7 }
 0x622   :  { %v2127_v14 = vpop.xlane.xlu1 %2126 }
 0x623   :  { %v2141_v15 = vadd.f32 1e-05, %v2135_v11  ;;  %v2134_v16 = vsub.f32 %v2128_v13, %v2131_v8  ;;  %v2130_v21 = vmul.f32 0.03125, %v2127_v14 }
 0x624   :  { %v2112_v9 = vpop.xlane.xlu0 %2111 }
 0x625   :  { %4372 = vrsqrt.f32 %v2141_v15  ;;  %v2140_v17 = vadd.f32 1e-05, %v2134_v16  ;;  %v2115_v20 = vmul.f32 0.03125, %v2112_v9 }
 0x626   :  { %v1494_v6 = vpop.xlane.xlu1 %1493 }
 0x627   :  { %4374 = vrsqrt.f32 %v2140_v17  ;;  %v2133_v0 = vmul.f32 %v2115_v20, %v2115_v20  ;;  %v5178_v23 = vmul.f32 0.03125, %v1494_v6  ;;  %v2139_v1 = vsub.f32 %v5103_v59, %v2115_v20  ;;  %v5214_v20 = vld [vmem:[%s5630_s11] ss:$0 sm:$0xff] }
 0x628   :  { %v1491_v25 = vpop.xlane.xlu0 %1490 }
 0x629   :  { %v2136_v26 = vsub.f32 %v2130_v21, %v2133_v0  ;;  %v5180_v27 = vmul.f32 0.03125, %v1491_v25  ;;  %v1535_v29 = vmul.f32 %v5178_v23, %v5178_v23  ;;  %v1545_v59 = vsub.f32 %v5120_v28, %v5178_v23  ;;  %v5225_v23 = vld [vmem:[%s5631_s12] ss:$0 sm:$0xff] }
 0x62a   :  { %v1519_v38 = vpop.xlane.xlu1 %1518 }
 0x62b   :  { %v2142_v62 = vadd.f32 1e-05, %v2136_v26  ;;  %v1530_v18 = vmul.f32 0.03125, %v1519_v38  ;;  %v1534_v34 = vmul.f32 %v5180_v27, %v5180_v27  ;;  %v1544_v21 = vsub.f32 %v5124_v30, %v5180_v27 }
 0x62c   :  { %v1516_v32 = vpop.xlane.xlu0 %1515 }
 0x62d   :  { %4376 = vrsqrt.f32 %v2142_v62  ;;  %v1540_v36 = vsub.f32 %v1530_v18, %v1535_v29  ;;  %v1529_v37 = vmul.f32 0.03125, %v1516_v32 }
 0x62e   :  { %v1500_v41 = vpop.xlane.xlu1 %1499 }
 0x62f   :  { %v1550_v33 = vadd.f32 1e-05, %v1540_v36  ;;  %v1539_v42 = vsub.f32 %v1529_v37, %v1534_v34  ;;  %v5186_v43 = vmul.f32 0.03125, %v1500_v41 }
 0x630   :  { %v1497_v31 = vpop.xlane.xlu0 %1496 }
 0x631   :  { %4378 = vrsqrt.f32 %v1550_v33  ;;  %v1549_v46 = vadd.f32 1e-05, %v1539_v42  ;;  %v5193_v49 = vmul.f32 0.03125, %v1497_v31  ;;  %v1537_v40 = vmul.f32 %v5186_v43, %v5186_v43 }
 0x632   :  { %v4373_v22 = vpop.eup %4372  ;;  %v1525_v35 = vpop.xlane.xlu1 %1524  ;;  %v1547_v31 = vsub.f32 %v5137_v44, %v5186_v43  ;;  %v4323_v43 = vld [vmem:[%s5624_s5 + $0x38] sm:$0xff]  }
 0x633   :  { %v2147_v50 = vmul.f32 %v4373_v22, %v2138_v45  ;;  %4380 = vrsqrt.f32 %v1549_v46  ;;  %v1532_v52 = vmul.f32 0.03125, %v1525_v35  ;;  %v1536_v12 = vmul.f32 %v5193_v49, %v5193_v49  ;;  %v2204_v35 = vld [vmem:[#allocation2 + $0x50] sm:$0xff] }
 0x634   :  { %v4375_v54 = vpop.eup %4374  ;;  %v1522_v55 = vpop.xlane.xlu0 %1521 }
 0x635   :  { %v2146_v56 = vmul.f32 %v4375_v54, %v2137_v48  ;;  %v2157_v60 = vmul.f32 %v3501_v24, %v2147_v50  ;;  %v1542_v57 = vsub.f32 %v1532_v52, %v1537_v40  ;;  %v1531_v39 = vmul.f32 0.03125, %v1522_v55  ;;  %v4324_v54 = vld [vmem:[%s5624_s5 + $0x70] sm:$0xff]  }
 0x636   :  { %v1528_v3 = vpop.xlane.xlu1 %1527  ;;  %v1546_v50 = vsub.f32 %v5141_v10, %v5193_v49 }
 0x637   :  { %v2156_v58 = vmul.f32 %v3501_v24, %v2146_v56  ;;  %v2167_v61 = vadd.f32 %v3502_v19, %v2157_v60  ;;  %v1552_v53 = vadd.f32 1e-05, %v1542_v57  ;;  %v1541_v63 = vsub.f32 %v1531_v39, %v1536_v12 }
 0x638   :  { %v1503_v4 = vpop.xlane.xlu0 %1502  ;;  %v1533_v14 = vmul.f32 0.03125, %v1528_v3 }
 0x639   :  { %v2166_v5 = vadd.f32 %v3502_v19, %v2156_v58  ;;  %2170 = vst.msk [vmem:[#allocation2 + $0x40] sm:$0xff] %vm55_vm0, %v2167_v61  ;;  %4382 = vrsqrt.f32 %v1552_v53  ;;  %v1551_v7 = vadd.f32 1e-05, %v1541_v63  ;;  %v5204_v8 = vmul.f32 0.03125, %v1503_v4  ;;  %v4325_v63 = vld [vmem:[%s5624_s5 + $0x30] sm:$0xff]  }
 0x63a   :  { %v4377_v11 = vpop.eup %4376 }
 0x63b   :  { %v2148_v13 = vmul.f32 %v4377_v11, %v2139_v1  ;;  %2169 = vst.msk [vmem:[#allocation2 + $0x38] sm:$0xff] %vm55_vm0, %v2166_v5  ;;  %4384 = vrsqrt.f32 %v1551_v7  ;;  %v1538_v15 = vmul.f32 %v5204_v8, %v5204_v8  ;;  %v4326_v5 = vld [vmem:[%s5624_s5 + $0x68] sm:$0xff]   ;;  %v1548_v7 = vsub.f32 %v5145_v47, %v5204_v8 }
 0x63d   :  { %v2158_v16 = vmul.f32 %v3501_v24, %v2148_v13  ;;  %v1543_v9 = vsub.f32 %v1533_v14, %v1538_v15 }
 0x63e   :  { %v4379_v17 = vpop.eup %4378 }
 0x63f   :  { %v2168_v6 = vadd.f32 %v3502_v19, %v2158_v16  ;;  %v1560_v0 = vmul.f32 %v4379_v17, %v1545_v59  ;;  %v1553_v25 = vadd.f32 1e-05, %v1543_v9 }
 0x640   :  { %v4381_v26 = vpop.eup %4380  ;;  %v5220_v28 = vld [vmem:[#allocation2 + $0x40] sm:$0xff] }
 0x641   :  { %2171 = vst.msk [vmem:[#allocation2 + $0x48] sm:$0xff] %vm55_vm0, %v2168_v6  ;;  %v1559_v38 = vmul.f32 %v4381_v26, %v1544_v21  ;;  %v1572_v62 = vmul.f32 %v5214_v20, %v1560_v0  ;;  %4386 = vrsqrt.f32 %v1553_v25  ;;  %v4327_v6 = vld [vmem:[%s5624_s5 + $0x28] sm:$0xff]   ;;  %v4328_v0 = vld [vmem:[%s5624_s5 + $0x60] sm:$0xff]  }
 0x642   :  { %v5227_v29 = vld [vmem:[#allocation2 + $0x38] sm:$0xff] }
 0x643   :  { %v2176_v18 = vld [vmem:[#allocation2 + $0x31] sm:$0xff]  ;;  %v2177_v30 = vld [vmem:[#allocation2 + $0x39] sm:$0xff]  ;;  %v1571_v27 = vmul.f32 %v5214_v20, %v1559_v38  ;;  %v2327_v32 = vpack.c.bf16 %v5220_v28, %v5227_v29  ;;  %v1584_v48 = vadd.f32 %v5225_v23, %v1572_v62 }
 0x644   :  { %v4116_v34 = vpack.i.bf16 %v2177_v30, %v2176_v18  ;;  %v2192_v36 = vld [vmem:[#allocation2 + $0x35] sm:$0xff]  ;;  %v2193_v37 = vld [vmem:[#allocation2 + $0x3d] sm:$0xff] }
 0x645   :  { %v4111_v41 = vpack.i.bf16 %v2193_v37, %v2192_v36  ;;  %v2196_v33 = vld [vmem:[#allocation2 + $0x36] sm:$0xff]  ;;  %v2197_v42 = vld [vmem:[#allocation2 + $0x3e] sm:$0xff]  ;;  %3842 = vmatprep.mubr.msk.bf16.mxu1 %vm55_vm0, %v2327_v32  ;;  %v1583_v22 = vadd.f32 %v5225_v23, %v1571_v27 }
 0x646   :  { %4117 = vrot.lane.b32.xlu1 %v4116_v34, %s4470_s29  ;;  %v2180_v45 = vld [vmem:[#allocation2 + $0x32] sm:$0xff]  ;;  %v2181_v46 = vld [vmem:[#allocation2 + $0x3a] sm:$0xff]  ;;  %v4383_v24 = vpop.eup %4382  ;;  %v4121_v40 = vpack.i.bf16 %v2197_v42, %v2196_v33 }
 0x647   :  { %4112 = vrot.lane.b32.xlu0 %v4111_v41, %s4470_s29  ;;  %v1588_v52 = vpack.c.bf16 %v1584_v48, %v1583_v22  ;;  %v1562_v44 = vmul.f32 %v4383_v24, %v1547_v31  ;;  %v4126_v12 = vpack.i.bf16 %v2181_v46, %v2180_v45  ;;  %v2200_v56 = vld [vmem:[#allocation2 + $0x37] sm:$0xff]  ;;  %v2201_v60 = vld [vmem:[#allocation2 + $0x3f] sm:$0xff]  ;;  %v4334_v46 = vld [vmem:[%s5624_s5 + $0x48] sm:$0xff]  }
 0x648   :  { %v4385_v19 = vpop.eup %4384  ;;  %v5247_v55 = vld [vmem:[#allocation2 + $0x48] sm:$0xff]  ;;  %v2184_v49 = vld [vmem:[#allocation2 + $0x33] sm:$0xff]  ;;  %v2185_v57 = vld [vmem:[#allocation2 + $0x3b] sm:$0xff]  ;;  %v4131_v61 = vpack.i.bf16 %v2201_v60, %v2200_v56 }
 0x649   :  { %3819 = vmatmul.mubr.msk.bf16.vlgmr.msra.gmra.mxu0 %vm55_vm0, %v1588_v52  ;;  %v2330_v10 = vpack.c.bf16 %v2204_v35, %v5247_v55  ;;  %v1561_v39 = vmul.f32 %v4385_v19, %v1546_v50  ;;  %v1574_v58 = vmul.f32 %v5214_v20, %v1562_v44  ;;  %v4136_v1 = vpack.i.bf16 %v2185_v57, %v2184_v49  ;;  %v2194_v3 = vld [vmem:[#allocation2 + $0x45] sm:$0xff]  ;;  %v2195_v4 = vld [vmem:[#allocation2 + $0x4d] sm:$0xff]  ;;  %v4330_v34 = vld [vmem:[%s5624_s5 + $0x58] sm:$0xff]  }
 0x64a   :  { %4122 = vrot.lane.b32.xlu1 %v4121_v40, %s4469_s26  ;;  %3822 = vmatprep.mubr.msk.bf16.mxu0 %vm4472_vm3, %v4468_v2  ;;  %v2178_v11 = vld [vmem:[#allocation2 + $0x41] sm:$0xff]  ;;  %v2179_v13 = vld [vmem:[#allocation2 + $0x49] sm:$0xff]  ;;  %v4141_v9 = vpack.i.bf16 %v2195_v4, %v2194_v3  ;;  %v4331_v33 = vld [vmem:[%s5624_s5 + $0x18] sm:$0xff]  }
 0x64b   :  { %4127 = vrot.lane.b32.xlu0 %v4126_v12, %s4469_s26  ;;  %3843 = vmatmul.mubr.msk.bf16.vlgmr.msra.gmra.mxu1 %vm55_vm0, %v2330_v10  ;;  %v1573_v53 = vmul.f32 %v5214_v20, %v1561_v39  ;;  %v1586_v15 = vadd.f32 %v5225_v23, %v1574_v58  ;;  %v4146_v47 = vpack.i.bf16 %v2179_v13, %v2178_v11  ;;  %v2198_v8 = vld [vmem:[#allocation2 + $0x46] sm:$0xff]  ;;  %v2199_v21 = vld [vmem:[#allocation2 + $0x4e] sm:$0xff]  ;;  %v2189_v58 = vld [vmem:[#allocation2 + $0x3c] sm:$0xff] }
 0x64c   :  { %3707 = vmatpush3.bf16.msra.mxu0 %v4323_v43  ;;  %v2182_v26 = vld [vmem:[#allocation2 + $0x42] sm:$0xff]  ;;  %v2183_v38 = vld [vmem:[#allocation2 + $0x4a] sm:$0xff]  ;;  %v4151_v62 = vpack.i.bf16 %v2199_v21, %v2198_v8  ;;  %v2188_v39 = vld [vmem:[#allocation2 + $0x34] sm:$0xff] }
 0x64d   :  { %3708 = vmatprep.subr.bf16.mxu0 %v4324_v54  ;;  %v1585_v14 = vadd.f32 %v5225_v23, %v1573_v53  ;;  %v4329_v30 = vld [vmem:[%s5624_s5 + $0x20] sm:$0xff]   ;;  %v2203_v32 = vld [vmem:[#allocation2 + $0x4f] sm:$0xff] }
 0x64e   :  { %4132 = vrot.lane.b32.xlu1 %v4131_v61, %s4471_s24  ;;  %v4387_v16 = vpop.eup %4386  ;;  %v2202_v27 = vld [vmem:[#allocation2 + $0x47] sm:$0xff]  ;;  %v4332_v31 = vld [vmem:[%s5624_s5 + $0x50] sm:$0xff]  }
 0x64f   :  { %4137 = vrot.lane.b32.xlu0 %v4136_v1, %s4471_s24  ;;  %v1563_v59 = vmul.f32 %v4387_v16, %v1548_v7  ;;  %v1589_v17 = vpack.c.bf16 %v1586_v15, %v1585_v14  ;;  %v2186_v36 = vld [vmem:[#allocation2 + $0x43] sm:$0xff]  ;;  %v2187_v37 = vld [vmem:[#allocation2 + $0x4b] sm:$0xff] }
 0x650   :  { %3709 = vmatpush3.bf16.msra.mxu0 %v4325_v63  ;;  %v4166_v42 = vpack.i.bf16 %v2187_v37, %v2186_v36  ;;  %v4333_v45 = vld [vmem:[%s5624_s5 + $0x10] sm:$0xff]   ;;  %v4335_v22 = vld [vmem:[%s5624_s5 + $0x8] sm:$0xff]   ;;  %v4336_v48 = vld [vmem:[%s5624_s5 + $0x40] sm:$0xff]  }
 0x651   :  { %3710 = vmatprep.subr.bf16.mxu0 %v4326_v5  ;;  %v1575_v25 = vmul.f32 %v5214_v20, %v1563_v59  ;;  %3823 = vmatmul.mubr.msk.bf16.gmra.mxu0 %vm55_vm0, %v1589_v17  ;;  %v4156_v20 = vpack.i.bf16 %v2183_v38, %v2182_v26  ;;  %v4337_v24 = vld [vmem:[%s5624_s5] sm:$0xff]  }
 0x652   :  { %4142 = vrot.lane.b32.xlu1 %v4141_v9, %s4470_s29  ;;  %3826 = vmatprep.mubr.msk.bf16.mxu0 %vm4472_vm3, %v4468_v2 }
 0x653   :  { %4147 = vrot.lane.b32.xlu0 %v4146_v47, %s4470_s29  ;;  %v1587_v18 = vadd.f32 %v5225_v23, %v1575_v25  ;;  %v4161_v23 = vpack.i.bf16 %v2203_v32, %v2202_v27 }
 0x654   :  { %3711 = vmatpush3.bf16.msra.mxu0 %v4327_v6 }
 0x655   :  { %3712 = vmatprep.subr.bf16.mxu0 %v4328_v0  ;;  %v1590_v41 = vpack.c.bf16 %v1587_v18, %v1587_v18 }
 0x656   :  { %4152 = vrot.lane.b32.xlu1 %v4151_v62, %s4469_s26 }
 0x657   :  { %4157 = vrot.lane.b32.xlu0 %v4156_v20, %s4469_s26  ;;  %v2191_v20 = vld [vmem:[#allocation2 + $0x4c] sm:$0xff] }
 0x658   :  { %3713 = vmatpush3.bf16.msra.mxu0 %v4329_v30  ;;  %v2190_v30 = vld [vmem:[#allocation2 + $0x44] sm:$0xff] }
 0x659   :  { %3714 = vmatprep.subr.bf16.mxu0 %v4330_v34  ;;  %3827 = vmatmul.mubr.msk.bf16.gmra.mxu0 %vm55_vm0, %v1590_v41 }
 0x65a   :  { %4162 = vrot.lane.b32.xlu1 %v4161_v23, %s4471_s24 }
 0x65b   :  { %4167 = vrot.lane.b32.xlu0 %v4166_v42, %s4471_s24 }
 0x65c   :  { %3715 = vmatpush3.bf16.msra.mxu0 %v4331_v33 }
 0x65d   :  { %3716 = vmatprep.subr.bf16.mxu0 %v4332_v31 }
 0x660   :  { %3717 = vmatpush3.bf16.msra.mxu0 %v4333_v45 }
 0x661   :  { %3718 = vmatprep.subr.bf16.mxu0 %v4334_v46 }
 0x664   :  { %3719 = vmatpush3.bf16.msra.mxu0 %v4335_v22 }
 0x665   :  { %3720 = vmatprep.subr.bf16.mxu0 %v4336_v48 }
 0x668   :  { %3721 = vmatpush3.bf16.msra.mxu0 %v4337_v24 }
 0x669   :  { %3846 = vmatprep.subr.bf16.mxu0 %v4468_v2 }
 0x6b8   :  { %v4118_v35 = vpop.permute.xlu1 %4117 }
 0x6b9   :  { %v4113_v50 = vpop.permute.xlu0 %4112  ;;  %v4120_v40 = vunpack.i.h.bf16 %v4118_v35  ;;  %v4119_v52 = vunpack.i.l.bf16 %v4118_v35 }
 0x6ba   :  { %v4115_v43 = vunpack.i.h.bf16 %v4113_v50  ;;  %v4114_v54 = vunpack.i.l.bf16 %v4113_v50 }
 0x6bb   :  { %v2302_v49 = vsel %vm55_vm0, %v5227_v29, %v4120_v40  ;;  %v2301_v57 = vsel %vm55_vm0, %v5060_v51, %v4119_v52 }
 0x6bc   :  { %v4123_v44 = vpop.permute.xlu1 %4122  ;;  %v2314_v53 = vsel %vm55_vm0, %v2189_v58, %v4115_v43  ;;  %v2313_v63 = vsel %vm55_vm0, %v2188_v39, %v4114_v54  ;;  %v3467_v43 = vld [vmem:[%s5633_s14] ss:$0 sm:$0xff] }
 0x6bd   :  { %v4128_v19 = vpop.permute.xlu0 %4127  ;;  %v4125_v12 = vunpack.i.h.bf16 %v4123_v44  ;;  %v4124_v56 = vunpack.i.l.bf16 %v4123_v44 }
 0x6be   :  { %v4130_v60 = vunpack.i.h.bf16 %v4128_v19  ;;  %v4129_v10 = vunpack.i.l.bf16 %v4128_v19  ;;  %v1679_v19 = vld [vmem:[%s5634_s15] sm:$0xff] }
 0x6bf   :  { %v2317_v5 = vsel %vm172_vm1, %v2313_v63, %v4124_v56  ;;  %v2318_v7 = vsel %vm172_vm1, %v2314_v53, %v4125_v12  ;;  %v1681_v63 = vld [vmem:[%s5634_s15 + $0x10] sm:$0xff] }
 0x6c0   :  { %v4133_v61 = vpop.permute.xlu1 %4132  ;;  %v2306_v29 = vsel %vm172_vm1, %v2302_v49, %v4130_v60  ;;  %v2305_v51 = vsel %vm172_vm1, %v2301_v57, %v4129_v10  ;;  %v1680_v49 = vld [vmem:[%s5634_s15 + $0x8] sm:$0xff] }
 0x6c1   :  { %v4135_v1 = vunpack.i.h.bf16 %v4133_v61  ;;  %v4134_v3 = vunpack.i.l.bf16 %v4133_v61  ;;  %v4138_v4 = vpop.permute.xlu0 %4137 }
 0x6c2   :  { %v4140_v11 = vunpack.i.h.bf16 %v4138_v4  ;;  %v4139_v13 = vunpack.i.l.bf16 %v4138_v4 }
 0x6c3   :  { %v2321_v14 = vsel %vm176_vm2, %v2317_v5, %v4134_v3  ;;  %v2322_v15 = vsel %vm176_vm2, %v2318_v7, %v4135_v1 }
 0x6c4   :  { %v2309_v16 = vsel %vm176_vm2, %v2305_v51, %v4139_v13  ;;  %v2310_v59 = vsel %vm176_vm2, %v2306_v29, %v4140_v11  ;;  %v4143_v9 = vpop.permute.xlu1 %4142  ;;  %v2326_v17 = vpack.c.bf16 %v2322_v15, %v2321_v14  ;;  %v1682_v11 = vld [vmem:[%s5634_s15 + $0x18] sm:$0xff] }
 0x6c5   :  { %v2325_v6 = vpack.c.bf16 %v2310_v59, %v2309_v16  ;;  %v4148_v47 = vpop.permute.xlu0 %4147  ;;  %v4145_v8 = vunpack.i.h.bf16 %v4143_v9  ;;  %v4144_v21 = vunpack.i.l.bf16 %v4143_v9  ;;  %v1683_v16 = vld [vmem:[%s5634_s15 + $0x20] sm:$0xff] }
 0x6c6   :  { %2520 = vmatprep.mubr.bf16.mxu0 %v2326_v17  ;;  %v4150_v25 = vunpack.i.h.bf16 %v4148_v47  ;;  %v4149_v26 = vunpack.i.l.bf16 %v4148_v47 }
 0x6c7   :  { %2521 = vmatmul.mubr.bf16.vlgmr.msra.gmra.mxu0 %v2325_v6  ;;  %v2316_v34 = vsel %vm55_vm0, %v2191_v20, %v4145_v8  ;;  %v2315_v36 = vsel %vm55_vm0, %v2190_v30, %v4144_v21 }
 0x6c8   :  { %v4153_v0 = vpop.permute.xlu1 %4152  ;;  %v2304_v23 = vsel %vm55_vm0, %v5247_v55, %v4150_v25  ;;  %v2303_v41 = vsel %vm55_vm0, %v5220_v28, %v4149_v26 }
 0x6c9   :  { %v4158_v38 = vpop.permute.xlu0 %4157  ;;  %v4155_v62 = vunpack.i.h.bf16 %v4153_v0  ;;  %v4154_v18 = vunpack.i.l.bf16 %v4153_v0 }
 0x6ca   :  { %v4160_v27 = vunpack.i.h.bf16 %v4158_v38  ;;  %v4159_v32 = vunpack.i.l.bf16 %v4158_v38 }
 0x6cb   :  { %v2319_v45 = vsel %vm172_vm1, %v2315_v36, %v4154_v18  ;;  %v2320_v46 = vsel %vm172_vm1, %v2316_v34, %v4155_v62 }
 0x6cc   :  { %v4163_v37 = vpop.permute.xlu1 %4162  ;;  %v2307_v24 = vsel %vm172_vm1, %v2303_v41, %v4159_v32  ;;  %v2308_v35 = vsel %vm172_vm1, %v2304_v23, %v4160_v27 }
 0x6cd   :  { %v4165_v33 = vunpack.i.h.bf16 %v4163_v37  ;;  %v4164_v42 = vunpack.i.l.bf16 %v4163_v37  ;;  %v4168_v31 = vpop.permute.xlu0 %4167 }
 0x6ce   :  { %v4170_v22 = vunpack.i.h.bf16 %v4168_v31  ;;  %v4169_v48 = vunpack.i.l.bf16 %v4168_v31 }
 0x6cf   :  { %v2323_v50 = vsel %vm176_vm2, %v2319_v45, %v4164_v42  ;;  %v2324_v55 = vsel %vm176_vm2, %v2320_v46, %v4165_v33  ;;  %v3503_v45 = vld [vmem:[%s5625_s6] ss:$0 sm:$0xff] }
 0x6d0   :  { %v2329_v40 = vpack.c.bf16 %v2324_v55, %v2323_v50  ;;  %v2311_v28 = vsel %vm176_vm2, %v2307_v24, %v4169_v48  ;;  %v2312_v52 = vsel %vm176_vm2, %v2308_v35, %v4170_v22 }
 0x6d1   :  { %v2328_v44 = vpack.c.bf16 %v2312_v52, %v2311_v28 }
 0x6d2   :  { %2528 = vmatprep.mubr.bf16.mxu0 %v2329_v40 }
 0x6d3   :  { %2529 = vmatmul.mubr.bf16.gmra.mxu0 %v2328_v44 }
 0x6d4   :  { %3850 = vmatprep.mubr.msk.bf16.mxu0 %vm4472_vm3, %v4468_v2 }
 0x709   :  { %v1657_v54 = vpop.f32.mrf.mxu0 }
 0x70a   :  { %v1658_v12 = vadd.f32 %v3467_v43, %v1657_v54 }
 0x70b   :  { %v3820_v56 = vpop.f32.mrf.mxu0  ;;  %v3844_v33 = vpop.f32.mrf.mxu1 }
 0x70c   :  { %v1684_v60 = vadd.f32 %v1679_v19, %v1658_v12 }
 0x70d   :  { %v1660_v10 = vpop.f32.mrf.mxu0  ;;  %v2571_v31 = vpop.f32.mrf.mxu1 }
 0x70e   :  { %v3473_v57 = vmul.f32 -1.442695, %v1684_v60  ;;  %v1661_v39 = vadd.f32 %v3467_v43, %v1660_v10 }
 0x70f   :  { %v3821_v58 = vpop.f32.mrf.mxu0  ;;  %v3845_v35 = vpop.f32.mrf.mxu1 }
 0x710   :  { %4388 = vpow2.f32 %v3473_v57  ;;  %v1685_v61 = vadd.f32 %v1680_v49, %v1661_v39 }
 0x711   :  { %v1665_v53 = vpop.f32.mrf.mxu0  ;;  %v2574_v44 = vpop.f32.mrf.mxu1 }
 0x712   :  { %v3474_v1 = vmul.f32 -1.442695, %v1685_v61  ;;  %v1666_v3 = vadd.f32 %v3467_v43, %v1665_v53 }
 0x713   :  { %v3824_v4 = vpop.f32.mrf.mxu0 }
 0x714   :  { %4390 = vpow2.f32 %v3474_v1  ;;  %v1686_v5 = vadd.f32 %v1681_v63, %v1666_v3 }
 0x715   :  { %v1668_v7 = vpop.f32.mrf.mxu0 }
 0x716   :  { %v3475_v13 = vmul.f32 -1.442695, %v1686_v5  ;;  %v1669_v29 = vadd.f32 %v3467_v43, %v1668_v7 }
 0x717   :  { %v3825_v51 = vpop.f32.mrf.mxu0 }
 0x718   :  { %4392 = vpow2.f32 %v3475_v13  ;;  %v1687_v14 = vadd.f32 %v1682_v11, %v1669_v29  ;;  %v4338_v51 = vld [vmem:[%s5628_s9 + $0x88] sm:$0xff]  }
 0x719   :  { %v1673_v15 = vpop.f32.mrf.mxu0  ;;  %3847 = vmatpush3.bf16.msra.mxu0 %v4338_v51 }
 0x71a   :  { %v3476_v59 = vmul.f32 -1.442695, %v1687_v14  ;;  %v1674_v9 = vadd.f32 %v3467_v43, %v1673_v15  ;;  %3848 = vmatprep.subr.bf16.mxu0 %v4468_v2  ;;  %v4339_v14 = vld [vmem:[%s5628_s9 + $0x80] sm:$0xff]   ;;  %v4340_v15 = vld [vmem:[%s5628_s9 + $0x78] sm:$0xff]  }
 0x71b   :  { %v3828_v17 = vpop.f32.mrf.mxu0  ;;  %3738 = vmatprep.subr.bf16.mxu1 %v4340_v15 }
 0x71c   :  { %4394 = vpow2.f32 %v3476_v59  ;;  %v1688_v6 = vadd.f32 %v1683_v16, %v1674_v9  ;;  %v4341_v16 = vld [vmem:[%s5628_s9 + $0x38] sm:$0xff]   ;;  %v4342_v59 = vld [vmem:[%s5628_s9 + $0x70] sm:$0xff]   ;;  %v4344_v17 = vld [vmem:[%s5628_s9 + $0x68] sm:$0xff]  }
 0x71d   :  { %v4389_v47 = vpop.eup %4388  ;;  %v1676_v8 = vpop.f32.mrf.mxu0  ;;  %3849 = vmatpush3.bf16.msra.mxu0 %v4339_v14  ;;  %3739 = vmatpush3.bf16.msra.mxu1 %v4341_v16  ;;  %v4343_v9 = vld [vmem:[%s5628_s9 + $0x30] sm:$0xff]  }
 0x71e   :  { %v1704_v21 = vadd.f32 1.0, %v4389_v47  ;;  %v3477_v0 = vmul.f32 -1.442695, %v1688_v6  ;;  %3862 = vmatprep.subr.bf16.mxu0 %v4468_v2  ;;  %3740 = vmatprep.subr.bf16.mxu1 %v4342_v59  ;;  %v4345_v6 = vld [vmem:[%s5628_s9 + $0x28] sm:$0xff]   ;;  %v4346_v47 = vld [vmem:[%s5628_s9 + $0x60] sm:$0xff]  }
 0x71f   :  { %v3829_v25 = vpop.f32.mrf.mxu0  ;;  %v4347_v8 = vld [vmem:[%s5628_s9 + $0x20] sm:$0xff]  }
 0x720   :  { %4396 = vrcp.f32 %v1704_v21  ;;  %v4348_v21 = vld [vmem:[%s5628_s9 + $0x58] sm:$0xff]  }
 0x721   :  { %v4391_v26 = vpop.eup %4390  ;;  %4398 = vpow2.f32 %v3477_v0  ;;  %3741 = vmatpush3.bf16.msra.mxu1 %v4343_v9  ;;  %v4349_v0 = vld [vmem:[%s5628_s9 + $0x18] sm:$0xff]  }
 0x722   :  { %v1705_v38 = vadd.f32 1.0, %v4391_v26  ;;  %3742 = vmatprep.subr.bf16.mxu1 %v4344_v17 }
 0x724   :  { %4400 = vrcp.f32 %v1705_v38 }
 0x725   :  { %v4393_v62 = vpop.eup %4392  ;;  %3743 = vmatpush3.bf16.msra.mxu1 %v4345_v6 }
 0x726   :  { %v1706_v18 = vadd.f32 1.0, %v4393_v62  ;;  %3744 = vmatprep.subr.bf16.mxu1 %v4346_v47 }
 0x728   :  { %4402 = vrcp.f32 %v1706_v18 }
 0x729   :  { %v4395_v30 = vpop.eup %4394  ;;  %3745 = vmatpush3.bf16.msra.mxu1 %v4347_v8 }
 0x72a   :  { %v1707_v20 = vadd.f32 1.0, %v4395_v30  ;;  %3746 = vmatprep.subr.bf16.mxu1 %v4348_v21 }
 0x72c   :  { %4404 = vrcp.f32 %v1707_v20 }
 0x72d   :  { %v4397_v27 = vpop.eup %4396  ;;  %3747 = vmatpush3.bf16.msra.mxu1 %v4349_v0 }
 0x72e   :  { %v4399_v32 = vpop.eup %4398  ;;  %1719 = vst [vmem:[#allocation3] sm:$0xff] %v4397_v27 }
 0x72f   :  { %v1708_v34 = vadd.f32 1.0, %v4399_v32 }
 0x731   :  { %v4401_v36 = vpop.eup %4400  ;;  %4406 = vrcp.f32 %v1708_v34 }
 0x732   :  { %1720 = vst [vmem:[#allocation3 + $0x8] sm:$0xff] %v4401_v36 }
 0x735   :  { %v4403_v37 = vpop.eup %4402 }
 0x736   :  { %1721 = vst [vmem:[#allocation3 + $0x10] sm:$0xff] %v4403_v37 }
 0x739   :  { %v4405_v23 = vpop.eup %4404 }
 0x73a   :  { %1722 = vst [vmem:[#allocation3 + $0x18] sm:$0xff] %v4405_v23 }
 0x73e   :  { %v4407_v41 = vpop.eup %4406 }
 0x73f   :  { %1723 = vst [vmem:[#allocation3 + $0x20] sm:$0xff] %v4407_v41 }
 0x787   :  { %v3722_v42 = vpop.f32.mrf.mxu0 }
 0x789   :  { %v3723_v46 = vpop.f32.mrf.mxu0 }
 0x78a   :  { %v3724_v22 = vadd.f32 %v3723_v46, %v3722_v42 }
 0x78b   :  { %v3725_v48 = vpop.f32.mrf.mxu0 }
 0x78c   :  { %v2523_v24 = vadd.f32 %v3724_v22, %v3503_v45 }
 0x78d   :  { %v3726_v50 = vpop.f32.mrf.mxu0 }
 0x78e   :  { %v5367_v55 = vadd.f32 %v2571_v31, %v2523_v24  ;;  %v3727_v40 = vadd.f32 %v3726_v50, %v3725_v48 }
 0x790   :  { %v2526_v28 = vadd.f32 %v3727_v40, %v3503_v45  ;;  %v2586_v52 = vsel %vm55_vm0, %v5367_v55, 0.0  ;;  %v2602_v56 = vmul.f32 %v5367_v55, %v5367_v55 }
 0x791   :  { %2587 = vadd.xlane.f32.xlu1 %v2586_v52 }
 0x792   :  { %v5371_v43 = vadd.f32 %v2574_v44, %v2526_v28  ;;  %v2606_v58 = vsel %vm55_vm0, %v2602_v56, 0.0 }
 0x793   :  { %v3728_v54 = vpop.f32.mrf.mxu0 }
 0x794   :  { %v2589_v19 = vsel %vm55_vm0, %v5371_v43, 0.0  ;;  %v2603_v12 = vmul.f32 %v5371_v43, %v5371_v43 }
 0x795   :  { %v3729_v60 = vpop.f32.mrf.mxu0  ;;  %2590 = vadd.xlane.f32.xlu0 %v2589_v19 }
 0x796   :  { %v3730_v10 = vadd.f32 %v3729_v60, %v3728_v54  ;;  %v2609_v49 = vsel %vm55_vm0, %v2603_v12, 0.0  ;;  %v3524_v12 = vld [vmem:[%s5626_s7] ss:$0 sm:$0xff] }
 0x797   :  { %v3731_v57 = vpop.f32.mrf.mxu0  ;;  %2610 = vadd.xlane.f32.xlu1 %v2609_v49  ;;  %v3525_v49 = vld [vmem:[%s5627_s8] ss:$0 sm:$0xff] }
 0x798   :  { %v2531_v39 = vadd.f32 %v3730_v10, %v3503_v45 }
 0x799   :  { %v3732_v61 = vpop.f32.mrf.mxu0  ;;  %2607 = vadd.xlane.f32.xlu0 %v2606_v58 }
 0x79a   :  { %v5381_v53 = vadd.f32 %v3844_v33, %v2531_v39  ;;  %v3733_v63 = vadd.f32 %v3732_v61, %v3731_v57 }
 0x79c   :  { %v2534_v1 = vadd.f32 %v3733_v63, %v3503_v45  ;;  %v2592_v3 = vsel %vm55_vm0, %v5381_v53, 0.0  ;;  %v2604_v4 = vmul.f32 %v5381_v53, %v5381_v53 }
 0x79d   :  { %2593 = vadd.xlane.f32.xlu0 %v2592_v3 }
 0x79e   :  { %v5387_v5 = vadd.f32 %v3845_v35, %v2534_v1  ;;  %v2612_v7 = vsel %vm55_vm0, %v2604_v4, 0.0  ;;  %v4351_v1 = vld [vmem:[%s5628_s9 + $0x10] sm:$0xff]  }
 0x7a0   :  { %v2595_v11 = vsel %vm55_vm0, %v5387_v5, 0.0  ;;  %v2605_v13 = vmul.f32 %v5387_v5, %v5387_v5 }
 0x7a1   :  { %2613 = vadd.xlane.f32.xlu0 %v2612_v7  ;;  %2596 = vadd.xlane.f32.xlu1 %v2595_v11 }
 0x7a2   :  { %v2615_v29 = vsel %vm55_vm0, %v2605_v13, 0.0  ;;  %v4352_v13 = vld [vmem:[%s5628_s9 + $0x48] sm:$0xff]  }
 0x7a5   :  { %2616 = vadd.xlane.f32.xlu1 %v2615_v29 }
 0x81a   :  { %v2588_v25 = vpop.xlane.xlu1 %2587 }
 0x81b   :  { %v2598_v38 = vmul.f32 0.03125, %v2588_v25 }
 0x81d   :  { %v2622_v32 = vmul.f32 %v2598_v38, %v2598_v38  ;;  %v2630_v56 = vsub.f32 %v5367_v55, %v2598_v38  ;;  %v4350_v55 = vld [vmem:[%s5628_s9 + $0x50] sm:$0xff]  }
 0x81e   :  { %v2591_v26 = vpop.xlane.xlu0 %2590  ;;  %3748 = vmatprep.subr.bf16.mxu1 %v4350_v55 }
 0x81f   :  { %v2599_v62 = vmul.f32 0.03125, %v2591_v26  ;;  %3749 = vmatpush3.bf16.msra.mxu1 %v4351_v1 }
 0x820   :  { %v2611_v18 = vpop.xlane.xlu1 %2610  ;;  %3750 = vmatprep.subr.bf16.mxu1 %v4352_v13 }
 0x821   :  { %v2623_v30 = vmul.f32 %v2599_v62, %v2599_v62  ;;  %v2619_v20 = vmul.f32 0.03125, %v2611_v18  ;;  %v2631_v44 = vsub.f32 %v5371_v43, %v2599_v62 }
 0x822   :  { %v2608_v27 = vpop.xlane.xlu0 %2607 }
 0x823   :  { %v2627_v34 = vsub.f32 %v2619_v20, %v2623_v30  ;;  %v2618_v36 = vmul.f32 0.03125, %v2608_v27  ;;  %v4354_v30 = vld [vmem:[%s5628_s9 + $0x40] sm:$0xff]  }
 0x824   :  { %v4355_v20 = vld [vmem:[%s5628_s9] sm:$0xff]  }
 0x825   :  { %v2635_v37 = vadd.f32 1e-05, %v2627_v34  ;;  %v2626_v23 = vsub.f32 %v2618_v36, %v2622_v32 }
 0x826   :  { %v2594_v41 = vpop.xlane.xlu0 %2593 }
 0x827   :  { %4408 = vrsqrt.f32 %v2635_v37  ;;  %v2634_v33 = vadd.f32 1e-05, %v2626_v23  ;;  %v2600_v42 = vmul.f32 0.03125, %v2594_v41 }
 0x829   :  { %4410 = vrsqrt.f32 %v2634_v33  ;;  %v2624_v46 = vmul.f32 %v2600_v42, %v2600_v42  ;;  %v2632_v63 = vsub.f32 %v5381_v53, %v2600_v42  ;;  %v4353_v53 = vld [vmem:[%s5628_s9 + $0x8] sm:$0xff]  }
 0x82a   :  { %v2614_v31 = vpop.xlane.xlu0 %2613  ;;  %v2597_v45 = vpop.xlane.xlu1 %2596  ;;  %3751 = vmatpush3.bf16.msra.mxu1 %v4353_v53 }
 0x82b   :  { %v2620_v22 = vmul.f32 0.03125, %v2614_v31  ;;  %v2601_v48 = vmul.f32 0.03125, %v2597_v45  ;;  %3752 = vmatprep.subr.bf16.mxu1 %v4354_v30 }
 0x82d   :  { %v2628_v24 = vsub.f32 %v2620_v22, %v2624_v46  ;;  %v2625_v40 = vmul.f32 %v2601_v48, %v2601_v48  ;;  %v2633_v11 = vsub.f32 %v5387_v5, %v2601_v48 }
 0x82e   :  { %v2617_v35 = vpop.xlane.xlu1 %2616  ;;  %3753 = vmatpush3.bf16.msra.mxu1 %v4355_v20 }
 0x82f   :  { %v2636_v50 = vadd.f32 1e-05, %v2628_v24  ;;  %v2621_v28 = vmul.f32 0.03125, %v2617_v35 }
 0x831   :  { %4412 = vrsqrt.f32 %v2636_v50  ;;  %v2629_v52 = vsub.f32 %v2621_v28, %v2625_v40 }
 0x833   :  { %v2637_v54 = vadd.f32 1e-05, %v2629_v52 }
 0x834   :  { %v4409_v19 = vpop.eup %4408 }
 0x835   :  { %v2643_v60 = vmul.f32 %v4409_v19, %v2631_v44  ;;  %4414 = vrsqrt.f32 %v2637_v54 }
 0x836   :  { %v4411_v10 = vpop.eup %4410 }
 0x837   :  { %v2654_v57 = vmul.f32 %v3524_v12, %v2643_v60  ;;  %v2642_v39 = vmul.f32 %v4411_v10, %v2630_v56 }
 0x839   :  { %v2665_v58 = vadd.f32 %v3525_v49, %v2654_v57  ;;  %v2653_v61 = vmul.f32 %v3524_v12, %v2642_v39 }
 0x83b   :  { %2669 = vst.msk [vmem:[#allocation2 + $0x40] sm:$0xff] %vm55_vm0, %v2665_v58  ;;  %v2664_v43 = vadd.f32 %v3525_v49, %v2653_v61 }
 0x83d   :  { %2668 = vst.msk [vmem:[#allocation2 + $0x38] sm:$0xff] %vm55_vm0, %v2664_v43 }
 0x83e   :  { %v4413_v3 = vpop.eup %4412 }
 0x83f   :  { %v2644_v4 = vmul.f32 %v4413_v3, %v2632_v63  ;;  %v2712_v63 = vld [vmem:[#allocation2 + $0x58] sm:$0xff] }
 0x840   :  { %v2871_v1 = vpack.c.bf16 %v2712_v63, %v2712_v63 }
 0x841   :  { %v2655_v7 = vmul.f32 %v3524_v12, %v2644_v4 }
 0x842   :  { %v4415_v29 = vpop.eup %4414  ;;  %v5460_v47 = vld [vmem:[#allocation2 + $0x40] sm:$0xff] }
 0x843   :  { %v2666_v51 = vadd.f32 %v3525_v49, %v2655_v7  ;;  %v2645_v14 = vmul.f32 %v4415_v29, %v2633_v11 }
 0x844   :  { %v2697_v15 = vld [vmem:[#allocation2 + $0x35] sm:$0xff]  ;;  %v2698_v16 = vld [vmem:[#allocation2 + $0x3d] sm:$0xff] }
 0x845   :  { %v2677_v59 = vld [vmem:[#allocation2 + $0x31] sm:$0xff]  ;;  %2670 = vst.msk [vmem:[#allocation2 + $0x48] sm:$0xff] %vm55_vm0, %v2666_v51  ;;  %v2656_v9 = vmul.f32 %v3524_v12, %v2645_v14  ;;  %v4171_v5 = vpack.i.bf16 %v2698_v16, %v2697_v15  ;;  %v2678_v17 = vld [vmem:[#allocation2 + $0x39] sm:$0xff] }
 0x846   :  { %v5458_v6 = vld [vmem:[#allocation2 + $0x38] sm:$0xff]  ;;  %v4176_v8 = vpack.i.bf16 %v2678_v17, %v2677_v59  ;;  %v2672_v59 = vld [vmem:[#allocation2 + $0x30] sm:$0xff] }
 0x847   :  { %v2865_v21 = vpack.c.bf16 %v5460_v47, %v5458_v6  ;;  %v2682_v0 = vld [vmem:[#allocation2 + $0x32] sm:$0xff]  ;;  %v2683_v25 = vld [vmem:[#allocation2 + $0x3a] sm:$0xff]  ;;  %v2667_v26 = vadd.f32 %v3525_v49, %v2656_v9  ;;  %4172 = vrot.lane.b32.xlu0 %v4171_v5, %s4470_s29 }
 0x848   :  { %v2702_v38 = vld [vmem:[#allocation2 + $0x36] sm:$0xff]  ;;  %v2703_v62 = vld [vmem:[#allocation2 + $0x3e] sm:$0xff]  ;;  %4177 = vrot.lane.b32.xlu1 %v4176_v8, %s4470_s29  ;;  %v4186_v18 = vpack.i.bf16 %v2683_v25, %v2682_v0 }
 0x849   :  { %3851 = vmatmul.mubr.msk.bf16.vlgmr.msra.gmra.mxu0 %vm55_vm0, %v2865_v21  ;;  %2671 = vst.msk [vmem:[#allocation2 + $0x50] sm:$0xff] %vm55_vm0, %v2667_v26  ;;  %v4181_v27 = vpack.i.bf16 %v2703_v62, %v2702_v38  ;;  %v2687_v32 = vld [vmem:[#allocation2 + $0x33] sm:$0xff]  ;;  %v2688_v34 = vld [vmem:[#allocation2 + $0x3b] sm:$0xff] }
 0x84a   :  { %3854 = vmatprep.mubr.msk.bf16.mxu0 %vm4472_vm3, %v4468_v2  ;;  %v2707_v36 = vld [vmem:[#allocation2 + $0x37] sm:$0xff]  ;;  %v2708_v37 = vld [vmem:[#allocation2 + $0x3f] sm:$0xff]  ;;  %v4196_v23 = vpack.i.bf16 %v2688_v34, %v2687_v32 }
 0x84b   :  { %4187 = vrot.lane.b32.xlu0 %v4186_v18, %s4469_s26  ;;  %v4191_v41 = vpack.i.bf16 %v2708_v37, %v2707_v36  ;;  %v2692_v17 = vld [vmem:[#allocation2 + $0x34] sm:$0xff]  ;;  %v2693_v8 = vld [vmem:[#allocation2 + $0x3c] sm:$0xff] }
 0x84c   :  { %4182 = vrot.lane.b32.xlu1 %v4181_v27, %s4469_s26  ;;  %v2699_v33 = vld [vmem:[#allocation2 + $0x45] sm:$0xff] }
 0x84d   :  { %v2679_v42 = vld [vmem:[#allocation2 + $0x41] sm:$0xff] }
 0x84e   :  { %v5479_v31 = vld [vmem:[#allocation2 + $0x48] sm:$0xff] }
 0x84f   :  { %4197 = vrot.lane.b32.xlu0 %v4196_v23, %s4471_s24  ;;  %v2684_v28 = vld [vmem:[#allocation2 + $0x42] sm:$0xff] }
 0x850   :  { %4192 = vrot.lane.b32.xlu1 %v4191_v41, %s4471_s24  ;;  %v2700_v45 = vld [vmem:[#allocation2 + $0x4d] sm:$0xff]  ;;  %v2689_v56 = vld [vmem:[#allocation2 + $0x43] sm:$0xff]  ;;  %v2706_v39 = vld [vmem:[#allocation2 + $0x56] sm:$0xff] }
 0x851   :  { %v2680_v46 = vld [vmem:[#allocation2 + $0x49] sm:$0xff]  ;;  %v4201_v48 = vpack.i.bf16 %v2700_v45, %v2699_v33  ;;  %v2686_v57 = vld [vmem:[#allocation2 + $0x52] sm:$0xff] }
 0x852   :  { %v5482_v22 = vld [vmem:[#allocation2 + $0x50] sm:$0xff]  ;;  %v4206_v24 = vpack.i.bf16 %v2680_v46, %v2679_v42  ;;  %v2704_v52 = vld [vmem:[#allocation2 + $0x46] sm:$0xff]  ;;  %v4236_v43 = vpack.i.bf16 %v2686_v57, %v2706_v39 }
 0x853   :  { %v2868_v35 = vpack.c.bf16 %v5482_v22, %v5479_v31  ;;  %v2685_v50 = vld [vmem:[#allocation2 + $0x4a] sm:$0xff]  ;;  %v2701_v61 = vld [vmem:[#allocation2 + $0x55] sm:$0xff] }
 0x854   :  { %4207 = vrot.lane.b32.xlu0 %v4206_v24, %s4470_s29  ;;  %v2705_v40 = vld [vmem:[#allocation2 + $0x4e] sm:$0xff]  ;;  %4202 = vrot.lane.b32.xlu1 %v4201_v48, %s4470_s29  ;;  %v4216_v44 = vpack.i.bf16 %v2685_v50, %v2684_v28  ;;  %v2711_v4 = vld [vmem:[#allocation2 + $0x57] sm:$0xff]  ;;  %v2694_v57 = vld [vmem:[#allocation2 + $0x44] sm:$0xff] }
 0x855   :  { %3855 = vmatmul.mubr.msk.bf16.gmra.mxu0 %vm55_vm0, %v2868_v35  ;;  %v4211_v54 = vpack.i.bf16 %v2705_v40, %v2704_v52  ;;  %v2690_v19 = vld [vmem:[#allocation2 + $0x4b] sm:$0xff]  ;;  %v2691_v3 = vld [vmem:[#allocation2 + $0x53] sm:$0xff] }
 0x856   :  { %3858 = vmatprep.mubr.msk.bf16.mxu0 %vm4472_vm3, %v4468_v2  ;;  %v2710_v12 = vld [vmem:[#allocation2 + $0x4f] sm:$0xff]  ;;  %v2709_v60 = vld [vmem:[#allocation2 + $0x47] sm:$0xff]  ;;  %v4226_v10 = vpack.i.bf16 %v2690_v19, %v2689_v56  ;;  %v4241_v7 = vpack.i.bf16 %v2691_v3, %v2711_v4 }
 0x857   :  { %v4221_v49 = vpack.i.bf16 %v2710_v12, %v2709_v60  ;;  %v2681_v58 = vld [vmem:[#allocation2 + $0x51] sm:$0xff] }
 0x858   :  { %4217 = vrot.lane.b32.xlu0 %v4216_v44, %s4469_s26  ;;  %4212 = vrot.lane.b32.xlu1 %v4211_v54, %s4469_s26  ;;  %v4231_v55 = vpack.i.bf16 %v2681_v58, %v2701_v61  ;;  %v2695_v39 = vld [vmem:[#allocation2 + $0x4c] sm:$0xff] }
 0x85c   :  { %4227 = vrot.lane.b32.xlu0 %v4226_v10, %s4471_s24  ;;  %4222 = vrot.lane.b32.xlu1 %v4221_v49, %s4471_s24 }
 0x85d   :  { %3859 = vmatmul.mubr.msk.bf16.gmra.mxu0 %vm55_vm0, %v2871_v1 }
 0x85e   :  { %3866 = vmatprep.mubr.msk.bf16.mxu0 %vm4472_vm3, %v4468_v2 }
 0x860   :  { %4237 = vrot.lane.b32.xlu0 %v4236_v43, %s4469_s26  ;;  %4232 = vrot.lane.b32.xlu1 %v4231_v55, %s4470_s29 }
 0x864   :  { %4242 = vrot.lane.b32.xlu1 %v4241_v7, %s4471_s24 }
 0x8b9   :  { %v4173_v11 = vpop.permute.xlu0 %4172 }
 0x8ba   :  { %v4178_v13 = vpop.permute.xlu1 %4177  ;;  %v4175_v53 = vunpack.i.h.bf16 %v4173_v11  ;;  %v4174_v29 = vunpack.i.l.bf16 %v4173_v11 }
 0x8bb   :  { %v4180_v14 = vunpack.i.h.bf16 %v4178_v13  ;;  %v4179_v15 = vunpack.i.l.bf16 %v4178_v13 }
 0x8bc   :  { %v2848_v25 = vsel %vm55_vm0, %v2692_v17, %v4174_v29  ;;  %v2849_v26 = vsel %vm55_vm0, %v2693_v8, %v4175_v53 }
 0x8bd   :  { %v4188_v51 = vpop.permute.xlu0 %4187  ;;  %v2834_v62 = vsel %vm55_vm0, %v5458_v6, %v4180_v14  ;;  %v2833_v18 = vsel %vm55_vm0, %v2672_v59, %v4179_v15 }
 0x8be   :  { %v4183_v16 = vpop.permute.xlu1 %4182  ;;  %v4190_v9 = vunpack.i.h.bf16 %v4188_v51  ;;  %v4189_v5 = vunpack.i.l.bf16 %v4188_v51 }
 0x8bf   :  { %v4185_v21 = vunpack.i.h.bf16 %v4183_v16  ;;  %v4184_v0 = vunpack.i.l.bf16 %v4183_v16 }
 0x8c0   :  { %v2838_v32 = vsel %vm172_vm1, %v2833_v18, %v4189_v5  ;;  %v2839_v34 = vsel %vm172_vm1, %v2834_v62, %v4190_v9 }
 0x8c1   :  { %v4198_v38 = vpop.permute.xlu0 %4197  ;;  %v2854_v23 = vsel %vm172_vm1, %v2849_v26, %v4185_v21  ;;  %v2853_v41 = vsel %vm172_vm1, %v2848_v25, %v4184_v0  ;;  %v2696_v21 = vld [vmem:[#allocation2 + $0x54] sm:$0xff] }
 0x8c2   :  { %v4200_v30 = vunpack.i.h.bf16 %v4198_v38  ;;  %v4199_v20 = vunpack.i.l.bf16 %v4198_v38  ;;  %v4193_v27 = vpop.permute.xlu1 %4192 }
 0x8c3   :  { %v4195_v36 = vunpack.i.h.bf16 %v4193_v27  ;;  %v4194_v37 = vunpack.i.l.bf16 %v4193_v27 }
 0x8c4   :  { %v2843_v33 = vsel %vm176_vm2, %v2838_v32, %v4199_v20  ;;  %v2844_v42 = vsel %vm176_vm2, %v2839_v34, %v4200_v30 }
 0x8c5   :  { %v2863_v6 = vpack.c.bf16 %v2844_v42, %v2843_v33  ;;  %v2858_v46 = vsel %vm176_vm2, %v2853_v41, %v4194_v37  ;;  %v2859_v48 = vsel %vm176_vm2, %v2854_v23, %v4195_v36 }
 0x8c6   :  { %v4208_v45 = vpop.permute.xlu0 %4207  ;;  %v4203_v24 = vpop.permute.xlu1 %4202  ;;  %v2864_v35 = vpack.c.bf16 %v2859_v48, %v2858_v46 }
 0x8c7   :  { %v4210_v50 = vunpack.i.h.bf16 %v4208_v45  ;;  %v4209_v40 = vunpack.i.l.bf16 %v4208_v45  ;;  %v4205_v52 = vunpack.i.h.bf16 %v4203_v24  ;;  %v4204_v44 = vunpack.i.l.bf16 %v4203_v24 }
 0x8c8   :  { %3064 = vmatprep.mubr.bf16.mxu1 %v2864_v35 }
 0x8c9   :  { %3065 = vmatmul.mubr.bf16.vlgmr.msra.gmra.mxu1 %v2863_v6  ;;  %v2836_v10 = vsel %vm55_vm0, %v5479_v31, %v4210_v50  ;;  %v2835_v49 = vsel %vm55_vm0, %v5460_v47, %v4209_v40  ;;  %v2851_v61 = vsel %vm55_vm0, %v2695_v39, %v4205_v52  ;;  %v2850_v43 = vsel %vm55_vm0, %v2694_v57, %v4204_v44  ;;  %v3526_v50 = vld [vmem:[%s5629_s10] ss:$0 sm:$0xff] }
 0x8ca   :  { %v4218_v28 = vpop.permute.xlu0 %4217  ;;  %v4213_v54 = vpop.permute.xlu1 %4212 }
 0x8cb   :  { %v4220_v19 = vunpack.i.h.bf16 %v4218_v28  ;;  %v4219_v12 = vunpack.i.l.bf16 %v4218_v28  ;;  %v4215_v56 = vunpack.i.h.bf16 %v4213_v54  ;;  %v4214_v60 = vunpack.i.l.bf16 %v4213_v54 }
 0x8cd   :  { %v2840_v3 = vsel %vm172_vm1, %v2835_v49, %v4219_v12  ;;  %v2841_v4 = vsel %vm172_vm1, %v2836_v10, %v4220_v19  ;;  %v2855_v31 = vsel %vm172_vm1, %v2850_v43, %v4214_v60  ;;  %v2856_v47 = vsel %vm172_vm1, %v2851_v61, %v4215_v56 }
 0x8ce   :  { %v4228_v58 = vpop.permute.xlu0 %4227  ;;  %v4223_v1 = vpop.permute.xlu1 %4222 }
 0x8cf   :  { %v4230_v63 = vunpack.i.h.bf16 %v4228_v58  ;;  %v4229_v55 = vunpack.i.l.bf16 %v4228_v58  ;;  %v4225_v7 = vunpack.i.h.bf16 %v4223_v1  ;;  %v4224_v11 = vunpack.i.l.bf16 %v4223_v1 }
 0x8d1   :  { %v2845_v13 = vsel %vm176_vm2, %v2840_v3, %v4229_v55  ;;  %v2846_v53 = vsel %vm176_vm2, %v2841_v4, %v4230_v63  ;;  %v2860_v51 = vsel %vm176_vm2, %v2855_v31, %v4224_v11  ;;  %v2861_v14 = vsel %vm176_vm2, %v2856_v47, %v4225_v7 }
 0x8d2   :  { %v4238_v29 = vpop.permute.xlu0 %4237  ;;  %v2866_v15 = vpack.c.bf16 %v2846_v53, %v2845_v13  ;;  %v4233_v16 = vpop.permute.xlu1 %4232  ;;  %v2867_v59 = vpack.c.bf16 %v2861_v14, %v2860_v51 }
 0x8d3   :  { %v4235_v9 = vunpack.i.h.bf16 %v4233_v16  ;;  %v4234_v5 = vunpack.i.l.bf16 %v4233_v16  ;;  %v4240_v17 = vunpack.i.h.bf16 %v4238_v29  ;;  %v4239_v8 = vunpack.i.l.bf16 %v4238_v29 }
 0x8d4   :  { %3072 = vmatprep.mubr.bf16.mxu1 %v2867_v59 }
 0x8d5   :  { %v2837_v0 = vsel %vm55_vm0, %v5482_v22, %v4235_v9  ;;  %v2852_v25 = vsel %vm55_vm0, %v2696_v21, %v4234_v5  ;;  %3073 = vmatmul.mubr.bf16.gmra.mxu1 %v2866_v15 }
 0x8d6   :  { %v4243_v26 = vpop.permute.xlu1 %4242  ;;  %v2857_v18 = vsel %vm172_vm1, %v2852_v25, %v4239_v8  ;;  %v2842_v30 = vsel %vm172_vm1, %v2837_v0, %v4240_v17 }
 0x8d7   :  { %v4245_v38 = vunpack.i.h.bf16 %v4243_v26  ;;  %v4244_v62 = vunpack.i.l.bf16 %v4243_v26 }
 0x8d9   :  { %v2862_v20 = vsel %vm176_vm2, %v2857_v18, %v4244_v62  ;;  %v2847_v27 = vsel %vm176_vm2, %v2842_v30, %v4245_v38  ;;  %v4356_v38 = vld [vmem:[%s5632_s13 + $0x8] sm:$0xff]   ;;  %v4357_v62 = vld [vmem:[%s5632_s13] sm:$0xff]  }
 0x8da   :  { %v2870_v32 = vpack.c.bf16 %v2862_v20, %v2862_v20  ;;  %v2869_v34 = vpack.c.bf16 %v2847_v27, %v2847_v27  ;;  %3863 = vmatpush3.bf16.msra.mxu0 %v4356_v38 }
 0x8db   :  { %3864 = vmatprep.subr.bf16.mxu0 %v4468_v2 }
 0x8dc   :  { %3080 = vmatprep.mubr.bf16.mxu1 %v2870_v32 }
 0x8dd   :  { %3081 = vmatmul.mubr.bf16.gmra.mxu1 %v2869_v34 }
 0x8de   :  { %3865 = vmatpush3.bf16.msra.mxu0 %v4357_v62 }
 0x909   :  { %v3122_v36 = vpop.f32.mrf.mxu0 }
 0x90b   :  { %v3852_v22 = vpop.f32.mrf.mxu0 }
 0x90d   :  { %v3125_v37 = vpop.f32.mrf.mxu0 }
 0x90f   :  { %v3853_v23 = vpop.f32.mrf.mxu0 }
 0x915   :  { %v3130_v41 = vpop.f32.mrf.mxu0 }
 0x917   :  { %v3856_v33 = vpop.f32.mrf.mxu0 }
 0x919   :  { %v3133_v42 = vpop.f32.mrf.mxu0 }
 0x91b   :  { %v3857_v6 = vpop.f32.mrf.mxu0 }
 0x91d   :  { %v3138_v45 = vpop.f32.mrf.mxu0 }
 0x91f   :  { %v3860_v46 = vpop.f32.mrf.mxu0 }
 0x921   :  { %v3141_v48 = vpop.f32.mrf.mxu0 }
 0x923   :  { %v3861_v24 = vpop.f32.mrf.mxu0 }
 0x989   :  { %v3754_v35 = vpop.f32.mrf.mxu1 }
 0x98b   :  { %v3755_v40 = vpop.f32.mrf.mxu1 }
 0x98c   :  { %v3756_v28 = vadd.f32 %v3755_v40, %v3754_v35 }
 0x98d   :  { %v3757_v52 = vpop.f32.mrf.mxu1 }
 0x98e   :  { %v3067_v44 = vadd.f32 %v3756_v28, %v3526_v50 }
 0x98f   :  { %v3758_v54 = vpop.f32.mrf.mxu1 }
 0x990   :  { %v5538_v19 = vadd.f32 %v3122_v36, %v3067_v44  ;;  %v3759_v12 = vadd.f32 %v3758_v54, %v3757_v52 }
 0x992   :  { %v3070_v56 = vadd.f32 %v3759_v12, %v3526_v50  ;;  %v3144_v60 = vsel %vm55_vm0, %v5538_v19, 0.0  ;;  %v3164_v10 = vmul.f32 %v5538_v19, %v5538_v19 }
 0x993   :  { %3145 = vadd.xlane.f32.xlu0 %v3144_v60 }
 0x994   :  { %v5544_v49 = vadd.f32 %v3125_v37, %v3070_v56  ;;  %v3169_v58 = vsel %vm55_vm0, %v3164_v10, 0.0 }
 0x995   :  { %v3760_v57 = vpop.f32.mrf.mxu1 }
 0x996   :  { %v3147_v39 = vsel %vm55_vm0, %v5544_v49, 0.0  ;;  %v3165_v61 = vmul.f32 %v5544_v49, %v5544_v49 }
 0x997   :  { %v3761_v43 = vpop.f32.mrf.mxu1  ;;  %3148 = vadd.xlane.f32.xlu1 %v3147_v39  ;;  %3170 = vadd.xlane.f32.xlu0 %v3169_v58 }
 0x998   :  { %v3762_v63 = vadd.f32 %v3761_v43, %v3760_v57  ;;  %v3172_v3 = vsel %vm55_vm0, %v3165_v61, 0.0 }
 0x999   :  { %v3763_v55 = vpop.f32.mrf.mxu1 }
 0x99a   :  { %v3075_v1 = vadd.f32 %v3762_v63, %v3526_v50 }
 0x99b   :  { %v3764_v4 = vpop.f32.mrf.mxu1  ;;  %3173 = vadd.xlane.f32.xlu0 %v3172_v3 }
 0x99c   :  { %v5552_v7 = vadd.f32 %v3130_v41, %v3075_v1  ;;  %v3765_v11 = vadd.f32 %v3764_v4, %v3763_v55  ;;  %v3548_v1 = vld [vmem:[%s5630_s11] ss:$0 sm:$0xff] }
 0x99d   :  { %v3766_v31 = vpop.f32.mrf.mxu1 }
 0x99e   :  { %v3078_v47 = vadd.f32 %v3765_v11, %v3526_v50  ;;  %v3150_v13 = vsel %vm55_vm0, %v5552_v7, 0.0  ;;  %v3166_v53 = vmul.f32 %v5552_v7, %v5552_v7 }
 0x99f   :  { %v3767_v29 = vpop.f32.mrf.mxu1  ;;  %3151 = vadd.xlane.f32.xlu1 %v3150_v13  ;;  %v3549_v13 = vld [vmem:[%s5631_s12] ss:$0 sm:$0xff] }
 0x9a0   :  { %v5558_v51 = vadd.f32 %v3133_v42, %v3078_v47  ;;  %v3768_v14 = vadd.f32 %v3767_v29, %v3766_v31  ;;  %v3175_v59 = vsel %vm55_vm0, %v3166_v53, 0.0 }
 0x9a1   :  { %v3769_v15 = vpop.f32.mrf.mxu1 }
 0x9a2   :  { %v3083_v16 = vadd.f32 %v3768_v14, %v3526_v50  ;;  %v3153_v9 = vsel %vm55_vm0, %v5558_v51, 0.0  ;;  %v3167_v5 = vmul.f32 %v5558_v51, %v5558_v51 }
 0x9a3   :  { %v3770_v17 = vpop.f32.mrf.mxu1  ;;  %3176 = vadd.xlane.f32.xlu1 %v3175_v59  ;;  %3154 = vadd.xlane.f32.xlu0 %v3153_v9 }
 0x9a4   :  { %v5565_v8 = vadd.f32 %v3138_v45, %v3083_v16  ;;  %v3178_v0 = vsel %vm55_vm0, %v3167_v5, 0.0 }
 0x9a6   :  { %v3156_v21 = vsel %vm55_vm0, %v5565_v8, 0.0  ;;  %v3168_v25 = vmul.f32 %v5565_v8, %v5565_v8 }
 0x9a7   :  { %3157 = vadd.xlane.f32.xlu1 %v3156_v21  ;;  %3179 = vadd.xlane.f32.xlu0 %v3178_v0 }
 0x9a8   :  { %v3181_v26 = vsel %vm55_vm0, %v3168_v25, 0.0 }
 0x9ab   :  { %3182 = vadd.xlane.f32.xlu0 %v3181_v26 }
 0xa1c   :  { %v3146_v18 = vpop.xlane.xlu0 %3145 }
 0xa1d   :  { %v3159_v30 = vmul.f32 0.03125, %v3146_v18 }
 0xa1f   :  { %v3189_v32 = vmul.f32 %v3159_v30, %v3159_v30  ;;  %v3199_v10 = vsub.f32 %v5538_v19, %v3159_v30 }
 0xa20   :  { %v3149_v20 = vpop.xlane.xlu1 %3148  ;;  %v3171_v27 = vpop.xlane.xlu0 %3170 }
 0xa21   :  { %v3160_v34 = vmul.f32 0.03125, %v3149_v20  ;;  %v3184_v36 = vmul.f32 0.03125, %v3171_v27 }
 0xa23   :  { %v3194_v22 = vsub.f32 %v3184_v36, %v3189_v32  ;;  %v3190_v23 = vmul.f32 %v3160_v34, %v3160_v34  ;;  %v3200_v3 = vsub.f32 %v5544_v49, %v3160_v34  ;;  %v3556_v32 = vld [vmem:[%s5634_s15 + $0x28] sm:$0xff] }
 0xa24   :  { %v3174_v37 = vpop.xlane.xlu0 %3173 }
 0xa25   :  { %v3204_v41 = vadd.f32 1e-05, %v3194_v22  ;;  %v3185_v33 = vmul.f32 0.03125, %v3174_v37 }
 0xa27   :  { %4416 = vrsqrt.f32 %v3204_v41  ;;  %v3195_v42 = vsub.f32 %v3185_v33, %v3190_v23 }
 0xa28   :  { %v3152_v6 = vpop.xlane.xlu1 %3151 }
 0xa29   :  { %v3205_v45 = vadd.f32 1e-05, %v3195_v42  ;;  %v3161_v46 = vmul.f32 0.03125, %v3152_v6 }
 0xa2b   :  { %4418 = vrsqrt.f32 %v3205_v45  ;;  %v3191_v35 = vmul.f32 %v3161_v46, %v3161_v46  ;;  %v3201_v15 = vsub.f32 %v5552_v7, %v3161_v46  ;;  %v3558_v46 = vld [vmem:[%s5634_s15 + $0x38] sm:$0xff] }
 0xa2c   :  { %v3177_v48 = vpop.xlane.xlu1 %3176  ;;  %v3155_v24 = vpop.xlane.xlu0 %3154 }
 0xa2d   :  { %v3186_v50 = vmul.f32 0.03125, %v3177_v48  ;;  %v3162_v40 = vmul.f32 0.03125, %v3155_v24 }
 0xa2f   :  { %v3196_v28 = vsub.f32 %v3186_v50, %v3191_v35  ;;  %v3192_v12 = vmul.f32 %v3162_v40, %v3162_v40  ;;  %v3202_v9 = vsub.f32 %v5558_v51, %v3162_v40  ;;  %v3550_v51 = vld [vmem:[%s5633_s14] ss:$0 sm:$0xff] }
 0xa30   :  { %v3158_v52 = vpop.xlane.xlu1 %3157  ;;  %v3180_v44 = vpop.xlane.xlu0 %3179  ;;  %v3559_v40 = vld [vmem:[%s5634_s15 + $0x40] sm:$0xff] }
 0xa31   :  { %v3206_v54 = vadd.f32 1e-05, %v3196_v28  ;;  %v3163_v56 = vmul.f32 0.03125, %v3158_v52  ;;  %v3187_v60 = vmul.f32 0.03125, %v3180_v44 }
 0xa33   :  { %4420 = vrsqrt.f32 %v3206_v54  ;;  %v3197_v57 = vsub.f32 %v3187_v60, %v3192_v12  ;;  %v3193_v43 = vmul.f32 %v3163_v56, %v3163_v56  ;;  %v3203_v0 = vsub.f32 %v5565_v8, %v3163_v56  ;;  %v3560_v60 = vld [vmem:[%s5634_s15 + $0x48] sm:$0xff] }
 0xa34   :  { %v4417_v39 = vpop.eup %4416  ;;  %v3183_v58 = vpop.xlane.xlu0 %3182 }
 0xa35   :  { %v3214_v61 = vmul.f32 %v4417_v39, %v3199_v10  ;;  %v3207_v63 = vadd.f32 1e-05, %v3197_v57  ;;  %v3188_v55 = vmul.f32 0.03125, %v3183_v58 }
 0xa37   :  { %4422 = vrsqrt.f32 %v3207_v63  ;;  %v3198_v4 = vsub.f32 %v3188_v55, %v3193_v43  ;;  %v3226_v31 = vmul.f32 %v3548_v1, %v3214_v61 }
 0xa38   :  { %v4419_v11 = vpop.eup %4418 }
 0xa39   :  { %v3215_v47 = vmul.f32 %v4419_v11, %v3200_v3  ;;  %v3208_v19 = vadd.f32 1e-05, %v3198_v4  ;;  %v3238_v29 = vadd.f32 %v3549_v13, %v3226_v31 }
 0xa3b   :  { %v3227_v53 = vmul.f32 %v3548_v1, %v3215_v47  ;;  %4424 = vrsqrt.f32 %v3208_v19 }
 0xa3d   :  { %v3239_v14 = vadd.f32 %v3549_v13, %v3227_v53 }
 0xa3f   :  { %v3243_v16 = vpack.c.bf16 %v3239_v14, %v3238_v29 }
 0xa40   :  { %v4421_v59 = vpop.eup %4420 }
 0xa41   :  { %3867 = vmatmul.mubr.msk.bf16.vlgmr.msra.gmra.mxu0 %vm55_vm0, %v3243_v16  ;;  %v3216_v49 = vmul.f32 %v4421_v59, %v3201_v15 }
 0xa42   :  { %3870 = vmatprep.mubr.msk.bf16.mxu0 %vm4472_vm3, %v4468_v2 }
 0xa43   :  { %v3228_v21 = vmul.f32 %v3548_v1, %v3216_v49 }
 0xa44   :  { %v4423_v5 = vpop.eup %4422 }
 0xa45   :  { %v3217_v17 = vmul.f32 %v4423_v5, %v3202_v9  ;;  %v3240_v38 = vadd.f32 %v3549_v13, %v3228_v21 }
 0xa47   :  { %v3229_v25 = vmul.f32 %v3548_v1, %v3217_v17 }
 0xa48   :  { %v4425_v26 = vpop.eup %4424 }
 0xa49   :  { %v3241_v62 = vadd.f32 %v3549_v13, %v3229_v25  ;;  %v3218_v7 = vmul.f32 %v4425_v26, %v3203_v0 }
 0xa4b   :  { %v3244_v18 = vpack.c.bf16 %v3241_v62, %v3240_v38  ;;  %v3230_v30 = vmul.f32 %v3548_v1, %v3218_v7 }
 0xa4d   :  { %3871 = vmatmul.mubr.msk.bf16.gmra.mxu0 %vm55_vm0, %v3244_v18  ;;  %v3242_v20 = vadd.f32 %v3549_v13, %v3230_v30 }
 0xa4e   :  { %3874 = vmatprep.mubr.msk.bf16.mxu0 %vm4472_vm3, %v4468_v2  ;;  %v3557_v2 = vld [vmem:[%s5634_s15 + $0x30] sm:$0xff]  ;;  %s4473_s15 = smov [#allocation3]  }
 0xa4f   :  { %v3245_v27 = vpack.c.bf16 %v3242_v20, %v3242_v20  ;;  %s3386_s19 = sshll.u32 %s4473_s15, 4  ;;  %s3387_s19 = int_to_ptr.vmem [resolvable:$true] %s3386_s19 }
 0xa50   :  { %s4446_s20 = scalar_lea.vmem %s3387_s19, 1280  ;;  %p4451_p1 = scmp.lt.s32.totalorder %s3387_s19, %s3387_s19 }
 0xa51   :  { %p4447_p0 = scmp.ne.s32.totalorder %s3387_s19, %s4446_s20  ;;  %p4452_p2 = scmp.lt.s32.totalorder %s4446_s20, %s4446_s20 }
 0xa53   :  { %p4453_p3 = por %p4452_p2, %p4451_p1 }
 0xa55   :  { %3875 = vmatmul.mubr.msk.bf16.gmra.mxu0 %vm55_vm0, %v3245_v27  ;;  %p4454_p4 = pnand %p4453_p3, %p4447_p0 }
 0xb01   :  { %v3312_v8 = vpop.f32.mrf.mxu0 }
 0xb02   :  { %v3313_v34 = vadd.f32 %v3550_v51, %v3312_v8 }
 0xb03   :  { %v3868_v36 = vpop.f32.mrf.mxu0 }
 0xb04   :  { %v3340_v22 = vadd.f32 %v3556_v32, %v3313_v34 }
 0xb05   :  { %v3315_v37 = vpop.f32.mrf.mxu0 }
 0xb06   :  { %v3561_v23 = vmul.f32 -1.442695, %v3340_v22  ;;  %v3316_v41 = vadd.f32 %v3550_v51, %v3315_v37 }
 0xb07   :  { %v3869_v33 = vpop.f32.mrf.mxu0 }
 0xb08   :  { %4426 = vpow2.f32 %v3561_v23  ;;  %v3341_v42 = vadd.f32 %v3557_v2, %v3316_v41 }
 0xb0a   :  { %v3562_v6 = vmul.f32 -1.442695, %v3341_v42 }
 0xb0c   :  { %4428 = vpow2.f32 %v3562_v6 }
 0xb0d   :  { %v3320_v45 = vpop.f32.mrf.mxu0 }
 0xb0e   :  { %v3321_v48 = vadd.f32 %v3550_v51, %v3320_v45 }
 0xb0f   :  { %v3872_v24 = vpop.f32.mrf.mxu0 }
 0xb10   :  { %v3342_v35 = vadd.f32 %v3558_v46, %v3321_v48 }
 0xb11   :  { %v3323_v50 = vpop.f32.mrf.mxu0 }
 0xb12   :  { %v3563_v28 = vmul.f32 -1.442695, %v3342_v35  ;;  %v3324_v52 = vadd.f32 %v3550_v51, %v3323_v50 }
 0xb13   :  { %v3873_v44 = vpop.f32.mrf.mxu0 }
 0xb14   :  { %4430 = vpow2.f32 %v3563_v28  ;;  %v3343_v54 = vadd.f32 %v3559_v40, %v3324_v52 }
 0xb15   :  { %v4427_v12 = vpop.eup %4426  ;;  %v3328_v56 = vpop.f32.mrf.mxu0 }
 0xb16   :  { %v3360_v10 = vadd.f32 1.0, %v4427_v12  ;;  %v3564_v57 = vmul.f32 -1.442695, %v3343_v54  ;;  %v3329_v39 = vadd.f32 %v3550_v51, %v3328_v56 }
 0xb17   :  { %v3876_v58 = vpop.f32.mrf.mxu0 }
 0xb18   :  { %4432 = vrcp.f32 %v3360_v10  ;;  %v3344_v61 = vadd.f32 %v3560_v60, %v3329_v39 }
 0xb19   :  { %v4429_v43 = vpop.eup %4428  ;;  %4434 = vpow2.f32 %v3564_v57  ;;  %v3331_v63 = vpop.f32.mrf.mxu0 }
 0xb1a   :  { %v3361_v55 = vadd.f32 1.0, %v4429_v43  ;;  %v3565_v1 = vmul.f32 -1.442695, %v3344_v61 }
 0xb1b   :  { %v3877_v3 = vpop.f32.mrf.mxu0 }
 0xb1c   :  { %4436 = vrcp.f32 %v3361_v55 }
 0xb1d   :  { %4438 = vpow2.f32 %v3565_v1 }
 0xb21   :  { %v4431_v4 = vpop.eup %4430 }
 0xb22   :  { %v3362_v11 = vadd.f32 1.0, %v4431_v4 }
 0xb24   :  { %4440 = vrcp.f32 %v3362_v11 }
 0xb25   :  { %v4433_v31 = vpop.eup %4432 }
 0xb26   :  { %v4435_v47 = vpop.eup %4434  ;;  %3376 = vst [vmem:[#allocation3 + $0x28] sm:$0xff] %v4433_v31 }
 0xb27   :  { %v3363_v19 = vadd.f32 1.0, %v4435_v47 }
 0xb29   :  { %v4437_v13 = vpop.eup %4436  ;;  %4442 = vrcp.f32 %v3363_v19 }
 0xb2a   :  { %v4439_v53 = vpop.eup %4438  ;;  %3377 = vst [vmem:[#allocation3 + $0x30] sm:$0xff] %v4437_v13 }
 0xb2b   :  { %v3364_v29 = vadd.f32 1.0, %v4439_v53 }
 0xb2d   :  { %4444 = vrcp.f32 %v3364_v29 }
 0xb31   :  { %v4441_v14 = vpop.eup %4440 }
 0xb32   :  { %3378 = vst [vmem:[#allocation3 + $0x38] sm:$0xff] %v4441_v14 }
 0xb36   :  { %v4443_v15 = vpop.eup %4442 }
 0xb37   :  { %3379 = vst [vmem:[#allocation3 + $0x40] sm:$0xff] %v4443_v15 }
 0xb3a   :  { %v4445_v16 = vpop.eup %4444 }
 0xb3b   :  { %3380 = vst [vmem:[#allocation3 + $0x48] sm:$0xff] %v4445_v16 }
 0xb3c   :  { %4457 = shalt.err (!%p4454_p4)
}
 0xb3d   :  { %s4474_s1 = smov 128   ;;  %s4475_s21 = smov 8  }
 0xb3e   :  { %3392 = dma.vmem_to_hbm [thread:$0]  %s3387_s19, 1280, %s5635_s16, [#allocation4], %s4474_s1, %s4474_s1, %s4475_s21  }
 0xb3f   :  { %4466 = dma.done.wait [#allocation4], 1280  }
 0xb40   :  { %4467 = vsyncadd [#allocation4], 4294966016 }
 0xb41   :  { %3396 = vsyncpa [#allocation4], 1 }

</bundles_post_ra>
